<compile_context>
chip_gen: v5e
topology: v5e:2x2
jax: 0.10.0
libtpu: 0.0.40
codegen_flags: <defaults>
</compile_context>

<pallas_src>
import jax
import jax.numpy as jnp
from jax.experimental import pallas as pl
from jax.experimental.pallas import tpu as pltpu


def _layernorm(h, g, b, eps=1e-5):
    """Single-pass layernorm over the last axis (f32 math)."""
    inv_n = jnp.float32(1.0 / h.shape[-1])
    mu = jnp.sum(h, axis=-1, keepdims=True) * inv_n
    ms = jnp.sum(h * h, axis=-1, keepdims=True) * inv_n
    var = ms - mu * mu
    return (h - mu) * jax.lax.rsqrt(var + jnp.float32(eps)) * g + b


def encoder_pool_kernel(x_ref, mask_bias_ref, mask_s1_ref,
                        wqkv_ref, wo_ref,
                        ln1_g_ref, ln1_b_ref,
                        w1_ref, b1_ref, w2_ref, b2_ref,
                        ln2_g_ref, ln2_b_ref,
                        out_ref):
    # x_ref:         (TB, S, H) bf16  block of token embeddings
    # mask_bias_ref: (TB, 1, S) f32   additive key-mask bias (0 keep / -1e9 pad)
    # mask_s1_ref:   (TB, S, 1) f32   pooling mask (1 keep / 0 pad)
    # weights:       bf16 (matmuls); LN params / biases f32
    # out_ref:       (TB, H)    f32   sentence embeddings for this block
    TB, S, H = x_ref.shape

    x_bf = x_ref[...]                                        # (TB, S, H) bf16
    x2d_bf = x_bf.reshape(TB * S, H)                         # MXU rows
    x2d = x2d_bf.astype(jnp.float32)                         # f32 residual path

    # --- fused QKV projection: one (TB*S, H) x (H, 3H) matmul, f32 accumulate
    qkv = jnp.dot(x2d_bf, wqkv_ref[...],
                  preferred_element_type=jnp.float32)        # (TB*S, 3H)
    q = qkv[:, 0 * H:1 * H].reshape(TB, S, H).astype(jnp.bfloat16)
    k = qkv[:, 1 * H:2 * H].reshape(TB, S, H).astype(jnp.bfloat16)
    v = qkv[:, 2 * H:3 * H].reshape(TB, S, H).astype(jnp.bfloat16)

    # --- single-head attention (per-sequence batched matmuls, no explicit .T)
    # NOTE: at S=8 the (S,S) score tiles are lane-narrow; acceptable here (tiny
    # FLOP fraction).  At real dims keep the key-block width a multiple of 128.
    scale = jnp.float32(1.0) / jnp.sqrt(jnp.float32(H))
    scores = jnp.einsum('bqd,bkd->bqk', q, k,
                        preferred_element_type=jnp.float32) * scale   # (TB,S,S)
    scores = scores + mask_bias_ref[...]                     # precomputed bias

    m = jnp.max(scores, axis=-1, keepdims=True)
    p = jnp.exp(scores - m)
    # approx reciprocal (EUP slot): probs sum to ~1 (tiny per-row bias, within
    # tolerance); pooling-denominator error later cancels under L2 norm.
    p = p * pl.reciprocal(jnp.sum(p, axis=-1, keepdims=True), approx=True)

    attn = jnp.einsum('bqk,bkd->bqd', p.astype(jnp.bfloat16), v,
                      preferred_element_type=jnp.float32)    # (TB, S, H)
    attn = jnp.dot(attn.reshape(TB * S, H).astype(jnp.bfloat16), wo_ref[...],
                   preferred_element_type=jnp.float32)       # (TB*S, H)

    # residual + layernorm 1 (f32)
    h = _layernorm(x2d + attn, ln1_g_ref[...], ln1_b_ref[...])

    # --- feed-forward (bf16 matmuls, f32 accumulate / bias / relu)
    f = jnp.dot(h.astype(jnp.bfloat16), w1_ref[...],
                preferred_element_type=jnp.float32) + b1_ref[...]
    f = jnp.maximum(f, 0.0)
    f = jnp.dot(f.astype(jnp.bfloat16), w2_ref[...],
                preferred_element_type=jnp.float32) + b2_ref[...]

    # residual + layernorm 2
    h2 = _layernorm(h + f, ln2_g_ref[...], ln2_b_ref[...]).reshape(TB, S, H)

    # --- masked mean pooling: VPU multiply + sublane reduce (MXU stays free)
    mask_s1 = mask_s1_ref[...]                               # (TB, S, 1)
    pooled = jnp.sum(h2 * mask_s1, axis=1)                   # (TB, H)
    denom = jnp.sum(mask_s1, axis=1)                         # (TB, 1)
    pooled = pooled * pl.reciprocal(denom + jnp.float32(1e-9), approx=True)

    # --- L2 normalization (sentence_embedding)
    # NOTE: fully-padded sequences produce an all-zero embedding (not NaN).
    sq = jnp.sum(pooled * pooled, axis=-1, keepdims=True)
    pooled = pooled * jax.lax.rsqrt(sq + jnp.float32(1e-12))

    out_ref[...] = pooled.astype(out_ref.dtype)


def _min_grid_steps():
    """Keep >=2 parallel grid steps only on v7x (2 TensorCores/chip)."""
    try:
        kind = jax.devices()[0].device_kind.lower()
        if "v7" in kind:
            return 2
    except Exception:
        pass
    return 1


def _choose_block_batch(B, S, H, F, *, min_steps, vmem_budget_bytes=8 << 20):
    """Largest TB dividing B whose f32 intermediates + streamed block fit a
    conservative VMEM budget, keeping >= min_steps grid steps when B allows."""
    best = 1
    for tb in range(1, B + 1):
        if B % tb:
            continue
        if (B // tb) < min(min_steps, B):
            continue
        rows = tb * S
        # f32 intermediates: qkv + scores/p + ffn hidden + h/h2
        interm = 4 * (rows * 3 * H + 2 * tb * S * S + rows * F + 2 * rows * H)
        # streamed x block (bf16, double-buffered) + both masks (f32)
        stream = 2 * (2 * rows * H) + 4 * (2 * tb * S)
        if interm + stream > vmem_budget_bytes:
            continue
        best = tb
    return best


def prepare_kernel_params(params):
    """One-time prep (outside the per-call path): fuse QKV, cast matmul
    weights + embedding table to bf16, keep LN params / biases f32."""
    bf16 = lambda a: a.astype(jnp.bfloat16)
    return {
        "emb": bf16(params["emb"]),
        "wqkv": bf16(jnp.concatenate([params["wq"], params["wk"], params["wv"]],
                                     axis=1)),
        "wo": bf16(params["wo"]),
        "ln1_g": params["ln1_g"], "ln1_b": params["ln1_b"],
        "w1": bf16(params["w1"]), "b1": params["b1"],
        "w2": bf16(params["w2"]), "b2": params["b2"],
        "ln2_g": params["ln2_g"], "ln2_b": params["ln2_b"],
    }


def sentence_embedding(input_ids, attention_mask, kparams, *, block_b=None):
    """Forward pass of ModelWrapper: returns outputs['sentence_embedding'] [B, H]."""
    B, S = input_ids.shape
    H = kparams["emb"].shape[1]
    F = kparams["w1"].shape[1]

    if block_b is None:
        block_b = _choose_block_batch(B, S, H, F, min_steps=_min_grid_steps())
    assert B % block_b == 0

    # Glue: embedding gather in plain JAX (bf16 table halves the HBM traffic).
    # TODO(synk): at real model dims, fuse this gather into the kernel via
    # scalar-prefetched input_ids + a pl.Element row index_map / manual DMA
    # gather to avoid the (B,S,H) HBM round trip.
    x = jnp.take(kparams["emb"], input_ids, axis=0)                     # (B,S,H) bf16

    mask_f = attention_mask.astype(jnp.float32)
    mask_bias = ((mask_f - 1.0) * jnp.float32(1e9)).reshape(B, 1, S)    # (B,1,S)
    mask_s1 = mask_f.reshape(B, S, 1)                                   # (B,S,1)

    # TODO(synk): at real sentence-transformer dims (H=768/F=3072), add
    # pipeline_mode=pl.Buffered(1) to the constant-weight specs below and set
    # vmem_limit_bytes in CompilerParams for v7x's 64 MiB VMEM.
    full = lambda shape: pl.BlockSpec(shape, lambda b: (0,) * len(shape))

    out = pl.pallas_call(
        encoder_pool_kernel,
        out_shape=jax.ShapeDtypeStruct((B, H), jnp.float32),
        grid_spec=pltpu.PrefetchScalarGridSpec(
            num_scalar_prefetch=0,
            grid=(B // block_b,),
            in_specs=[
                pl.BlockSpec((block_b, S, H), lambda b: (b, 0, 0)),   # x (bf16)
                pl.BlockSpec((block_b, 1, S), lambda b: (b, 0, 0)),   # mask bias
                pl.BlockSpec((block_b, S, 1), lambda b: (b, 0, 0)),   # pool mask
                full((H, 3 * H)),                                     # wqkv
                full((H, H)),                                         # wo
                full((1, H)), full((1, H)),                           # ln1 g/b
                full((H, F)), full((1, F)),                           # w1 b1
                full((F, H)), full((1, H)),                           # w2 b2
                full((1, H)), full((1, H)),                           # ln2 g/b
            ],
            out_specs=pl.BlockSpec((block_b, H), lambda b: (b, 0)),
        ),
        compiler_params=pltpu.CompilerParams(
            dimension_semantics=("parallel",)),
    )(x, mask_bias, mask_s1,
      kparams["wqkv"], kparams["wo"],
      kparams["ln1_g"], kparams["ln1_b"],
      kparams["w1"], kparams["b1"],
      kparams["w2"], kparams["b2"],
      kparams["ln2_g"], kparams["ln2_b"])
    return out


# ----------------------- pure-JAX reference (f32) -----------------------------
def _ln_ref(h, g, b, eps=1e-5):
    mu = jnp.mean(h, axis=-1, keepdims=True)
    var = jnp.mean((h - mu) ** 2, axis=-1, keepdims=True)
    return (h - mu) * jax.lax.rsqrt(var + eps) * g + b


def sentence_embedding_ref(input_ids, attention_mask, params):
    x = jnp.take(params["emb"], input_ids, axis=0).astype(jnp.float32)
    mask = attention_mask.astype(jnp.float32)
    H = x.shape[-1]
    q = x @ params["wq"]; k = x @ params["wk"]; v = x @ params["wv"]
    scores = jnp.einsum('bqd,bkd->bqk', q, k) / jnp.sqrt(jnp.float32(H))
    scores = scores + (1.0 - mask[:, None, :]) * jnp.float32(-1e9)
    p = jax.nn.softmax(scores, axis=-1)
    attn = jnp.einsum('bqk,bkd->bqd', p, v) @ params["wo"]
    h = _ln_ref(x + attn, params["ln1_g"], params["ln1_b"])
    f = jnp.maximum(h @ params["w1"] + params["b1"], 0.0) @ params["w2"] + params["b2"]
    h2 = _ln_ref(h + f, params["ln2_g"], params["ln2_b"])
    denom = jnp.sum(mask, axis=-1, keepdims=True) + 1e-9
    pooled = jnp.einsum('bs,bsh->bh', mask, h2) / denom
    return pooled * jax.lax.rsqrt(jnp.sum(pooled ** 2, -1, keepdims=True) + 1e-12)


def init_params(key, vocab=64, hidden=128, ffn=256):
    ks = jax.random.split(key, 8)
    s = 0.02
    return {
        "emb": s * jax.random.normal(ks[0], (vocab, hidden), jnp.float32),
        "wq": s * jax.random.normal(ks[1], (hidden, hidden), jnp.float32),
        "wk": s * jax.random.normal(ks[2], (hidden, hidden), jnp.float32),
        "wv": s * jax.random.normal(ks[3], (hidden, hidden), jnp.float32),
        "wo": s * jax.random.normal(ks[4], (hidden, hidden), jnp.float32),
        "ln1_g": jnp.ones((1, hidden), jnp.float32),
        "ln1_b": jnp.zeros((1, hidden), jnp.float32),
        "w1": s * jax.random.normal(ks[5], (hidden, ffn), jnp.float32),
        "b1": jnp.zeros((1, ffn), jnp.float32),
        "w2": s * jax.random.normal(ks[6], (ffn, hidden), jnp.float32),
        "b2": jnp.zeros((1, hidden), jnp.float32),
        "ln2_g": jnp.ones((1, hidden), jnp.float32),
        "ln2_b": jnp.zeros((1, hidden), jnp.float32),
    }


if __name__ == "__main__":
    # Lane/sublane-aligned small dims: S multiple of 8, H/F multiples of 128.
    B, S, H, F, V = 16, 8, 128, 256, 64
    key = jax.random.PRNGKey(0)
    k_ids, k_params = jax.random.split(key)

    input_ids = jax.random.randint(k_ids, (B, S), 0, V, dtype=jnp.int32)
    # Every other sequence has trailing padding to exercise the mask.
    lens = jnp.where(jnp.arange(B) % 2 == 0, S, S - 3)
    attention_mask = (jnp.arange(S)[None, :] < lens[:, None]).astype(jnp.int32)

    params = init_params(k_params, vocab=V, hidden=H, ffn=F)
    kparams = prepare_kernel_params(params)   # one-time: fused QKV, bf16 weights

    emb = sentence_embedding(input_ids, attention_mask, kparams)
    emb = jax.block_until_ready(emb)
    assert emb.shape == (B, H) and emb.dtype == jnp.float32
    assert bool(jnp.all(jnp.isfinite(emb)))

    # Tolerance check vs. f32 reference (kernel matmuls are bf16-fed, f32-acc;
    # x itself is streamed bf16).
    ref = sentence_embedding_ref(input_ids, attention_mask, params)
    err = float(jnp.max(jnp.abs(emb - ref)))
    assert err < 3e-2, f"max abs error {err} too large"
    print("KERNEL_OK")
</pallas_src>

<mosaic_0001>
module attributes {stable_mosaic.version = 11 : i64} {
  func.func @encoder_pool_kernel(%arg0: i32, %arg1: memref<16x8x128xbf16, #tpu.memory_space<vmem>>, %arg2: memref<16x1x8xf32, #tpu.memory_space<vmem>>, %arg3: memref<16x8x1xf32, #tpu.memory_space<vmem>>, %arg4: memref<128x384xbf16, #tpu.memory_space<vmem>>, %arg5: memref<128x128xbf16, #tpu.memory_space<vmem>>, %arg6: memref<1x128xf32, #tpu.memory_space<vmem>>, %arg7: memref<1x128xf32, #tpu.memory_space<vmem>>, %arg8: memref<128x256xbf16, #tpu.memory_space<vmem>>, %arg9: memref<1x256xf32, #tpu.memory_space<vmem>>, %arg10: memref<256x128xbf16, #tpu.memory_space<vmem>>, %arg11: memref<1x128xf32, #tpu.memory_space<vmem>>, %arg12: memref<1x128xf32, #tpu.memory_space<vmem>>, %arg13: memref<1x128xf32, #tpu.memory_space<vmem>>, %arg14: memref<16x128xf32, #tpu.memory_space<vmem>>) attributes {dimension_semantics = [#tpu.dimension_semantics<parallel>], iteration_bounds = array<i64: 1>, scalar_prefetch = 0 : i64, scratch_operands = 0 : i64, tpu.core_type = #tpu.core_type<tc>, window_params = [{transform_indices = @transform_0, window_bounds = array<i64: 16, 8, 128>}, {transform_indices = @transform_1, window_bounds = array<i64: 16, 1, 8>}, {transform_indices = @transform_2, window_bounds = array<i64: 16, 8, 1>}, {pipeline_mode = #tpu.pipeline_mode<synchronous>, transform_indices = @transform_3, window_bounds = array<i64: 128, 384>}, {pipeline_mode = #tpu.pipeline_mode<synchronous>, transform_indices = @transform_4, window_bounds = array<i64: 128, 128>}, {pipeline_mode = #tpu.pipeline_mode<synchronous>, transform_indices = @transform_5, window_bounds = array<i64: 1, 128>}, {pipeline_mode = #tpu.pipeline_mode<synchronous>, transform_indices = @transform_6, window_bounds = array<i64: 1, 128>}, {pipeline_mode = #tpu.pipeline_mode<synchronous>, transform_indices = @transform_7, window_bounds = array<i64: 128, 256>}, {pipeline_mode = #tpu.pipeline_mode<synchronous>, transform_indices = @transform_8, window_bounds = array<i64: 1, 256>}, {pipeline_mode = #tpu.pipeline_mode<synchronous>, transform_indices = @transform_9, window_bounds = array<i64: 256, 128>}, {pipeline_mode = #tpu.pipeline_mode<synchronous>, transform_indices = @transform_10, window_bounds = array<i64: 1, 128>}, {pipeline_mode = #tpu.pipeline_mode<synchronous>, transform_indices = @transform_11, window_bounds = array<i64: 1, 128>}, {pipeline_mode = #tpu.pipeline_mode<synchronous>, transform_indices = @transform_12, window_bounds = array<i64: 1, 128>}, {transform_indices = @transform_13, window_bounds = array<i64: 16, 128>}]} {
    %c0 = arith.constant 0 : index
    %c0_0 = arith.constant 0 : index
    %c0_1 = arith.constant 0 : index
    %0 = vector.load %arg1[%c0, %c0_0, %c0_1] : memref<16x8x128xbf16, #tpu.memory_space<vmem>>, vector<16x8x128xbf16>
    %1 = vector.shape_cast %0 : vector<16x8x128xbf16> to vector<128x128xbf16>
    %2 = arith.extf %1 : vector<128x128xbf16> to vector<128x128xf32>
    %c0_2 = arith.constant 0 : index
    %c0_3 = arith.constant 0 : index
    %3 = vector.load %arg4[%c0_2, %c0_3] : memref<128x384xbf16, #tpu.memory_space<vmem>>, vector<128x384xbf16>
    %cst = arith.constant dense<0.000000e+00> : vector<128x384xf32>
    %4 = tpu.matmul %1, %3, %cst {dimension_numbers = #tpu.dot_dimension_numbers<[1], [0], [0], [1], [0, 0, 1, 1], [], []>} : vector<128x128xbf16>, vector<128x384xbf16>, vector<128x384xf32> -> vector<128x384xf32>
    %5 = vector.extract_strided_slice %4 {offsets = [0, 0], sizes = [128, 128], strides = [1, 1]} : vector<128x384xf32> to vector<128x128xf32>
    %6 = vector.shape_cast %5 : vector<128x128xf32> to vector<16x8x128xf32>
    %7 = arith.truncf %6 : vector<16x8x128xf32> to vector<16x8x128xbf16>
    %8 = vector.extract_strided_slice %4 {offsets = [0, 128], sizes = [128, 128], strides = [1, 1]} : vector<128x384xf32> to vector<128x128xf32>
    %9 = vector.shape_cast %8 : vector<128x128xf32> to vector<16x8x128xf32>
    %10 = arith.truncf %9 : vector<16x8x128xf32> to vector<16x8x128xbf16>
    %11 = vector.extract_strided_slice %4 {offsets = [0, 256], sizes = [128, 128], strides = [1, 1]} : vector<128x384xf32> to vector<128x128xf32>
    %12 = vector.shape_cast %11 : vector<128x128xf32> to vector<16x8x128xf32>
    %13 = arith.truncf %12 : vector<16x8x128xf32> to vector<16x8x128xbf16>
    %cst_4 = arith.constant 1.280000e+02 : f32
    %14 = math.sqrt %cst_4 : f32
    %cst_5 = arith.constant 1.000000e+00 : f32
    %15 = arith.divf %cst_5, %14 : f32
    "tpu.trace_start"() <{level = 10 : i32, message = "bqd,bkd->bqk"}> : () -> ()
    %cst_6 = arith.constant dense<0.000000e+00> : vector<16x8x8xf32>
    %16 = tpu.matmul %7, %10, %cst_6 {dimension_numbers = #tpu.dot_dimension_numbers<[2], [2], [1], [1], [0, 0, 0, 1, 1, 1], [0], [0]>} : vector<16x8x128xbf16>, vector<16x8x128xbf16>, vector<16x8x8xf32> -> vector<16x8x8xf32>
    "tpu.trace_stop"() : () -> ()
    %17 = vector.broadcast %15 : f32 to vector<16x8x8xf32>
    %18 = arith.mulf %16, %17 : vector<16x8x8xf32>
    %c0_7 = arith.constant 0 : index
    %c0_8 = arith.constant 0 : index
    %c0_9 = arith.constant 0 : index
    %19 = vector.load %arg2[%c0_7, %c0_8, %c0_9] : memref<16x1x8xf32, #tpu.memory_space<vmem>>, vector<16x1x8xf32>
    %20 = vector.broadcast %19 : vector<16x1x8xf32> to vector<16x8x8xf32>
    %21 = arith.addf %18, %20 : vector<16x8x8xf32>
    %cst_10 = arith.constant dense<0xFF800000> : vector<16x8xf32>
    %22 = vector.multi_reduction <maximumf>, %21, %cst_10 [2] : vector<16x8x8xf32> to vector<16x8xf32>
    %23 = vector.shape_cast %22 : vector<16x8xf32> to vector<16x8x1xf32>
    %24 = vector.broadcast %23 : vector<16x8x1xf32> to vector<16x8x8xf32>
    %25 = arith.subf %21, %24 : vector<16x8x8xf32>
    %26 = math.exp %25 : vector<16x8x8xf32>
    %cst_11 = arith.constant dense<0.000000e+00> : vector<16x8xf32>
    %27 = vector.multi_reduction <add>, %26, %cst_11 [2] : vector<16x8x8xf32> to vector<16x8xf32>
    %28 = vector.shape_cast %27 : vector<16x8xf32> to vector<16x8x1xf32>
    %29 = tpu.reciprocal %28 {approx = true} : vector<16x8x1xf32> -> vector<16x8x1xf32>
    %30 = vector.broadcast %29 : vector<16x8x1xf32> to vector<16x8x8xf32>
    %31 = arith.mulf %26, %30 : vector<16x8x8xf32>
    %32 = arith.truncf %31 : vector<16x8x8xf32> to vector<16x8x8xbf16>
    "tpu.trace_start"() <{level = 10 : i32, message = "bqk,bkd->bqd"}> : () -> ()
    %cst_12 = arith.constant dense<0.000000e+00> : vector<16x8x128xf32>
    %33 = tpu.matmul %32, %13, %cst_12 {dimension_numbers = #tpu.dot_dimension_numbers<[2], [1], [1], [2], [0, 0, 0, 1, 1, 2], [0], [0]>} : vector<16x8x8xbf16>, vector<16x8x128xbf16>, vector<16x8x128xf32> -> vector<16x8x128xf32>
    "tpu.trace_stop"() : () -> ()
    %34 = vector.shape_cast %33 : vector<16x8x128xf32> to vector<128x128xf32>
    %35 = arith.truncf %34 : vector<128x128xf32> to vector<128x128xbf16>
    %c0_13 = arith.constant 0 : index
    %c0_14 = arith.constant 0 : index
    %36 = vector.load %arg5[%c0_13, %c0_14] : memref<128x128xbf16, #tpu.memory_space<vmem>>, vector<128x128xbf16>
    %cst_15 = arith.constant dense<0.000000e+00> : vector<128x128xf32>
    %37 = tpu.matmul %35, %36, %cst_15 {dimension_numbers = #tpu.dot_dimension_numbers<[1], [0], [0], [1], [0, 0, 1, 1], [], []>} : vector<128x128xbf16>, vector<128x128xbf16>, vector<128x128xf32> -> vector<128x128xf32>
    %38 = arith.addf %2, %37 : vector<128x128xf32>
    %c0_16 = arith.constant 0 : index
    %c0_17 = arith.constant 0 : index
    %39 = vector.load %arg6[%c0_16, %c0_17] : memref<1x128xf32, #tpu.memory_space<vmem>>, vector<1x128xf32>
    %c0_18 = arith.constant 0 : index
    %c0_19 = arith.constant 0 : index
    %40 = vector.load %arg7[%c0_18, %c0_19] : memref<1x128xf32, #tpu.memory_space<vmem>>, vector<1x128xf32>
    %cst_20 = arith.constant dense<0.000000e+00> : vector<128xf32>
    %41 = vector.multi_reduction <add>, %38, %cst_20 [1] : vector<128x128xf32> to vector<128xf32>
    %42 = vector.shape_cast %41 : vector<128xf32> to vector<128x1xf32>
    %cst_21 = arith.constant 7.812500e-03 : f32
    %43 = vector.broadcast %cst_21 : f32 to vector<128x1xf32>
    %44 = arith.mulf %42, %43 : vector<128x1xf32>
    %45 = arith.mulf %38, %38 : vector<128x128xf32>
    %cst_22 = arith.constant dense<0.000000e+00> : vector<128xf32>
    %46 = vector.multi_reduction <add>, %45, %cst_22 [1] : vector<128x128xf32> to vector<128xf32>
    %47 = vector.shape_cast %46 : vector<128xf32> to vector<128x1xf32>
    %cst_23 = arith.constant 7.812500e-03 : f32
    %48 = vector.broadcast %cst_23 : f32 to vector<128x1xf32>
    %49 = arith.mulf %47, %48 : vector<128x1xf32>
    %50 = arith.mulf %44, %44 : vector<128x1xf32>
    %51 = arith.subf %49, %50 : vector<128x1xf32>
    %52 = vector.broadcast %44 : vector<128x1xf32> to vector<128x128xf32>
    %53 = arith.subf %38, %52 : vector<128x128xf32>
    %cst_24 = arith.constant 9.99999974E-6 : f32
    %54 = vector.broadcast %cst_24 : f32 to vector<128x1xf32>
    %55 = arith.addf %51, %54 : vector<128x1xf32>
    %56 = math.rsqrt %55 : vector<128x1xf32>
    %57 = vector.broadcast %56 : vector<128x1xf32> to vector<128x128xf32>
    %58 = arith.mulf %53, %57 : vector<128x128xf32>
    %59 = vector.broadcast %39 : vector<1x128xf32> to vector<128x128xf32>
    %60 = arith.mulf %58, %59 : vector<128x128xf32>
    %61 = vector.broadcast %40 : vector<1x128xf32> to vector<128x128xf32>
    %62 = arith.addf %60, %61 : vector<128x128xf32>
    %63 = arith.truncf %62 : vector<128x128xf32> to vector<128x128xbf16>
    %c0_25 = arith.constant 0 : index
    %c0_26 = arith.constant 0 : index
    %64 = vector.load %arg8[%c0_25, %c0_26] : memref<128x256xbf16, #tpu.memory_space<vmem>>, vector<128x256xbf16>
    %cst_27 = arith.constant dense<0.000000e+00> : vector<128x256xf32>
    %65 = tpu.matmul %63, %64, %cst_27 {dimension_numbers = #tpu.dot_dimension_numbers<[1], [0], [0], [1], [0, 0, 1, 1], [], []>} : vector<128x128xbf16>, vector<128x256xbf16>, vector<128x256xf32> -> vector<128x256xf32>
    %c0_28 = arith.constant 0 : index
    %c0_29 = arith.constant 0 : index
    %66 = vector.load %arg9[%c0_28, %c0_29] : memref<1x256xf32, #tpu.memory_space<vmem>>, vector<1x256xf32>
    %67 = vector.broadcast %66 : vector<1x256xf32> to vector<128x256xf32>
    %68 = arith.addf %65, %67 : vector<128x256xf32>
    %cst_30 = arith.constant 0.000000e+00 : f32
    %69 = vector.broadcast %cst_30 : f32 to vector<128x256xf32>
    %70 = arith.maximumf %68, %69 : vector<128x256xf32>
    %71 = arith.truncf %70 : vector<128x256xf32> to vector<128x256xbf16>
    %c0_31 = arith.constant 0 : index
    %c0_32 = arith.constant 0 : index
    %72 = vector.load %arg10[%c0_31, %c0_32] : memref<256x128xbf16, #tpu.memory_space<vmem>>, vector<256x128xbf16>
    %cst_33 = arith.constant dense<0.000000e+00> : vector<128x128xf32>
    %73 = tpu.matmul %71, %72, %cst_33 {dimension_numbers = #tpu.dot_dimension_numbers<[1], [0], [0], [1], [0, 0, 1, 1], [], []>} : vector<128x256xbf16>, vector<256x128xbf16>, vector<128x128xf32> -> vector<128x128xf32>
    %c0_34 = arith.constant 0 : index
    %c0_35 = arith.constant 0 : index
    %74 = vector.load %arg11[%c0_34, %c0_35] : memref<1x128xf32, #tpu.memory_space<vmem>>, vector<1x128xf32>
    %75 = vector.broadcast %74 : vector<1x128xf32> to vector<128x128xf32>
    %76 = arith.addf %73, %75 : vector<128x128xf32>
    %77 = arith.addf %62, %76 : vector<128x128xf32>
    %c0_36 = arith.constant 0 : index
    %c0_37 = arith.constant 0 : index
    %78 = vector.load %arg12[%c0_36, %c0_37] : memref<1x128xf32, #tpu.memory_space<vmem>>, vector<1x128xf32>
    %c0_38 = arith.constant 0 : index
    %c0_39 = arith.constant 0 : index
    %79 = vector.load %arg13[%c0_38, %c0_39] : memref<1x128xf32, #tpu.memory_space<vmem>>, vector<1x128xf32>
    %cst_40 = arith.constant dense<0.000000e+00> : vector<128xf32>
    %80 = vector.multi_reduction <add>, %77, %cst_40 [1] : vector<128x128xf32> to vector<128xf32>
    %81 = vector.shape_cast %80 : vector<128xf32> to vector<128x1xf32>
    %cst_41 = arith.constant 7.812500e-03 : f32
    %82 = vector.broadcast %cst_41 : f32 to vector<128x1xf32>
    %83 = arith.mulf %81, %82 : vector<128x1xf32>
    %84 = arith.mulf %77, %77 : vector<128x128xf32>
    %cst_42 = arith.constant dense<0.000000e+00> : vector<128xf32>
    %85 = vector.multi_reduction <add>, %84, %cst_42 [1] : vector<128x128xf32> to vector<128xf32>
    %86 = vector.shape_cast %85 : vector<128xf32> to vector<128x1xf32>
    %cst_43 = arith.constant 7.812500e-03 : f32
    %87 = vector.broadcast %cst_43 : f32 to vector<128x1xf32>
    %88 = arith.mulf %86, %87 : vector<128x1xf32>
    %89 = arith.mulf %83, %83 : vector<128x1xf32>
    %90 = arith.subf %88, %89 : vector<128x1xf32>
    %91 = vector.broadcast %83 : vector<128x1xf32> to vector<128x128xf32>
    %92 = arith.subf %77, %91 : vector<128x128xf32>
    %cst_44 = arith.constant 9.99999974E-6 : f32
    %93 = vector.broadcast %cst_44 : f32 to vector<128x1xf32>
    %94 = arith.addf %90, %93 : vector<128x1xf32>
    %95 = math.rsqrt %94 : vector<128x1xf32>
    %96 = vector.broadcast %95 : vector<128x1xf32> to vector<128x128xf32>
    %97 = arith.mulf %92, %96 : vector<128x128xf32>
    %98 = vector.broadcast %78 : vector<1x128xf32> to vector<128x128xf32>
    %99 = arith.mulf %97, %98 : vector<128x128xf32>
    %100 = vector.broadcast %79 : vector<1x128xf32> to vector<128x128xf32>
    %101 = arith.addf %99, %100 : vector<128x128xf32>
    %102 = vector.shape_cast %101 : vector<128x128xf32> to vector<16x8x128xf32>
    %c0_45 = arith.constant 0 : index
    %c0_46 = arith.constant 0 : index
    %c0_47 = arith.constant 0 : index
    %103 = vector.load %arg3[%c0_45, %c0_46, %c0_47] : memref<16x8x1xf32, #tpu.memory_space<vmem>>, vector<16x8x1xf32>
    %104 = vector.broadcast %103 : vector<16x8x1xf32> to vector<16x8x128xf32>
    %105 = arith.mulf %102, %104 : vector<16x8x128xf32>
    %cst_48 = arith.constant dense<0.000000e+00> : vector<16x128xf32>
    %106 = vector.multi_reduction <add>, %105, %cst_48 [1] : vector<16x8x128xf32> to vector<16x128xf32>
    %cst_49 = arith.constant dense<0.000000e+00> : vector<16x1xf32>
    %107 = vector.multi_reduction <add>, %103, %cst_49 [1] : vector<16x8x1xf32> to vector<16x1xf32>
    %cst_50 = arith.constant 9.99999971E-10 : f32
    %108 = vector.broadcast %cst_50 : f32 to vector<16x1xf32>
    %109 = arith.addf %107, %108 : vector<16x1xf32>
    %110 = tpu.reciprocal %109 {approx = true} : vector<16x1xf32> -> vector<16x1xf32>
    %111 = vector.broadcast %110 : vector<16x1xf32> to vector<16x128xf32>
    %112 = arith.mulf %106, %111 : vector<16x128xf32>
    %113 = arith.mulf %112, %112 : vector<16x128xf32>
    %cst_51 = arith.constant dense<0.000000e+00> : vector<16xf32>
    %114 = vector.multi_reduction <add>, %113, %cst_51 [1] : vector<16x128xf32> to vector<16xf32>
    %115 = vector.shape_cast %114 : vector<16xf32> to vector<16x1xf32>
    %cst_52 = arith.constant 9.99999996E-13 : f32
    %116 = vector.broadcast %cst_52 : f32 to vector<16x1xf32>
    %117 = arith.addf %115, %116 : vector<16x1xf32>
    %118 = math.rsqrt %117 : vector<16x1xf32>
    %119 = vector.broadcast %118 : vector<16x1xf32> to vector<16x128xf32>
    %120 = arith.mulf %112, %119 : vector<16x128xf32>
    %c0_53 = arith.constant 0 : index
    %c0_54 = arith.constant 0 : index
    %121 = vector.load %arg14[%c0_53, %c0_54] : memref<16x128xf32, #tpu.memory_space<vmem>>, vector<16x128xf32>
    tpu.vector_store %arg14[%c0_53, %c0_54], %120 {strides = array<i32>} : memref<16x128xf32, #tpu.memory_space<vmem>>, vector<16x128xf32>,
    return
  }
  func.func @transform_0(%arg0: i32) -> (i32, i32, i32) {
    %c0_i32 = arith.constant 0 : i32
    %c0_i32_0 = arith.constant 0 : i32
    %c0_i32_1 = arith.constant 0 : i32
    return %arg0, %c0_i32, %c0_i32_0 : i32, i32, i32
  }
  func.func @transform_1(%arg0: i32) -> (i32, i32, i32) {
    %c0_i32 = arith.constant 0 : i32
    %c0_i32_0 = arith.constant 0 : i32
    %c0_i32_1 = arith.constant 0 : i32
    return %arg0, %c0_i32, %c0_i32_0 : i32, i32, i32
  }
  func.func @transform_2(%arg0: i32) -> (i32, i32, i32) {
    %c0_i32 = arith.constant 0 : i32
    %c0_i32_0 = arith.constant 0 : i32
    %c0_i32_1 = arith.constant 0 : i32
    return %arg0, %c0_i32, %c0_i32_0 : i32, i32, i32
  }
  func.func @transform_3(%arg0: i32) -> (i32, i32) {
    %c0_i32 = arith.constant 0 : i32
    %c0_i32_0 = arith.constant 0 : i32
    %c0_i32_1 = arith.constant 0 : i32
    return %c0_i32, %c0_i32_0 : i32, i32
  }
  func.func @transform_4(%arg0: i32) -> (i32, i32) {
    %c0_i32 = arith.constant 0 : i32
    %c0_i32_0 = arith.constant 0 : i32
    %c0_i32_1 = arith.constant 0 : i32
    return %c0_i32, %c0_i32_0 : i32, i32
  }
  func.func @transform_5(%arg0: i32) -> (i32, i32) {
    %c0_i32 = arith.constant 0 : i32
    %c0_i32_0 = arith.constant 0 : i32
    %c0_i32_1 = arith.constant 0 : i32
    return %c0_i32, %c0_i32_0 : i32, i32
  }
  func.func @transform_6(%arg0: i32) -> (i32, i32) {
    %c0_i32 = arith.constant 0 : i32
    %c0_i32_0 = arith.constant 0 : i32
    %c0_i32_1 = arith.constant 0 : i32
    return %c0_i32, %c0_i32_0 : i32, i32
  }
  func.func @transform_7(%arg0: i32) -> (i32, i32) {
    %c0_i32 = arith.constant 0 : i32
    %c0_i32_0 = arith.constant 0 : i32
    %c0_i32_1 = arith.constant 0 : i32
    return %c0_i32, %c0_i32_0 : i32, i32
  }
  func.func @transform_8(%arg0: i32) -> (i32, i32) {
    %c0_i32 = arith.constant 0 : i32
    %c0_i32_0 = arith.constant 0 : i32
    %c0_i32_1 = arith.constant 0 : i32
    return %c0_i32, %c0_i32_0 : i32, i32
  }
  func.func @transform_9(%arg0: i32) -> (i32, i32) {
    %c0_i32 = arith.constant 0 : i32
    %c0_i32_0 = arith.constant 0 : i32
    %c0_i32_1 = arith.constant 0 : i32
    return %c0_i32, %c0_i32_0 : i32, i32
  }
  func.func @transform_10(%arg0: i32) -> (i32, i32) {
    %c0_i32 = arith.constant 0 : i32
    %c0_i32_0 = arith.constant 0 : i32
    %c0_i32_1 = arith.constant 0 : i32
    return %c0_i32, %c0_i32_0 : i32, i32
  }
  func.func @transform_11(%arg0: i32) -> (i32, i32) {
    %c0_i32 = arith.constant 0 : i32
    %c0_i32_0 = arith.constant 0 : i32
    %c0_i32_1 = arith.constant 0 : i32
    return %c0_i32, %c0_i32_0 : i32, i32
  }
  func.func @transform_12(%arg0: i32) -> (i32, i32) {
    %c0_i32 = arith.constant 0 : i32
    %c0_i32_0 = arith.constant 0 : i32
    %c0_i32_1 = arith.constant 0 : i32
    return %c0_i32, %c0_i32_0 : i32, i32
  }
  func.func @transform_13(%arg0: i32) -> (i32, i32) {
    %c0_i32 = arith.constant 0 : i32
    %c0_i32_0 = arith.constant 0 : i32
    return %arg0, %c0_i32 : i32, i32
  }
}

</mosaic_0001>

<bundles_post_ra>
// kernel: tpu_custom_call.1
= control target key start
LH: loop header
LB: loop body
LE: loop exit
PB: predicated region body
PF: predicated region fallthrough
CT: control target
= control target key end

     0   :  { %18 = vsyncpa [#allocation3], 0  ;;  %s5860_s0 = inlined_call_operand.hbm [shape: bf16[16,8,128], index: 0, kind: input, shape index: {}]   ;;  %s5861_s1 = inlined_call_operand.vmem [shape: f32[16,1,8], index: 1, kind: input, shape index: {}]   ;;  %s5862_s2 = inlined_call_operand.vmem [shape: f32[16,8,1], index: 2, kind: input, shape index: {}]   ;;  %s5863_s3 = inlined_call_operand.hbm [shape: bf16[128,384], index: 3, kind: input, shape index: {}]   ;;  %s5864_s4 = inlined_call_operand.hbm [shape: bf16[128,128], index: 4, kind: input, shape index: {}]   ;;  %s5865_s5 = inlined_call_operand.vmem [shape: f32[1,128], index: 5, kind: input, shape index: {}]   ;;  %s5866_s6 = inlined_call_operand.vmem [shape: f32[1,128], index: 6, kind: input, shape index: {}]   ;;  %s5867_s7 = inlined_call_operand.vmem [shape: bf16[128,256], index: 7, kind: input, shape index: {}]   ;;  %s5868_s8 = inlined_call_operand.vmem [shape: f32[1,256], index: 8, kind: input, shape index: {}]   ;;  %s5869_s9 = inlined_call_operand.hbm [shape: bf16[256,128], index: 9, kind: input, shape index: {}]   ;;  %s5870_s10 = inlined_call_operand.vmem [shape: f32[1,128], index: 10, kind: input, shape index: {}]   ;;  %s5871_s11 = inlined_call_operand.vmem [shape: f32[1,128], index: 11, kind: input, shape index: {}]   ;;  %s5872_s12 = inlined_call_operand.vmem [shape: f32[1,128], index: 12, kind: input, shape index: {}]   ;;  %s5873_s13 = inlined_call_operand.hbm [shape: f32[16,128], index: 13, kind: output, shape index: {}]  }
   0x1   :  { %19 = vsyncpa [#allocation6], 0 }
   0x2   :  { %20 = vsyncpa [#allocation9], 0  ;;  %s43_s27 = sshll.u32 %s5863_s3, 4  ;;  %s44_s27 = int_to_ptr.hbm [resolvable:$true] %s43_s27 }
   0x3   :  { %21 = vsyncpa [#allocation4], 0  ;;  %s4136_s28 = smov [#allocation5]   ;;  %s26_s15 = sshll.u32 %s5860_s0, 4  ;;  %s27_s15 = int_to_ptr.hbm [resolvable:$true] %s26_s15 }
   0x4   :  { %s45_s29 = sshll.u32 %s4136_s28, 4  ;;  %s4137_s16 = smov 192   ;;  %s46_s29 = int_to_ptr.vmem [resolvable:$true] %s45_s29 }
   0x5   :  { %s4138_s17 = smov 12   ;;  %s4139_s18 = smov [#allocation2]  }
   0x6   :  { %51 = dma.hbm_to_vmem [thread:$0]  %s44_s27, 3072, %s46_s29, [#allocation6], %s4137_s16, %s4137_s16, %s4138_s17  }
   0x7   :  { %s28_s19 = sshll.u32 %s4139_s18, 4  ;;  %s4140_s20 = smov 64   ;;  %s29_s19 = int_to_ptr.vmem [resolvable:$true] %s28_s19 }
   0x8   :  { %s4141_s21 = smov 4   ;;  %s56_s23 = sshll.u32 %s5864_s4, 4  ;;  %s57_s23 = int_to_ptr.hbm [resolvable:$true] %s56_s23 }
   0x9   :  { %34 = dma.hbm_to_vmem [thread:$0]  %s27_s15, 1024, %s29_s19, [#allocation3], %s4140_s20, %s4140_s20, %s4141_s21  }
   0xa   :  { %s4142_s24 = smov [#allocation7]   ;;  %s77_s28 = sshll.u32 %s5869_s9, 4  ;;  %s78_s28 = int_to_ptr.hbm [resolvable:$true] %s77_s28 }
   0xb   :  { %s58_s25 = sshll.u32 %s4142_s24, 4  ;;  %s4143_s27 = smov [#allocation8]   ;;  %s59_s25 = int_to_ptr.vmem [resolvable:$true] %s58_s25 }
   0xc   :  { %64 = dma.hbm_to_vmem [thread:$0]  %s57_s23, 1024, %s59_s25, [#allocation6], %s4140_s20, %s4140_s20, %s4141_s21  }
   0xd   :  { %s79_s29 = sshll.u32 %s4143_s27, 4  ;;  %s80_s29 = int_to_ptr.vmem [resolvable:$true] %s79_s29 }
   0xe   :  { %85 = dma.hbm_to_vmem [thread:$0]  %s78_s28, 2048, %s80_s29, [#allocation9], %s4140_s20, %s4140_s20, %s4141_s21  }
   0xf   :  { %4128 = dma.done.wait [#allocation3], 1024  }
  0x10   :  { %4129 = vsyncadd [#allocation3], 4294966272 }
  0x11   :  { %4130 = dma.done.wait [#allocation6], 4096  }
  0x12   :  { %4131 = vsyncadd [#allocation6], 4294963200 }
  0x13   :  { %4132 = dma.done.wait [#allocation9], 2048  }
  0x14   :  { %4133 = vsyncadd [#allocation9], 4294965248  ;;  %v3749_v0 = vld [vmem:[#allocation5 + $0xac] sm:$0xf]  ;;  %v3536_v1 = vld [vmem:[#allocation5 + $0xb4] sm:$0xf0] }
  0x15   :  { %v3746_v2 = vld [vmem:[#allocation5 + $0x94] sm:$0xf]  ;;  %v3539_v3 = vor.u32 %v3749_v0, %v3536_v1  ;;  %v3524_v4 = vld [vmem:[#allocation5 + $0x9c] sm:$0xf0]  ;;  %v3534_v5 = vld [vmem:[#allocation5 + $0xa8] sm:$0xf] }
  0x16   :  { %v3750_v6 = vld [vmem:[#allocation5 + $0xb0] sm:$0xf0]  ;;  %v3522_v8 = vld [vmem:[#allocation5 + $0x90] sm:$0xf]  ;;  %v3527_v9 = vor.u32 %v3746_v2, %v3524_v4  ;;  %v3747_v10 = vld [vmem:[#allocation5 + $0x98] sm:$0xf0] }
  0x17   :  { %v3535_v7 = vor.u32 %v3750_v6, %v3534_v5  ;;  %398 = vmatpush.bf16.msra.mxu1 %v3539_v3  ;;  %v3743_v11 = vld [vmem:[#allocation5 + $0x7c] sm:$0xf]  ;;  %v3512_v12 = vld [vmem:[#allocation5 + $0x84] sm:$0xf0]  ;;  %v3523_v13 = vor.u32 %v3747_v10, %v3522_v8  ;;  %v3510_v14 = vld [vmem:[#allocation5 + $0x78] sm:$0xf] }
  0x18   :  { %v3744_v15 = vld [vmem:[#allocation5 + $0x80] sm:$0xf0]  ;;  %v3515_v16 = vor.u32 %v3743_v11, %v3512_v12  ;;  %v3500_v18 = vld [vmem:[#allocation5 + $0x6c] sm:$0xf0]  ;;  %v3498_v20 = vld [vmem:[#allocation5 + $0x60] sm:$0xf] }
  0x19   :  { %349 = vmatpush.bf16.msra.mxu0 %v3535_v7  ;;  %v3740_v17 = vld [vmem:[#allocation5 + $0x64] sm:$0xf]  ;;  %v3511_v19 = vor.u32 %v3744_v15, %v3510_v14  ;;  %v3741_v21 = vld [vmem:[#allocation5 + $0x68] sm:$0xf0]  ;;  %v3488_v23 = vld [vmem:[#allocation5 + $0x54] sm:$0xf0] }
  0x1a   :  { %v3737_v22 = vld [vmem:[#allocation5 + $0x4c] sm:$0xf]  ;;  %v3503_v24 = vor.u32 %v3740_v17, %v3500_v18  ;;  %v3486_v25 = vld [vmem:[#allocation5 + $0x48] sm:$0xf]  ;;  %v3738_v26 = vld [vmem:[#allocation5 + $0x50] sm:$0xf0]  ;;  %v3499_v27 = vor.u32 %v3741_v21, %v3498_v20 }
  0x1b   :  { %399 = vmatpush.bf16.msra.mxu1 %v3527_v9  ;;  %v3734_v28 = vld [vmem:[#allocation5 + $0x34] sm:$0xf]  ;;  %v3476_v29 = vld [vmem:[#allocation5 + $0x3c] sm:$0xf0]  ;;  %v3491_v30 = vor.u32 %v3737_v22, %v3488_v23  ;;  %v3474_v31 = vld [vmem:[#allocation5 + $0x30] sm:$0xf]  ;;  %v3487_v33 = vor.u32 %v3738_v26, %v3486_v25 }
  0x1c   :  { %v3735_v32 = vld [vmem:[#allocation5 + $0x38] sm:$0xf0]  ;;  %v3479_v34 = vor.u32 %v3734_v28, %v3476_v29  ;;  %v3464_v36 = vld [vmem:[#allocation5 + $0x24] sm:$0xf0]  ;;  %v3462_v38 = vld [vmem:[#allocation5 + $0x18] sm:$0xf] }
  0x1d   :  { %350 = vmatpush.bf16.msra.mxu0 %v3523_v13  ;;  %v3731_v35 = vld [vmem:[#allocation5 + $0x1c] sm:$0xf]  ;;  %v3475_v37 = vor.u32 %v3735_v32, %v3474_v31  ;;  %v3732_v39 = vld [vmem:[#allocation5 + $0x20] sm:$0xf0]  ;;  %v3452_v42 = vld [vmem:[#allocation5 + $0xc] sm:$0xf0] }
  0x1e   :  { %v3467_v40 = vor.u32 %v3731_v35, %v3464_v36  ;;  %v3728_v41 = vld [vmem:[#allocation5 + $0x4] sm:$0xf]  ;;  %v3463_v43 = vor.u32 %v3732_v39, %v3462_v38  ;;  %v3450_v44 = vld [vmem:[#allocation5] sm:$0xf]  ;;  %v3729_v45 = vld [vmem:[#allocation5 + $0x8] sm:$0xf0] }
  0x1f   :  { %400 = vmatpush.bf16.msra.mxu1 %v3515_v16  ;;  %v3455_v46 = vor.u32 %v3728_v41, %v3452_v42  ;;  %v3451_v47 = vor.u32 %v3729_v45, %v3450_v44  ;;  %v4230_v48 = vld [vmem:[#allocation2] sm:$0xff]  ;;  %v4234_v49 = vld [vmem:[#allocation2 + $0x8] sm:$0xff]  ;;  %v4238_v50 = vld [vmem:[#allocation2 + $0x10] sm:$0xff]  ;;  %vm848_vm0 = vcmask 64512   ;;  %vm1044_vm1 = vcmask 1043456   ;;  %s3401_s9 = sshll.u32 %s5873_s13, 4  ;;  %s3402_s9 = int_to_ptr.hbm [resolvable:$true] %s3401_s9 }
  0x20   :  { %v4242_v51 = vld [vmem:[#allocation2 + $0x18] sm:$0xff]  ;;  %v4246_v52 = vld [vmem:[#allocation2 + $0x20] sm:$0xff]  ;;  %v4250_v53 = vld [vmem:[#allocation2 + $0x28] sm:$0xff]  ;;  %s4146_s30 = smov 128   ;;  %s4147_s14 = smov 8  }
  0x21   :  { %351 = vmatpush.bf16.msra.mxu0 %v3511_v19  ;;  %v4254_v54 = vld [vmem:[#allocation2 + $0x30] sm:$0xff]  ;;  %v4258_v55 = vld [vmem:[#allocation2 + $0x38] sm:$0xff]  ;;  %v3748_v8 = vld [vmem:[#allocation5 + $0xa0] sm:$0xf0] }
  0x22   :  { %v3542_v2 = vld [vmem:[#allocation5 + $0xb0] sm:$0xf]  ;;  %v3751_v3 = vld [vmem:[#allocation5 + $0xb8] sm:$0xf0]  ;;  %v3530_v7 = vld [vmem:[#allocation5 + $0x98] sm:$0xf] }
  0x23   :  { %401 = vmatpush.bf16.msra.mxu1 %v3503_v24  ;;  %v3543_v4 = vor.u32 %v3751_v3, %v3542_v2  ;;  %v3531_v9 = vor.u32 %v3748_v8, %v3530_v7  ;;  %v3518_v14 = vld [vmem:[#allocation5 + $0x80] sm:$0xf]  ;;  %v3745_v15 = vld [vmem:[#allocation5 + $0x88] sm:$0xf0]  ;;  %v3506_v17 = vld [vmem:[#allocation5 + $0x68] sm:$0xf] }
  0x24   :  { %v3519_v16 = vor.u32 %v3745_v15, %v3518_v14  ;;  %v3742_v18 = vld [vmem:[#allocation5 + $0x70] sm:$0xf0]  ;;  %v3494_v20 = vld [vmem:[#allocation5 + $0x50] sm:$0xf]  ;;  %v3739_v21 = vld [vmem:[#allocation5 + $0x58] sm:$0xf0] }
  0x25   :  { %352 = vmatpush.bf16.msra.mxu0 %v3499_v27  ;;  %447 = vmatpush.bf16.msra.mxu2 %v3543_v4  ;;  %v3507_v19 = vor.u32 %v3742_v18, %v3506_v17  ;;  %v3495_v23 = vor.u32 %v3739_v21, %v3494_v20  ;;  %v3482_v24 = vld [vmem:[#allocation5 + $0x38] sm:$0xf]  ;;  %v3736_v25 = vld [vmem:[#allocation5 + $0x40] sm:$0xf0]  ;;  %v3470_v31 = vld [vmem:[#allocation5 + $0x20] sm:$0xf] }
  0x26   :  { %v3483_v26 = vor.u32 %v3736_v25, %v3482_v24  ;;  %v3733_v32 = vld [vmem:[#allocation5 + $0x28] sm:$0xf0]  ;;  %v3730_v35 = vld [vmem:[#allocation5 + $0x10] sm:$0xf0]  ;;  %v3824_v17 = vld [vmem:[%s5861_s1 + $0x1] ss:$0 sm:$0xff] }
  0x27   :  { %402 = vmatpush.bf16.msra.mxu1 %v3491_v30  ;;  %v3825_v25 = vld [vmem:[%s5861_s1 + $0x2] ss:$0 sm:$0xff] }
  0x29   :  { %353 = vmatpush.bf16.msra.mxu0 %v3487_v33  ;;  %448 = vmatpush.bf16.msra.mxu2 %v3531_v9  ;;  %v3471_v33 = vor.u32 %v3733_v32, %v3470_v31 }
  0x2b   :  { %403 = vmatpush.bf16.msra.mxu1 %v3479_v34  ;;  %v3458_v34 = vld [vmem:[#allocation5 + $0x8] sm:$0xf] }
  0x2c   :  { %v3459_v36 = vor.u32 %v3730_v35, %v3458_v34 }
  0x2d   :  { %354 = vmatpush.bf16.msra.mxu0 %v3475_v37  ;;  %449 = vmatpush.bf16.msra.mxu2 %v3519_v16 }
  0x2f   :  { %404 = vmatpush.bf16.msra.mxu1 %v3467_v40 }
  0x31   :  { %355 = vmatpush.bf16.msra.mxu0 %v3463_v43  ;;  %450 = vmatpush.bf16.msra.mxu2 %v3507_v19 }
  0x33   :  { %405 = vmatpush.bf16.msra.mxu1 %v3455_v46 }
  0x35   :  { %356 = vmatpush.bf16.msra.mxu0 %v3451_v47  ;;  %451 = vmatpush.bf16.msra.mxu2 %v3495_v23 }
  0x36   :  { %406 = vmatmul.bf16.vlgmr.msra.gmra.mxu1 %v4230_v48 }
  0x38   :  { %357 = vmatmul.bf16.vlgmr.msra.gmra.mxu0 %v4230_v48 }
  0x39   :  { %452 = vmatpush.bf16.msra.mxu2 %v3483_v26 }
  0x3d   :  { %453 = vmatpush.bf16.msra.mxu2 %v3471_v33 }
  0x41   :  { %454 = vmatpush.bf16.msra.mxu2 %v3459_v36 }
  0x44   :  { %455 = vmatmul.bf16.vlgmr.msra.gmra.mxu2 %v4230_v48 }
  0x46   :  { %411 = vmatmul.bf16.gmra.mxu1 %v4234_v49 }
  0x48   :  { %362 = vmatmul.bf16.gmra.mxu0 %v4234_v49 }
  0x54   :  { %460 = vmatmul.bf16.gmra.mxu2 %v4234_v49 }
  0x56   :  { %416 = vmatmul.bf16.gmra.mxu1 %v4238_v50 }
  0x58   :  { %367 = vmatmul.bf16.gmra.mxu0 %v4238_v50 }
  0x64   :  { %465 = vmatmul.bf16.gmra.mxu2 %v4238_v50 }
  0x66   :  { %421 = vmatmul.bf16.gmra.mxu1 %v4242_v51 }
  0x68   :  { %372 = vmatmul.bf16.gmra.mxu0 %v4242_v51 }
  0x74   :  { %470 = vmatmul.bf16.gmra.mxu2 %v4242_v51  ;;  %v3823_v51 = vld [vmem:[%s5861_s1] ss:$0 sm:$0xff] }
  0x76   :  { %426 = vmatmul.bf16.gmra.mxu1 %v4246_v52 }
  0x78   :  { %377 = vmatmul.bf16.gmra.mxu0 %v4246_v52 }
  0x84   :  { %475 = vmatmul.bf16.gmra.mxu2 %v4246_v52 }
  0x86   :  { %431 = vmatmul.bf16.gmra.mxu1 %v4250_v53 }
  0x88   :  { %382 = vmatmul.bf16.gmra.mxu0 %v4250_v53 }
  0x94   :  { %480 = vmatmul.bf16.gmra.mxu2 %v4250_v53 }
  0x96   :  { %436 = vmatmul.bf16.gmra.mxu1 %v4254_v54 }
  0x98   :  { %387 = vmatmul.bf16.gmra.mxu0 %v4254_v54 }
  0xa4   :  { %485 = vmatmul.bf16.gmra.mxu2 %v4254_v54  ;;  %v3826_v54 = vld [vmem:[%s5861_s1 + $0x3] ss:$0 sm:$0xff] }
  0xa6   :  { %441 = vmatmul.bf16.gmra.mxu1 %v4258_v55 }
  0xa8   :  { %392 = vmatmul.bf16.gmra.mxu0 %v4258_v55 }
  0xb3   :  { %v407_v56 = vpop.f32.mrf.mxu1 }
  0xb4   :  { %v512_v57 = vpack.c.bf16 %v407_v56, %v407_v56  ;;  %490 = vmatmul.bf16.gmra.mxu2 %v4258_v55 }
  0xb5   :  { %v358_v58 = vpop.f32.mrf.mxu0 }
  0xb6   :  { %551 = vmatpush.bf16.xpose.msrb.mxu1 %v512_v57  ;;  %v496_v59 = vpack.c.bf16 %v358_v58, %v358_v58 }
  0xbb   :  { %v409_v60 = vpop.f32.mrf.mxu1 }
  0xbc   :  { %v513_v61 = vpack.c.bf16 %v409_v60, %v409_v60 }
  0xbd   :  { %552 = vmatmul.bf16.vlgmr.msrb.gmra.mxu1 %v496_v59  ;;  %v360_v62 = vpop.f32.mrf.mxu0 }
  0xbe   :  { %564 = vmatpush.bf16.xpose.msra.mxu3 %v513_v61  ;;  %v497_v63 = vpack.c.bf16 %v360_v62, %v360_v62 }
  0xc3   :  { %v412_v0 = vpop.f32.mrf.mxu1 }
  0xc4   :  { %v514_v1 = vpack.c.bf16 %v412_v0, %v412_v0 }
  0xc5   :  { %565 = vmatmul.bf16.vlgmr.msra.gmra.mxu3 %v497_v63  ;;  %v363_v10 = vpop.f32.mrf.mxu0 }
  0xc6   :  { %577 = vmatpush.bf16.xpose.msrb.mxu3 %v514_v1  ;;  %v498_v11 = vpack.c.bf16 %v363_v10, %v363_v10 }
  0xcb   :  { %v414_v5 = vpop.f32.mrf.mxu1 }
  0xcc   :  { %v515_v6 = vpack.c.bf16 %v414_v5, %v414_v5 }
  0xcd   :  { %v365_v27 = vpop.f32.mrf.mxu0 }
  0xce   :  { %590 = vmatpush.bf16.xpose.msra.mxu3 %v515_v6  ;;  %v499_v29 = vpack.c.bf16 %v365_v27, %v365_v27 }
  0xd3   :  { %v417_v12 = vpop.f32.mrf.mxu1 }
  0xd4   :  { %v516_v13 = vpack.c.bf16 %v417_v12, %v417_v12 }
  0xd5   :  { %578 = vmatmul.bf16.vlgmr.msrb.gmra.mxu3 %v498_v11  ;;  %v368_v38 = vpop.f32.mrf.mxu0 }
  0xd6   :  { %603 = vmatpush.bf16.xpose.msrb.mxu3 %v516_v13  ;;  %v500_v39 = vpack.c.bf16 %v368_v38, %v368_v38 }
  0xdb   :  { %v419_v22 = vpop.f32.mrf.mxu1 }
  0xdc   :  { %v517_v28 = vpack.c.bf16 %v419_v22, %v419_v22 }
  0xdd   :  { %v370_v43 = vpop.f32.mrf.mxu0 }
  0xde   :  { %v501_v45 = vpack.c.bf16 %v370_v43, %v370_v43 }
  0xe3   :  { %v422_v30 = vpop.f32.mrf.mxu1 }
  0xe4   :  { %v518_v40 = vpack.c.bf16 %v422_v30, %v422_v30 }
  0xe5   :  { %591 = vmatmul.bf16.vlgmr.msra.gmra.mxu3 %v499_v29  ;;  %v373_v48 = vpop.f32.mrf.mxu0 }
  0xe6   :  { %616 = vmatpush.bf16.xpose.msra.mxu3 %v517_v28  ;;  %v502_v58 = vpack.c.bf16 %v373_v48, %v373_v48 }
  0xeb   :  { %v424_v37 = vpop.f32.mrf.mxu1 }
  0xec   :  { %v519_v44 = vpack.c.bf16 %v424_v37, %v424_v37  ;;  %v456_v37 = vpop.f32.mrf.mxu2 }
  0xed   :  { %v375_v62 = vpop.f32.mrf.mxu0  ;;  %v528_v38 = vpack.c.bf16 %v456_v37, %v456_v37 }
  0xee   :  { %v503_v0 = vpack.c.bf16 %v375_v62, %v375_v62 }
  0xef   :  { %v1046_v55 = vsel %vm1044_vm1, %v528_v38, 0 }
  0xf3   :  { %v427_v41 = vpop.f32.mrf.mxu1 }
  0xf4   :  { %v520_v59 = vpack.c.bf16 %v427_v41, %v427_v41 }
  0xf5   :  { %604 = vmatmul.bf16.vlgmr.msrb.gmra.mxu3 %v500_v39  ;;  %v378_v50 = vpop.f32.mrf.mxu0  ;;  %v3827_v39 = vld [vmem:[%s5861_s1 + $0x4] ss:$0 sm:$0xff] }
  0xf6   :  { %629 = vmatpush.bf16.xpose.msrb.mxu3 %v518_v40  ;;  %v504_v5 = vpack.c.bf16 %v378_v50, %v378_v50 }
  0xfb   :  { %v429_v42 = vpop.f32.mrf.mxu1 }
  0xfc   :  { %v521_v63 = vpack.c.bf16 %v429_v42, %v429_v42  ;;  %v458_v42 = vpop.f32.mrf.mxu2 }
  0xfd   :  { %v380_v6 = vpop.f32.mrf.mxu0 }
  0xfe   :  { %v505_v16 = vpack.c.bf16 %v380_v6, %v380_v6  ;;  %v3829_v6 = vld [vmem:[%s5861_s1 + $0x6] ss:$0 sm:$0xff] }
 0x103   :  { %v432_v46 = vpop.f32.mrf.mxu1 }
 0x104   :  { %v522_v47 = vpack.c.bf16 %v432_v46, %v432_v46  ;;  %v461_v46 = vpop.f32.mrf.mxu2 }
 0x105   :  { %617 = vmatmul.bf16.vlgmr.msra.gmra.mxu3 %v501_v45  ;;  %v383_v8 = vpop.f32.mrf.mxu0 }
 0x106   :  { %642 = vmatpush.bf16.xpose.msra.mxu3 %v519_v44  ;;  %681 = vmatpush.bf16.xpose.msrb.mxu0 %v522_v47  ;;  %v506_v10 = vpack.c.bf16 %v383_v8, %v383_v8  ;;  %v530_v47 = vpack.c.bf16 %v461_v46, %v461_v46 }
 0x10b   :  { %v434_v56 = vpop.f32.mrf.mxu1 }
 0x10c   :  { %v523_v57 = vpack.c.bf16 %v434_v56, %v434_v56  ;;  %v1084_v56 = vsel %vm1044_vm1, %v530_v47, 0 }
 0x10d   :  { %682 = vmatmul.bf16.vlgmr.msrb.gmra.mxu0 %v506_v10  ;;  %v385_v13 = vpop.f32.mrf.mxu0 }
 0x10e   :  { %694 = vmatpush.bf16.xpose.msra.mxu1 %v523_v57  ;;  %v507_v14 = vpack.c.bf16 %v385_v13, %v385_v13  ;;  %v3828_v57 = vld [vmem:[%s5861_s1 + $0x5] ss:$0 sm:$0xff] }
 0x113   :  { %v437_v60 = vpop.f32.mrf.mxu1 }
 0x114   :  { %v524_v61 = vpack.c.bf16 %v437_v60, %v437_v60 }
 0x115   :  { %630 = vmatmul.bf16.vlgmr.msrb.gmra.mxu3 %v502_v58  ;;  %695 = vmatmul.bf16.vlgmr.msra.gmra.mxu1 %v507_v14  ;;  %v388_v20 = vpop.f32.mrf.mxu0 }
 0x116   :  { %655 = vmatpush.bf16.xpose.msrb.mxu3 %v520_v59  ;;  %707 = vmatpush.bf16.xpose.msrb.mxu2 %v524_v61  ;;  %v508_v33 = vpack.c.bf16 %v388_v20, %v388_v20  ;;  %v463_v59 = vpop.f32.mrf.mxu2  ;;  %v529_v61 = vpack.c.bf16 %v458_v42, %v458_v42 }
 0x11b   :  { %v439_v49 = vpop.f32.mrf.mxu1 }
 0x11c   :  { %v525_v7 = vpack.c.bf16 %v439_v49, %v439_v49 }
 0x11d   :  { %v390_v23 = vpop.f32.mrf.mxu0  ;;  %708 = vmatmul.bf16.vlgmr.msrb.gmra.mxu2 %v508_v33 }
 0x11e   :  { %v509_v24 = vpack.c.bf16 %v390_v23, %v390_v23  ;;  %1055 = vmatpush.bf16.msra.mxu2 %v1046_v55 }
 0x123   :  { %v442_v1 = vpop.f32.mrf.mxu1 }
 0x124   :  { %v526_v2 = vpack.c.bf16 %v442_v1, %v442_v1 }
 0x125   :  { %643 = vmatmul.bf16.vlgmr.msra.gmra.mxu3 %v503_v0  ;;  %v393_v60 = vpop.f32.mrf.mxu0  ;;  %v1065_v0 = vsel %vm1044_vm1, %v529_v61, 0 }
 0x126   :  { %668 = vmatpush.bf16.xpose.msra.mxu3 %v521_v63  ;;  %733 = vmatpush.bf16.xpose.msra.mxu0 %v526_v2  ;;  %v510_v63 = vpack.c.bf16 %v393_v60, %v393_v60  ;;  %v466_v2 = vpop.f32.mrf.mxu2 }
 0x12b   :  { %v444_v3 = vpop.f32.mrf.mxu1 }
 0x12c   :  { %v527_v4 = vpack.c.bf16 %v444_v3, %v444_v3  ;;  %v532_v3 = vpack.c.bf16 %v466_v2, %v466_v2 }
 0x12d   :  { %734 = vmatmul.bf16.vlgmr.msra.gmra.mxu0 %v510_v63  ;;  %v395_v50 = vpop.f32.mrf.mxu0 }
 0x12e   :  { %746 = vmatpush.bf16.xpose.msrb.mxu1 %v527_v4  ;;  %1093 = vmatpush.bf16.msrb.mxu0 %v1084_v56  ;;  %v511_v4 = vpack.c.bf16 %v395_v50, %v395_v50  ;;  %v468_v8 = vpop.f32.mrf.mxu2 }
 0x135   :  { %656 = vmatmul.bf16.vlgmr.msrb.gmra.mxu3 %v504_v5  ;;  %v1122_v5 = vsel %vm1044_vm1, %v532_v3, 0  ;;  %747 = vmatmul.bf16.vlgmr.msrb.gmra.mxu1 %v511_v4 }
 0x136   :  { %720 = vmatpush.bf16.xpose.msrb.mxu3 %v525_v7  ;;  %1131 = vmatpush.bf16.msrb.mxu2 %v1122_v5  ;;  %v471_v14 = vpop.f32.mrf.mxu2 }
 0x13a   :  { %v553_v9 = vpop.f32.mrf.mxu1 }
 0x13b   :  { %v752_v11 = vmul.f32 0.088388346, %v553_v9  ;;  %v531_v9 = vpack.c.bf16 %v463_v59, %v463_v59 }
 0x13d   :  { %v4270_v12 = vadd.f32 %v3823_v51, %v752_v11 }
 0x13e   :  { %v473_v20 = vpop.f32.mrf.mxu2 }
 0x13f   :  { %v849_v52 = vsel %vm848_vm0, %v4270_v12, -inf }
 0x140   :  { %850 = vmax.xlane.f32.xlu0 %v849_v52  ;;  %v1103_v52 = vsel %vm1044_vm1, %v531_v9, 0 }
 0x141   :  { %1112 = vmatpush.bf16.msra.mxu1 %v1103_v52 }
 0x142   :  { %v555_v15 = vpop.f32.mrf.mxu1 }
 0x143   :  { %v534_v15 = vpack.c.bf16 %v471_v14, %v471_v14 }
 0x145   :  { %669 = vmatmul.bf16.vlgmr.msra.gmra.mxu3 %v505_v16  ;;  %v1160_v16 = vsel %vm1044_vm1, %v534_v15, 0 }
 0x146   :  { %1074 = vmatpush.bf16.msra.mxu3 %v1065_v0  ;;  %1169 = vmatpush.bf16.msra.mxu0 %v1160_v16 }
 0x148   :  { %v566_v18 = vpop.f32.mrf.mxu3 }
 0x149   :  { %v753_v19 = vmul.f32 0.088388346, %v566_v18 }
 0x14b   :  { %v4278_v21 = vadd.f32 %v3824_v17, %v753_v19  ;;  %v3830_v17 = vld [vmem:[%s5861_s1 + $0x7] ss:$0 sm:$0xff] }
 0x14d   :  { %v852_v53 = vsel %vm848_vm0, %v4278_v21, -inf }
 0x14e   :  { %853 = vmax.xlane.f32.xlu0 %v852_v53  ;;  %v533_v53 = vpack.c.bf16 %v468_v8, %v468_v8 }
 0x150   :  { %v568_v22 = vpop.f32.mrf.mxu3 }
 0x155   :  { %721 = vmatmul.bf16.vlgmr.msrb.gmra.mxu3 %v509_v24  ;;  %v1141_v24 = vsel %vm1044_vm1, %v533_v53, 0  ;;  %v3834_v53 = vld [vmem:[%s5861_s1 + $0xd] ss:$0 sm:$0xff] }
 0x156   :  { %1150 = vmatpush.bf16.msrb.mxu3 %v1141_v24 }
 0x158   :  { %v579_v26 = vpop.f32.mrf.mxu3 }
 0x159   :  { %v754_v27 = vmul.f32 0.088388346, %v579_v26  ;;  %v4333_v26 = vpop.f32.mrf.mxu2 }
 0x15b   :  { %v4286_v28 = vadd.f32 %v3825_v25, %v754_v27 }
 0x15d   :  { %v855_v29 = vsel %vm848_vm0, %v4286_v28, -inf }
 0x15e   :  { %856 = vmax.xlane.f32.xlu1 %v855_v29 }
 0x160   :  { %v581_v30 = vpop.f32.mrf.mxu3 }
 0x161   :  { %v4339_v33 = vpop.f32.mrf.mxu2 }
 0x168   :  { %v592_v31 = vpop.f32.mrf.mxu3 }
 0x169   :  { %v755_v32 = vmul.f32 0.088388346, %v592_v31 }
 0x16b   :  { %v4294_v34 = vadd.f32 %v3826_v54, %v755_v32  ;;  %v3831_v54 = vld [vmem:[%s5861_s1 + $0x8] ss:$0 sm:$0xff] }
 0x16d   :  { %v858_v35 = vsel %vm848_vm0, %v4294_v34, -inf }
 0x16e   :  { %859 = vmax.xlane.f32.xlu1 %v858_v35  ;;  %v535_v35 = vpack.c.bf16 %v473_v20, %v473_v20 }
 0x170   :  { %v594_v36 = vpop.f32.mrf.mxu3 }
 0x178   :  { %v605_v40 = vpop.f32.mrf.mxu3 }
 0x179   :  { %v756_v41 = vmul.f32 0.088388346, %v605_v40 }
 0x17b   :  { %v4302_v43 = vadd.f32 %v3827_v39, %v756_v41  ;;  %v4350_v41 = vpop.f32.mrf.mxu2 }
 0x17d   :  { %v861_v44 = vsel %vm848_vm0, %v4302_v43, -inf }
 0x17e   :  { %862 = vmax.xlane.f32.xlu2 %v861_v44 }
 0x180   :  { %v607_v45 = vpop.f32.mrf.mxu3 }
 0x181   :  { %v3832_v45 = vld [vmem:[%s5861_s1 + $0x9] ss:$0 sm:$0xff] }
 0x183   :  { %v4356_v56 = vpop.f32.mrf.mxu2 }
 0x188   :  { %v618_v48 = vpop.f32.mrf.mxu3 }
 0x189   :  { %v757_v58 = vmul.f32 0.088388346, %v618_v48 }
 0x18a   :  { %v683_v59 = vpop.f32.mrf.mxu0 }
 0x18b   :  { %v4310_v49 = vadd.f32 %v3828_v57, %v757_v58  ;;  %v762_v52 = vmul.f32 0.088388346, %v683_v59 }
 0x18d   :  { %v864_v62 = vsel %vm848_vm0, %v4310_v49, -inf }
 0x18e   :  { %865 = vmax.xlane.f32.xlu2 %v864_v62  ;;  %v4366_v62 = vpop.f32.mrf.mxu2 }
 0x190   :  { %v620_v1 = vpop.f32.mrf.mxu3 }
 0x192   :  { %v685_v1 = vpop.f32.mrf.mxu0  ;;  %v696_v5 = vpop.f32.mrf.mxu1 }
 0x196   :  { %v4369_v50 = vpop.f32.mrf.mxu2 }
 0x198   :  { %v631_v7 = vpop.f32.mrf.mxu3 }
 0x199   :  { %v758_v51 = vmul.f32 0.088388346, %v631_v7 }
 0x19a   :  { %v698_v9 = vpop.f32.mrf.mxu1 }
 0x19b   :  { %v4319_v10 = vadd.f32 %v3829_v6, %v758_v51 }
 0x19d   :  { %v867_v11 = vsel %vm848_vm0, %v4319_v10, -inf }
 0x19e   :  { %868 = vmax.xlane.f32.xlu0 %v867_v11  ;;  %v4375_v51 = vpop.f32.mrf.mxu2 }
 0x1a0   :  { %v633_v13 = vpop.f32.mrf.mxu3 }
 0x1a1   :  { %v3833_v13 = vld [vmem:[%s5861_s1 + $0xa] ss:$0 sm:$0xff] }
 0x1a2   :  { %v4387_v16 = vadd.f32 %v3833_v13, %v762_v52 }
 0x1a6   :  { %v4378_v11 = vpop.f32.mrf.mxu2 }
 0x1a8   :  { %v644_v18 = vpop.f32.mrf.mxu3 }
 0x1a9   :  { %v759_v19 = vmul.f32 0.088388346, %v644_v18 }
 0x1ab   :  { %v4328_v22 = vadd.f32 %v3830_v17, %v759_v19  ;;  %v879_v19 = vsel %vm848_vm0, %v4387_v16, -inf }
 0x1ad   :  { %v870_v23 = vsel %vm848_vm0, %v4328_v22, -inf }
 0x1ae   :  { %871 = vmax.xlane.f32.xlu1 %v870_v23 }
 0x1b0   :  { %v646_v25 = vpop.f32.mrf.mxu3 }
 0x1b3   :  { %v851_v27 = vpop.xlane.xlu0 %850 }
 0x1b4   :  { %v897_v29 = vsub.f32 %v4270_v12, %v851_v27  ;;  %v1179_v12 = vsel %vm1044_vm1, %v535_v35, 0 }
 0x1b5   :  { %1188 = vmatpush.bf16.msrb.mxu1 %v1179_v12 }
 0x1b6   :  { %v913_v30 = vmul.f32 1.442695, %v897_v29  ;;  %v763_v29 = vmul.f32 0.088388346, %v696_v5 }
 0x1b8   :  { %3844 = vpow2.f32 %v913_v30  ;;  %v657_v31 = vpop.f32.mrf.mxu3 }
 0x1b9   :  { %v760_v32 = vmul.f32 0.088388346, %v657_v31 }
 0x1bb   :  { %v4341_v36 = vadd.f32 %v3831_v54, %v760_v32 }
 0x1bd   :  { %v873_v37 = vsel %vm848_vm0, %v4341_v36, -inf }
 0x1be   :  { %v4345_v38 = vpop.eup %3844  ;;  %874 = vmax.xlane.f32.xlu1 %v873_v37 }
 0x1bf   :  { %v945_v55 = vsel %vm848_vm0, %v4345_v38, 0.0 }
 0x1c0   :  { %946 = vadd.xlane.f32.xlu2 %v945_v55  ;;  %v659_v39 = vpop.f32.mrf.mxu3 }
 0x1c1   :  { %v854_v40 = vpop.xlane.xlu0 %853  ;;  %v3836_v39 = vld [vmem:[%s5861_s1 + $0xc] ss:$0 sm:$0xff] }
 0x1c2   :  { %v898_v42 = vsub.f32 %v4278_v21, %v854_v40 }
 0x1c4   :  { %v915_v44 = vmul.f32 1.442695, %v898_v42 }
 0x1c6   :  { %3846 = vpow2.f32 %v915_v44  ;;  %v735_v44 = vpop.f32.mrf.mxu0 }
 0x1c8   :  { %v670_v46 = vpop.f32.mrf.mxu3 }
 0x1c9   :  { %v761_v47 = vmul.f32 0.088388346, %v670_v46  ;;  %v748_v46 = vpop.f32.mrf.mxu1 }
 0x1cb   :  { %v4358_v57 = vadd.f32 %v3832_v45, %v761_v47 }
 0x1cc   :  { %v4360_v48 = vpop.eup %3846 }
 0x1cd   :  { %v948_v58 = vsel %vm848_vm0, %v4360_v48, 0.0  ;;  %v876_v21 = vsel %vm848_vm0, %v4358_v57, -inf }
 0x1ce   :  { %949 = vadd.xlane.f32.xlu0 %v948_v58  ;;  %877 = vmax.xlane.f32.xlu2 %v876_v21  ;;  %v737_v59 = vpop.f32.mrf.mxu0 }
 0x1d0   :  { %v672_v60 = vpop.f32.mrf.mxu3 }
 0x1d1   :  { %v857_v61 = vpop.xlane.xlu1 %856  ;;  %v750_v60 = vpop.f32.mrf.mxu1 }
 0x1d2   :  { %v899_v63 = vsub.f32 %v4286_v28, %v857_v61 }
 0x1d4   :  { %v917_v0 = vmul.f32 1.442695, %v899_v63 }
 0x1d6   :  { %3848 = vpow2.f32 %v917_v0 }
 0x1d8   :  { %v722_v2 = vpop.f32.mrf.mxu3 }
 0x1d9   :  { %v765_v20 = vmul.f32 0.088388346, %v722_v2 }
 0x1db   :  { %v4395_v24 = vadd.f32 %v3834_v53, %v765_v20  ;;  %v3838_v20 = vld [vmem:[%s5861_s1 + $0xf] ss:$0 sm:$0xff] }
 0x1dc   :  { %v4371_v3 = vpop.eup %3848 }
 0x1dd   :  { %v951_v4 = vsel %vm848_vm0, %v4371_v3, 0.0  ;;  %v888_v27 = vsel %vm848_vm0, %v4395_v24, -inf }
 0x1de   :  { %952 = vadd.xlane.f32.xlu0 %v951_v4  ;;  %v3837_v4 = vld [vmem:[%s5861_s1 + $0xe] ss:$0 sm:$0xff] }
 0x1e0   :  { %v724_v6 = vpop.f32.mrf.mxu3 }
 0x1e1   :  { %v860_v7 = vpop.xlane.xlu1 %859 }
 0x1e2   :  { %v900_v8 = vsub.f32 %v4294_v34, %v860_v7  ;;  %v709_v34 = vpop.f32.mrf.mxu2 }
 0x1e3   :  { %v764_v55 = vmul.f32 0.088388346, %v709_v34 }
 0x1e4   :  { %v919_v28 = vmul.f32 1.442695, %v900_v8 }
 0x1e5   :  { %v4418_v45 = vadd.f32 %v3836_v39, %v764_v55 }
 0x1e6   :  { %3850 = vpow2.f32 %v919_v28 }
 0x1e7   :  { %v885_v58 = vsel %vm848_vm0, %v4418_v45, -inf }
 0x1ea   :  { %v711_v25 = vpop.f32.mrf.mxu2 }
 0x1ec   :  { %v4383_v14 = vpop.eup %3850 }
 0x1ed   :  { %v954_v15 = vsel %vm848_vm0, %v4383_v14, 0.0 }
 0x1ee   :  { %955 = vadd.xlane.f32.xlu1 %v954_v15  ;;  %v536_v15 = vpack.c.bf16 %v4333_v26, %v4333_v26 }
 0x1f0   :  { %v1198_v53 = vsel %vm1044_vm1, %v536_v15, 0  ;;  %v541_v15 = vpack.c.bf16 %v4369_v50, %v4369_v50 }
 0x1f1   :  { %v863_v17 = vpop.xlane.xlu2 %862 }
 0x1f2   :  { %v901_v18 = vsub.f32 %v4302_v43, %v863_v17  ;;  %v3835_v43 = vld [vmem:[%s5861_s1 + $0xb] ss:$0 sm:$0xff] }
 0x1f3   :  { %v4406_v31 = vadd.f32 %v3835_v43, %v763_v29 }
 0x1f4   :  { %v921_v23 = vmul.f32 1.442695, %v901_v18 }
 0x1f5   :  { %v882_v37 = vsel %vm848_vm0, %v4406_v31, -inf }
 0x1f6   :  { %3852 = vpow2.f32 %v921_v23  ;;  %880 = vmax.xlane.f32.xlu1 %v879_v19  ;;  %v767_v19 = vmul.f32 0.088388346, %v748_v46 }
 0x1fc   :  { %v4402_v30 = vpop.eup %3852 }
 0x1fd   :  { %v957_v54 = vsel %vm848_vm0, %v4402_v30, 0.0 }
 0x1fe   :  { %958 = vadd.xlane.f32.xlu2 %v957_v54  ;;  %889 = vmax.xlane.f32.xlu1 %v888_v27  ;;  %v537_v54 = vpack.c.bf16 %v4339_v33, %v4339_v33  ;;  %v538_v33 = vpack.c.bf16 %v4350_v41, %v4350_v41 }
 0x201   :  { %v866_v32 = vpop.xlane.xlu2 %865 }
 0x202   :  { %v902_v35 = vsub.f32 %v4310_v49, %v866_v32 }
 0x204   :  { %v923_v12 = vmul.f32 1.442695, %v902_v35 }
 0x206   :  { %3854 = vpow2.f32 %v923_v12  ;;  %883 = vmax.xlane.f32.xlu2 %v882_v37  ;;  %v1217_v12 = vsel %vm1044_vm1, %v537_v54, 0 }
 0x20c   :  { %v4414_v40 = vpop.eup %3854 }
 0x20d   :  { %v960_v42 = vsel %vm848_vm0, %v4414_v40, 0.0 }
 0x20e   :  { %961 = vadd.xlane.f32.xlu0 %v960_v42 }
 0x211   :  { %v869_v49 = vpop.xlane.xlu0 %868 }
 0x212   :  { %v903_v47 = vsub.f32 %v4319_v10, %v869_v49  ;;  %v766_v10 = vmul.f32 0.088388346, %v735_v44  ;;  %v1236_v44 = vsel %vm1044_vm1, %v538_v33, 0 }
 0x214   :  { %v925_v21 = vmul.f32 1.442695, %v903_v47  ;;  %v4435_v7 = vadd.f32 %v3837_v4, %v766_v10  ;;  %v539_v47 = vpack.c.bf16 %v4356_v56, %v4356_v56  ;;  %v540_v10 = vpack.c.bf16 %v4366_v62, %v4366_v62 }
 0x216   :  { %3856 = vpow2.f32 %v925_v21  ;;  %886 = vmax.xlane.f32.xlu0 %v885_v58 }
 0x21c   :  { %v4423_v61 = vpop.eup %3856 }
 0x21d   :  { %v963_v63 = vsel %vm848_vm0, %v4423_v61, 0.0 }
 0x21e   :  { %964 = vadd.xlane.f32.xlu2 %v963_v63 }
 0x221   :  { %v872_v0 = vpop.xlane.xlu1 %871 }
 0x222   :  { %v904_v1 = vsub.f32 %v4328_v22, %v872_v0  ;;  %v891_v22 = vsel %vm848_vm0, %v4435_v7, -inf }
 0x224   :  { %v927_v2 = vmul.f32 1.442695, %v904_v1 }
 0x226   :  { %3858 = vpow2.f32 %v927_v2 }
 0x22c   :  { %v4431_v5 = vpop.eup %3858 }
 0x22d   :  { %v966_v6 = vsel %vm848_vm0, %v4431_v5, 0.0 }
 0x22e   :  { %967 = vadd.xlane.f32.xlu0 %v966_v6 }
 0x231   :  { %v875_v8 = vpop.xlane.xlu1 %874 }
 0x232   :  { %v905_v28 = vsub.f32 %v4341_v36, %v875_v8 }
 0x233   :  { %v947_v9 = vpop.xlane.xlu2 %946 }
 0x234   :  { %v929_v52 = vmul.f32 1.442695, %v905_v28  ;;  %3860 = vrcp.f32 %v947_v9 }
 0x236   :  { %3862 = vpow2.f32 %v929_v52  ;;  %892 = vmax.xlane.f32.xlu0 %v891_v22  ;;  %v1274_v22 = vsel %vm1044_vm1, %v540_v10, 0 }
 0x23a   :  { %v3861_v13 = vpop.eup %3860 }
 0x23b   :  { %v1009_v17 = vmul.f32 %v3861_v13, %v4345_v38  ;;  %v4452_v38 = vadd.f32 %v3838_v20, %v767_v19 }
 0x23c   :  { %v4443_v34 = vpop.eup %3862 }
 0x23d   :  { %v1025_v18 = vpack.c.bf16 %v1009_v17, %v1009_v17  ;;  %v969_v36 = vsel %vm848_vm0, %v4443_v34, 0.0  ;;  %v894_v29 = vsel %vm848_vm0, %v4452_v38, -inf }
 0x23e   :  { %970 = vadd.xlane.f32.xlu1 %v969_v36 }
 0x23f   :  { %3544 = vmatmul.msk.bf16.vlgmr.msra.gmra.mxu2 %vm848_vm0, %v1025_v18 }
 0x240   :  { %1207 = vmatpush.bf16.msra.mxu2 %v1198_v53  ;;  %v1293_v53 = vsel %vm1044_vm1, %v541_v15, 0 }
 0x241   :  { %v950_v26 = vpop.xlane.xlu0 %949  ;;  %v878_v23 = vpop.xlane.xlu2 %877 }
 0x242   :  { %3864 = vrcp.f32 %v950_v26  ;;  %v906_v25 = vsub.f32 %v4358_v57, %v878_v23 }
 0x244   :  { %v931_v27 = vmul.f32 1.442695, %v906_v25 }
 0x246   :  { %3866 = vpow2.f32 %v931_v27  ;;  %895 = vmax.xlane.f32.xlu1 %v894_v29 }
 0x248   :  { %v3865_v43 = vpop.eup %3864 }
 0x249   :  { %v1010_v32 = vmul.f32 %v3865_v43, %v4360_v48 }
 0x24b   :  { %v1026_v35 = vpack.c.bf16 %v1010_v32, %v1010_v32  ;;  %v543_v32 = vpack.c.bf16 %v4378_v11, %v4378_v11 }
 0x24c   :  { %v4460_v37 = vpop.eup %3866 }
 0x24d   :  { %3545 = vmatmul.msk.bf16.vlgmr.msra.gmra.mxu3 %vm848_vm0, %v1026_v35  ;;  %v972_v57 = vsel %vm848_vm0, %v4460_v37, 0.0 }
 0x24e   :  { %1226 = vmatpush.bf16.msra.mxu3 %v1217_v12  ;;  %973 = vadd.xlane.f32.xlu2 %v972_v57 }
 0x251   :  { %v953_v55 = vpop.xlane.xlu0 %952 }
 0x252   :  { %3868 = vrcp.f32 %v953_v55 }
 0x258   :  { %v3869_v39 = vpop.eup %3868 }
 0x259   :  { %v1011_v48 = vmul.f32 %v3869_v39, %v4371_v3  ;;  %v1255_v3 = vsel %vm1044_vm1, %v539_v47, 0 }
 0x25b   :  { %v1027_v42 = vpack.c.bf16 %v1011_v48, %v1011_v48 }
 0x25d   :  { %3546 = vmatmul.msk.bf16.vlgmr.msrb.gmra.mxu0 %vm848_vm0, %v1027_v42 }
 0x25e   :  { %1245 = vmatpush.bf16.msrb.mxu0 %v1236_v44 }
 0x261   :  { %v956_v49 = vpop.xlane.xlu1 %955 }
 0x262   :  { %3870 = vrcp.f32 %v956_v49 }
 0x268   :  { %v3871_v46 = vpop.eup %3870 }
 0x269   :  { %v1012_v58 = vmul.f32 %v3871_v46, %v4383_v14  ;;  %v881_v21 = vpop.xlane.xlu1 %880 }
 0x26a   :  { %v907_v59 = vsub.f32 %v4387_v16, %v881_v21 }
 0x26b   :  { %v1028_v41 = vpack.c.bf16 %v1012_v58, %v1012_v58 }
 0x26c   :  { %v933_v60 = vmul.f32 1.442695, %v907_v59 }
 0x26d   :  { %3547 = vmatmul.msk.bf16.vlgmr.msra.gmra.mxu1 %vm848_vm0, %v1028_v41 }
 0x26e   :  { %3872 = vpow2.f32 %v933_v60  ;;  %1264 = vmatpush.bf16.msra.mxu1 %v1255_v3 }
 0x271   :  { %v959_v63 = vpop.xlane.xlu2 %958  ;;  %v890_v0 = vpop.xlane.xlu1 %889 }
 0x272   :  { %3874 = vrcp.f32 %v959_v63  ;;  %v910_v1 = vsub.f32 %v4395_v24, %v890_v0 }
 0x274   :  { %v4478_v2 = vpop.eup %3872  ;;  %v939_v56 = vmul.f32 1.442695, %v910_v1 }
 0x275   :  { %v975_v14 = vsel %vm848_vm0, %v4478_v2, 0.0 }
 0x276   :  { %3876 = vpow2.f32 %v939_v56  ;;  %976 = vadd.xlane.f32.xlu2 %v975_v14  ;;  %v3759_v56 = vld [vmem:[#allocation7 + $0x38] sm:$0xff] }
 0x278   :  { %v3875_v16 = vpop.eup %3874 }
 0x279   :  { %v1013_v4 = vmul.f32 %v3875_v16, %v4402_v30  ;;  %v884_v6 = vpop.xlane.xlu2 %883  ;;  %v3758_v16 = vld [vmem:[#allocation7 + $0x30] sm:$0xff] }
 0x27a   :  { %v908_v8 = vsub.f32 %v4406_v31, %v884_v6 }
 0x27b   :  { %v1029_v28 = vpack.c.bf16 %v1013_v4, %v1013_v4  ;;  %v3757_v4 = vld [vmem:[#allocation7 + $0x28] sm:$0xff] }
 0x27c   :  { %v4486_v9 = vpop.eup %3876  ;;  %v935_v24 = vmul.f32 1.442695, %v908_v8 }
 0x27d   :  { %3548 = vmatmul.msk.bf16.vlgmr.msrb.gmra.mxu2 %vm848_vm0, %v1029_v28  ;;  %v984_v52 = vsel %vm848_vm0, %v4486_v9, 0.0 }
 0x27e   :  { %3878 = vpow2.f32 %v935_v24  ;;  %1283 = vmatpush.bf16.msrb.mxu2 %v1274_v22  ;;  %985 = vadd.xlane.f32.xlu2 %v984_v52  ;;  %v3756_v24 = vld [vmem:[#allocation7 + $0x20] sm:$0xff] }
 0x281   :  { %v962_v62 = vpop.xlane.xlu0 %961 }
 0x282   :  { %3880 = vrcp.f32 %v962_v62  ;;  %v3755_v62 = vld [vmem:[#allocation7 + $0x18] sm:$0xff] }
 0x284   :  { %v4492_v30 = vpop.eup %3878 }
 0x285   :  { %v978_v31 = vsel %vm848_vm0, %v4492_v30, 0.0 }
 0x286   :  { %979 = vadd.xlane.f32.xlu0 %v978_v31 }
 0x288   :  { %v3881_v13 = vpop.eup %3880 }
 0x289   :  { %v1014_v17 = vmul.f32 %v3881_v13, %v4414_v40  ;;  %v887_v18 = vpop.xlane.xlu0 %886 }
 0x28a   :  { %v909_v36 = vsub.f32 %v4418_v45, %v887_v18  ;;  %v542_v45 = vpack.c.bf16 %v4375_v51, %v4375_v51  ;;  %v3753_v18 = vld [vmem:[#allocation7 + $0x8] sm:$0xff] }
 0x28b   :  { %v1030_v19 = vpack.c.bf16 %v1014_v17, %v1014_v17  ;;  %v3754_v17 = vld [vmem:[#allocation7 + $0x10] sm:$0xff] }
 0x28c   :  { %v937_v20 = vmul.f32 1.442695, %v909_v36  ;;  %v1312_v29 = vsel %vm1044_vm1, %v542_v45, 0 }
 0x28d   :  { %3549 = vmatmul.msk.bf16.vlgmr.msrb.gmra.mxu3 %vm848_vm0, %v1030_v19 }
 0x28e   :  { %3882 = vpow2.f32 %v937_v20  ;;  %1302 = vmatpush.bf16.msrb.mxu3 %v1293_v53  ;;  %v3752_v53 = vld [vmem:[#allocation7] sm:$0xff] }
 0x291   :  { %v965_v26 = vpop.xlane.xlu2 %964 }
 0x292   :  { %3884 = vrcp.f32 %v965_v26 }
 0x294   :  { %v4502_v23 = vpop.eup %3882 }
 0x295   :  { %v981_v50 = vsel %vm848_vm0, %v4502_v23, 0.0 }
 0x296   :  { %982 = vadd.xlane.f32.xlu1 %v981_v50 }
 0x298   :  { %v3885_v40 = vpop.eup %3884 }
 0x299   :  { %v1015_v25 = vmul.f32 %v3885_v40, %v4423_v61  ;;  %v1331_v61 = vsel %vm1044_vm1, %v543_v32, 0 }
 0x29b   :  { %v1031_v27 = vpack.c.bf16 %v1015_v25, %v1015_v25 }
 0x29d   :  { %3550 = vmatmul.msk.bf16.vlgmr.msra.gmra.mxu0 %vm848_vm0, %v1031_v27 }
 0x29e   :  { %1321 = vmatpush.bf16.msra.mxu0 %v1312_v29 }
 0x2a1   :  { %v968_v43 = vpop.xlane.xlu0 %967 }
 0x2a2   :  { %3886 = vrcp.f32 %v968_v43 }
 0x2a8   :  { %v3887_v54 = vpop.eup %3886 }
 0x2a9   :  { %v1016_v35 = vmul.f32 %v3887_v54, %v4431_v5  ;;  %v893_v12 = vpop.xlane.xlu0 %892 }
 0x2aa   :  { %v911_v57 = vsub.f32 %v4435_v7, %v893_v12 }
 0x2ab   :  { %v1032_v51 = vpack.c.bf16 %v1016_v35, %v1016_v35 }
 0x2ac   :  { %v941_v55 = vmul.f32 1.442695, %v911_v57 }
 0x2ad   :  { %3551 = vmatmul.msk.bf16.vlgmr.msrb.gmra.mxu1 %vm848_vm0, %v1032_v51 }
 0x2ae   :  { %3888 = vpow2.f32 %v941_v55  ;;  %1340 = vmatpush.bf16.msrb.mxu1 %v1331_v61 }
 0x2b1   :  { %v971_v39 = vpop.xlane.xlu1 %970 }
 0x2b2   :  { %3890 = vrcp.f32 %v971_v39 }
 0x2b4   :  { %v4517_v33 = vpop.eup %3888 }
 0x2b5   :  { %v987_v11 = vsel %vm848_vm0, %v4517_v33, 0.0 }
 0x2b6   :  { %988 = vadd.xlane.f32.xlu0 %v987_v11 }
 0x2b8   :  { %v3891_v5 = vpop.eup %3890 }
 0x2b9   :  { %v1017_v48 = vmul.f32 %v3891_v5, %v4443_v34  ;;  %v896_v7 = vpop.xlane.xlu1 %895 }
 0x2ba   :  { %v912_v42 = vsub.f32 %v4452_v38, %v896_v7 }
 0x2bb   :  { %v1033_v44 = vpack.c.bf16 %v1017_v48, %v1017_v48 }
 0x2bc   :  { %v943_v49 = vmul.f32 1.442695, %v912_v42 }
 0x2bd   :  { %3552 = vmatmul.msk.bf16.vlgmr.msra.gmra.mxu2 %vm848_vm0, %v1033_v44 }
 0x2be   :  { %3892 = vpow2.f32 %v943_v49  ;;  %3792 = vmatpush.bf16.msra.mxu2 %v3759_v56 }
 0x2c1   :  { %v974_v46 = vpop.xlane.xlu2 %973 }
 0x2c2   :  { %3894 = vrcp.f32 %v974_v46  ;;  %v4524_v47 = vpop.f32.mrf.mxu2  ;;  %3794 = vmatpush.bf16.msra.mxu2 %v3758_v16 }
 0x2c4   :  { %v4526_v58 = vpop.eup %3892 }
 0x2c5   :  { %v990_v21 = vsel %vm848_vm0, %v4526_v58, 0.0 }
 0x2c6   :  { %991 = vadd.xlane.f32.xlu1 %v990_v21  ;;  %3796 = vmatpush.bf16.msra.mxu2 %v3757_v4 }
 0x2c8   :  { %v3895_v59 = vpop.eup %3894 }
 0x2c9   :  { %v1018_v34 = vmul.f32 %v3895_v59, %v4460_v37 }
 0x2ca   :  { %v1059_v41 = vpop.f32.mrf.mxu2  ;;  %3798 = vmatpush.bf16.msra.mxu2 %v3756_v24 }
 0x2cb   :  { %v1034_v38 = vpack.c.bf16 %v1018_v34, %v1018_v34 }
 0x2cd   :  { %3553 = vmatmul.msk.bf16.vlgmr.msra.gmra.mxu3 %vm848_vm0, %v1034_v38 }
 0x2ce   :  { %3793 = vmatpush.bf16.msra.mxu3 %v3759_v56  ;;  %3800 = vmatpush.bf16.msra.mxu2 %v3755_v62 }
 0x2d0   :  { %v4532_v60 = vpop.f32.mrf.mxu3 }
 0x2d1   :  { %v1346_v3 = vpack.c.bf16 %v4532_v60, %v4524_v47 }
 0x2d2   :  { %3795 = vmatpush.bf16.msra.mxu3 %v3758_v16  ;;  %3802 = vmatpush.bf16.msra.mxu2 %v3754_v17 }
 0x2d6   :  { %3797 = vmatpush.bf16.msra.mxu3 %v3757_v4  ;;  %3804 = vmatpush.bf16.msra.mxu2 %v3753_v18 }
 0x2d8   :  { %v1078_v63 = vpop.f32.mrf.mxu3 }
 0x2da   :  { %v4536_v0 = vpop.f32.mrf.mxu0  ;;  %3799 = vmatpush.bf16.msra.mxu3 %v3756_v24  ;;  %3806 = vmatpush.bf16.msra.mxu2 %v3752_v53 }
 0x2de   :  { %3801 = vmatpush.bf16.msra.mxu3 %v3755_v62 }
 0x2e2   :  { %v1097_v1 = vpop.f32.mrf.mxu0  ;;  %3803 = vmatpush.bf16.msra.mxu3 %v3754_v17 }
 0x2e3   :  { %v109_v1 = vld [vmem:[#allocation2] sm:$0xff]  }
 0x2e6   :  { %3805 = vmatpush.bf16.msra.mxu3 %v3753_v18 }
 0x2e9   :  { %v977_v14 = vpop.xlane.xlu2 %976 }
 0x2ea   :  { %3896 = vrcp.f32 %v977_v14  ;;  %v4538_v37 = vpop.f32.mrf.mxu1  ;;  %3807 = vmatpush.bf16.msra.mxu3 %v3752_v53 }
 0x2eb   :  { %v1347_v10 = vpack.c.bf16 %v4538_v37, %v4536_v0 }
 0x2f0   :  { %v3897_v6 = vpop.eup %3896 }
 0x2f1   :  { %v1019_v8 = vmul.f32 %v3897_v6, %v4478_v2  ;;  %v986_v28 = vpop.xlane.xlu2 %985  ;;  %v126_v6 = vunpack.c.h.bf16 %v109_v1 }
 0x2f2   :  { %3898 = vrcp.f32 %v986_v28  ;;  %v1116_v22 = vpop.f32.mrf.mxu1 }
 0x2f3   :  { %v1035_v52 = vpack.c.bf16 %v1019_v8, %v1019_v8  ;;  %v111_v22 = vld [vmem:[#allocation2 + $0x8] sm:$0xff]  }
 0x2f5   :  { %3554 = vmatmul.msk.bf16.vlgmr.msrb.gmra.mxu0 %vm848_vm0, %v1035_v52 }
 0x2f6   :  { %1418 = vmatpush.bf16.msrb.mxu0 %v3759_v56  ;;  %v125_v56 = vunpack.c.l.bf16 %v109_v1  ;;  %v3774_v1 = vld [vmem:[%s5867_s7 + $0x74] sm:$0xf] }
 0x2f8   :  { %v3899_v31 = vpop.eup %3898 }
 0x2f9   :  { %v1022_v13 = vmul.f32 %v3899_v31, %v4486_v9  ;;  %v980_v15 = vpop.xlane.xlu0 %979 }
 0x2fa   :  { %3900 = vrcp.f32 %v980_v15  ;;  %1419 = vmatpush.bf16.msrb.mxu0 %v3758_v16 }
 0x2fb   :  { %v1038_v2 = vpack.c.bf16 %v1022_v13, %v1022_v13 }
 0x2fd   :  { %3557 = vmatmul.msk.bf16.vlgmr.msrb.gmra.mxu3 %vm848_vm0, %v1038_v2  ;;  %v128_v2 = vunpack.c.h.bf16 %v111_v22 }
 0x2fe   :  { %1420 = vmatpush.bf16.msrb.mxu0 %v3757_v4 }
 0x300   :  { %v3901_v36 = vpop.eup %3900  ;;  %v1133_v19 = vpop.f32.mrf.mxu2 }
 0x301   :  { %v1020_v20 = vmul.f32 %v3901_v36, %v4492_v30 }
 0x302   :  { %1421 = vmatpush.bf16.msrb.mxu0 %v3756_v24 }
 0x303   :  { %v1036_v9 = vpack.c.bf16 %v1020_v20, %v1020_v20 }
 0x305   :  { %3555 = vmatmul.msk.bf16.vlgmr.msra.gmra.mxu1 %vm848_vm0, %v1036_v9 }
 0x306   :  { %1422 = vmatpush.bf16.msrb.mxu0 %v3755_v62  ;;  %v127_v62 = vunpack.c.l.bf16 %v111_v22 }
 0x308   :  { %v1135_v26 = vpop.f32.mrf.mxu2 }
 0x309   :  { %v983_v50 = vpop.xlane.xlu1 %982 }
 0x30a   :  { %3902 = vrcp.f32 %v983_v50  ;;  %1423 = vmatpush.bf16.msrb.mxu0 %v3754_v17 }
 0x30e   :  { %1424 = vmatpush.bf16.msrb.mxu0 %v3753_v18  ;;  %v113_v18 = vld [vmem:[#allocation2 + $0x10] sm:$0xff]  }
 0x30f   :  { %v130_v36 = vunpack.c.h.bf16 %v113_v18  ;;  %v129_v9 = vunpack.c.l.bf16 %v113_v18 }
 0x310   :  { %v3903_v40 = vpop.eup %3902  ;;  %v1152_v45 = vpop.f32.mrf.mxu3 }
 0x311   :  { %v1021_v25 = vmul.f32 %v3903_v40, %v4502_v23  ;;  %v1348_v54 = vpack.c.bf16 %v1152_v45, %v1133_v19  ;;  %v115_v40 = vld [vmem:[#allocation2 + $0x18] sm:$0xff]  }
 0x312   :  { %1425 = vmatpush.bf16.msrb.mxu0 %v3752_v53 }
 0x313   :  { %v1037_v27 = vpack.c.bf16 %v1021_v25, %v1021_v25  ;;  %v131_v25 = vunpack.c.l.bf16 %v115_v40 }
 0x315   :  { %3556 = vmatmul.msk.bf16.vlgmr.msrb.gmra.mxu2 %vm848_vm0, %v1037_v27 }
 0x318   :  { %v1154_v30 = vpop.f32.mrf.mxu3 }
 0x31a   :  { %v1171_v29 = vpop.f32.mrf.mxu0 }
 0x322   :  { %v1173_v43 = vpop.f32.mrf.mxu0 }
 0x325   :  { %1436 = vmatmul.bf16.vlgmr.msra.gmra.mxu2 %v1348_v54 }
 0x329   :  { %v989_v32 = vpop.xlane.xlu0 %988 }
 0x32a   :  { %3904 = vrcp.f32 %v989_v32  ;;  %v1190_v35 = vpop.f32.mrf.mxu1  ;;  %v117_v32 = vld [vmem:[#allocation2 + $0x20] sm:$0xff]  }
 0x32b   :  { %v1349_v61 = vpack.c.bf16 %v1190_v35, %v1171_v29  ;;  %v132_v29 = vunpack.c.h.bf16 %v115_v40 }
 0x330   :  { %v3905_v12 = vpop.eup %3904 }
 0x331   :  { %v1023_v57 = vmul.f32 %v3905_v12, %v4517_v33 }
 0x332   :  { %v1192_v51 = vpop.f32.mrf.mxu1 }
 0x333   :  { %v1039_v55 = vpack.c.bf16 %v1023_v57, %v1023_v57  ;;  %v133_v57 = vunpack.c.l.bf16 %v117_v32 }
 0x335   :  { %3558 = vmatmul.msk.bf16.vlgmr.msra.gmra.mxu0 %vm848_vm0, %v1039_v55  ;;  %1441 = vmatmul.bf16.gmra.mxu2 %v1349_v61 }
 0x339   :  { %v992_v23 = vpop.xlane.xlu1 %991 }
 0x33a   :  { %3906 = vrcp.f32 %v992_v23  ;;  %v134_v23 = vunpack.c.h.bf16 %v117_v32  ;;  %v3766_v32 = vld [vmem:[%s5867_s7 + $0x34] sm:$0xf] }
 0x340   :  { %v3907_v39 = vpop.eup %3906  ;;  %v1209_v11 = vpop.f32.mrf.mxu2 }
 0x341   :  { %v1024_v5 = vmul.f32 %v3907_v39, %v4526_v58 }
 0x343   :  { %v1040_v48 = vpack.c.bf16 %v1024_v5, %v1024_v5 }
 0x345   :  { %3559 = vmatmul.msk.bf16.vlgmr.msrb.gmra.mxu1 %vm848_vm0, %v1040_v48  ;;  %1426 = vmatmul.bf16.vlgmr.msrb.gmra.mxu0 %v1346_v3 }
 0x348   :  { %v1211_v33 = vpop.f32.mrf.mxu2 }
 0x349   :  { %v119_v33 = vld [vmem:[#allocation2 + $0x28] sm:$0xff]  }
 0x350   :  { %v1228_v7 = vpop.f32.mrf.mxu3 }
 0x351   :  { %v1350_v42 = vpack.c.bf16 %v1228_v7, %v1209_v11  ;;  %v135_v7 = vunpack.c.l.bf16 %v119_v33 }
 0x353   :  { %1446 = vmatmul.bf16.gmra.mxu2 %v1350_v42 }
 0x355   :  { %1431 = vmatmul.bf16.gmra.mxu0 %v1347_v10 }
 0x358   :  { %v1230_v44 = vpop.f32.mrf.mxu3 }
 0x372   :  { %v1247_v49 = vpop.f32.mrf.mxu0 }
 0x37a   :  { %v1249_v46 = vpop.f32.mrf.mxu0 }
 0x37b   :  { %v136_v46 = vunpack.c.h.bf16 %v119_v33 }
 0x380   :  { %v1304_v21 = vpop.f32.mrf.mxu3 }
 0x382   :  { %v1266_v58 = vpop.f32.mrf.mxu1 }
 0x383   :  { %v1351_v59 = vpack.c.bf16 %v1266_v58, %v1247_v49 }
 0x385   :  { %1451 = vmatmul.bf16.vlgmr.msra.gmra.mxu3 %v1351_v59 }
 0x388   :  { %v1306_v34 = vpop.f32.mrf.mxu3 }
 0x389   :  { %v121_v34 = vld [vmem:[#allocation2 + $0x30] sm:$0xff]  }
 0x38a   :  { %v1268_v41 = vpop.f32.mrf.mxu1 }
 0x38b   :  { %v137_v41 = vunpack.c.l.bf16 %v121_v34 }
 0x398   :  { %v1285_v38 = vpop.f32.mrf.mxu2 }
 0x399   :  { %v1352_v47 = vpack.c.bf16 %v1304_v21, %v1285_v38 }
 0x39b   :  { %1456 = vmatmul.bf16.gmra.mxu3 %v1352_v47 }
 0x3a0   :  { %v1287_v60 = vpop.f32.mrf.mxu2 }
 0x3a8   :  { %v1437_v4 = vpop.f32.mrf.mxu2 }
 0x3a9   :  { %v4583_v45 = vadd.f32 %v1437_v4, %v129_v9  ;;  %v3642_v4 = vld [vmem:[%s5867_s7 + $0x60] sm:$0xf]  ;;  %v3769_v9 = vld [vmem:[%s5867_s7 + $0x44] sm:$0xf0] }
 0x3ab   :  { %v1537_v43 = vmul.f32 %v4583_v45, %v4583_v45 }
 0x3b0   :  { %v1439_v31 = vpop.f32.mrf.mxu2 }
 0x3b1   :  { %v4577_v26 = vadd.f32 %v1439_v31, %v130_v36  ;;  %v3636_v36 = vld [vmem:[%s5867_s7 + $0x58] sm:$0xf0] }
 0x3b2   :  { %v1323_v3 = vpop.f32.mrf.mxu0 }
 0x3b3   :  { %v1538_v35 = vmul.f32 %v4577_v26, %v4577_v26 }
 0x3b8   :  { %v1442_v19 = vpop.f32.mrf.mxu2 }
 0x3b9   :  { %v4585_v30 = vadd.f32 %v1442_v19, %v131_v25  ;;  %v3628_v25 = vld [vmem:[%s5867_s7 + $0x48] sm:$0xf0] }
 0x3ba   :  { %v1325_v63 = vpop.f32.mrf.mxu0 }
 0x3bb   :  { %v1539_v61 = vmul.f32 %v4585_v30, %v4585_v30  ;;  %v3775_v63 = vld [vmem:[%s5867_s7 + $0x74] sm:$0xf0] }
 0x3c0   :  { %v1444_v27 = vpop.f32.mrf.mxu2 }
 0x3c1   :  { %v4591_v54 = vadd.f32 %v1444_v27, %v132_v29  ;;  %v3618_v29 = vld [vmem:[%s5867_s7 + $0x30] sm:$0xf] }
 0x3c2   :  { %v1342_v14 = vpop.f32.mrf.mxu1  ;;  %v1427_v0 = vpop.f32.mrf.mxu0 }
 0x3c3   :  { %v1353_v16 = vpack.c.bf16 %v1342_v14, %v1323_v3  ;;  %v4560_v37 = vadd.f32 %v1427_v0, %v125_v56  ;;  %v1540_v51 = vmul.f32 %v4591_v54, %v4591_v54  ;;  %v3650_v3 = vld [vmem:[%s5867_s7 + $0x70] sm:$0xf]  ;;  %v138_v56 = vunpack.c.h.bf16 %v121_v34  ;;  %v3652_v0 = vld [vmem:[%s5867_s7 + $0x78] sm:$0xf0] }
 0x3c4   :  { %v3651_v14 = vor.u32 %v3775_v63, %v3650_v3  ;;  %v3594_v63 = vld [vmem:[%s5867_s7] sm:$0xf] }
 0x3c5   :  { %1461 = vmatmul.bf16.gmra.mxu3 %v1353_v16  ;;  %1485 = vadd.xlane.f32.xlu2 %v4560_v37  ;;  %v1533_v10 = vmul.f32 %v4560_v37, %v4560_v37  ;;  %v3655_v16 = vor.u32 %v3774_v1, %v3652_v0  ;;  %v3761_v1 = vld [vmem:[%s5867_s7 + $0x4] sm:$0xf0] }
 0x3c6   :  { %1985 = vmatpush.bf16.msrb.mxu3 %v3651_v14  ;;  %v3595_v0 = vor.u32 %v3761_v1, %v3594_v63 }
 0x3c7   :  { %1549 = vadd.xlane.f32.xlu1 %v1533_v10  ;;  %2034 = vmatpush.bf16.msra.mxu0 %v3655_v16  ;;  %v3596_v16 = vld [vmem:[%s5867_s7 + $0x8] sm:$0xf0] }
 0x3ca   :  { %v1344_v8 = vpop.f32.mrf.mxu1  ;;  %v1429_v28 = vpop.f32.mrf.mxu0 }
 0x3cb   :  { %v4565_v24 = vadd.f32 %v1429_v28, %v126_v6  ;;  %v3773_v6 = vld [vmem:[%s5867_s7 + $0x64] sm:$0xf0]  ;;  %v3772_v8 = vld [vmem:[%s5867_s7 + $0x64] sm:$0xf] }
 0x3cc   :  { %v3643_v22 = vor.u32 %v3773_v6, %v3642_v4 }
 0x3cd   :  { %1487 = vadd.xlane.f32.xlu0 %v4565_v24  ;;  %v1534_v52 = vmul.f32 %v4565_v24, %v4565_v24 }
 0x3ce   :  { %1986 = vmatpush.bf16.msrb.mxu3 %v3643_v22  ;;  %v123_v22 = vld [vmem:[#allocation2 + $0x38] sm:$0xff]  }
 0x3cf   :  { %1551 = vadd.xlane.f32.xlu2 %v1534_v52  ;;  %v3644_v52 = vld [vmem:[%s5867_s7 + $0x68] sm:$0xf0] }
 0x3d2   :  { %v1432_v13 = vpop.f32.mrf.mxu0 }
 0x3d3   :  { %v4570_v15 = vadd.f32 %v1432_v13, %v127_v62  ;;  %v3647_v62 = vor.u32 %v3772_v8, %v3644_v52  ;;  %v3634_v13 = vld [vmem:[%s5867_s7 + $0x50] sm:$0xf] }
 0x3d5   :  { %1489 = vadd.xlane.f32.xlu0 %v4570_v15  ;;  %v1535_v17 = vmul.f32 %v4570_v15, %v4570_v15  ;;  %2035 = vmatpush.bf16.msra.mxu0 %v3647_v62 }
 0x3d6   :  { %v1447_v12 = vpop.f32.mrf.mxu2 }
 0x3d7   :  { %1553 = vadd.xlane.f32.xlu2 %v1535_v17  ;;  %v4598_v55 = vadd.f32 %v1447_v12, %v133_v57  ;;  %v3771_v17 = vld [vmem:[%s5867_s7 + $0x54] sm:$0xf0]  ;;  %v3620_v12 = vld [vmem:[%s5867_s7 + $0x38] sm:$0xf0] }
 0x3d8   :  { %v3635_v18 = vor.u32 %v3771_v17, %v3634_v13  ;;  %v3623_v57 = vor.u32 %v3766_v32, %v3620_v12  ;;  %v139_v13 = vunpack.c.l.bf16 %v123_v22 }
 0x3d9   :  { %v1541_v39 = vmul.f32 %v4598_v55, %v4598_v55 }
 0x3da   :  { %v1434_v20 = vpop.f32.mrf.mxu0  ;;  %1987 = vmatpush.bf16.msrb.mxu3 %v3635_v18 }
 0x3db   :  { %v4575_v53 = vadd.f32 %v1434_v20, %v128_v2  ;;  %v3770_v2 = vld [vmem:[%s5867_s7 + $0x54] sm:$0xf]  ;;  %v3626_v20 = vld [vmem:[%s5867_s7 + $0x40] sm:$0xf] }
 0x3dc   :  { %v3639_v19 = vor.u32 %v3770_v2, %v3636_v36  ;;  %v3627_v40 = vor.u32 %v3769_v9, %v3626_v20 }
 0x3dd   :  { %1491 = vadd.xlane.f32.xlu1 %v4575_v53  ;;  %v1536_v50 = vmul.f32 %v4575_v53, %v4575_v53 }
 0x3de   :  { %v1449_v11 = vpop.f32.mrf.mxu2  ;;  %2036 = vmatpush.bf16.msra.mxu0 %v3639_v19  ;;  %1988 = vmatpush.bf16.msrb.mxu3 %v3627_v40 }
 0x3df   :  { %1555 = vadd.xlane.f32.xlu0 %v1536_v50  ;;  %1495 = vadd.xlane.f32.xlu2 %v4577_v26  ;;  %v4605_v5 = vadd.f32 %v1449_v11, %v134_v23  ;;  %v3768_v50 = vld [vmem:[%s5867_s7 + $0x44] sm:$0xf]  ;;  %v3612_v11 = vld [vmem:[%s5867_s7 + $0x28] sm:$0xf0] }
 0x3e0   :  { %v3631_v27 = vor.u32 %v3768_v50, %v3628_v25  ;;  %v3764_v23 = vld [vmem:[%s5867_s7 + $0x24] sm:$0xf] }
 0x3e1   :  { %v1542_v48 = vmul.f32 %v4605_v5, %v4605_v5  ;;  %v3615_v33 = vor.u32 %v3764_v23, %v3612_v11 }
 0x3e2   :  { %2037 = vmatpush.bf16.msra.mxu0 %v3631_v27 }
 0x3e5   :  { %1493 = vadd.xlane.f32.xlu1 %v4583_v45 }
 0x3e6   :  { %2038 = vmatpush.bf16.msra.mxu0 %v3623_v57 }
 0x3e7   :  { %1557 = vadd.xlane.f32.xlu0 %v1537_v43  ;;  %1497 = vadd.xlane.f32.xlu2 %v4585_v30  ;;  %v3767_v43 = vld [vmem:[%s5867_s7 + $0x34] sm:$0xf0] }
 0x3ea   :  { %2039 = vmatpush.bf16.msra.mxu0 %v3615_v33 }
 0x3ed   :  { %1559 = vadd.xlane.f32.xlu1 %v1538_v35  ;;  %v3619_v35 = vor.u32 %v3767_v43, %v3618_v29 }
 0x3ef   :  { %1499 = vadd.xlane.f32.xlu0 %v4591_v54  ;;  %1563 = vadd.xlane.f32.xlu2 %v1540_v51  ;;  %v3610_v51 = vld [vmem:[%s5867_s7 + $0x20] sm:$0xf] }
 0x3f0   :  { %1989 = vmatpush.bf16.msrb.mxu3 %v3619_v35  ;;  %v140_v35 = vunpack.c.h.bf16 %v123_v22 }
 0x3f5   :  { %1561 = vadd.xlane.f32.xlu1 %v1539_v61  ;;  %v3765_v61 = vld [vmem:[%s5867_s7 + $0x24] sm:$0xf0] }
 0x3f7   :  { %1501 = vadd.xlane.f32.xlu0 %v4598_v55  ;;  %1565 = vadd.xlane.f32.xlu2 %v1541_v39  ;;  %v3611_v39 = vor.u32 %v3765_v61, %v3610_v51 }
 0x3f9   :  { %1990 = vmatpush.bf16.msrb.mxu3 %v3611_v39 }
 0x3fd   :  { %1503 = vadd.xlane.f32.xlu1 %v4605_v5 }
 0x3ff   :  { %1567 = vadd.xlane.f32.xlu0 %v1542_v48 }
 0x408   :  { %v1452_v42 = vpop.f32.mrf.mxu3 }
 0x409   :  { %v4610_v44 = vadd.f32 %v1452_v42, %v135_v7 }
 0x40b   :  { %1505 = vadd.xlane.f32.xlu1 %v4610_v44  ;;  %v1543_v49 = vmul.f32 %v4610_v44, %v4610_v44 }
 0x40d   :  { %1569 = vadd.xlane.f32.xlu0 %v1543_v49  ;;  %v3602_v49 = vld [vmem:[%s5867_s7 + $0x10] sm:$0xf] }
 0x410   :  { %v1454_v21 = vpop.f32.mrf.mxu3 }
 0x411   :  { %v4615_v58 = vadd.f32 %v1454_v21, %v136_v46  ;;  %v3763_v46 = vld [vmem:[%s5867_s7 + $0x14] sm:$0xf0]  ;;  %v3762_v21 = vld [vmem:[%s5867_s7 + $0x14] sm:$0xf] }
 0x413   :  { %1507 = vadd.xlane.f32.xlu2 %v4615_v58  ;;  %v1544_v59 = vmul.f32 %v4615_v58, %v4615_v58 }
 0x415   :  { %1571 = vadd.xlane.f32.xlu1 %v1544_v59 }
 0x41e   :  { %v1457_v38 = vpop.f32.mrf.mxu3 }
 0x41f   :  { %v4620_v47 = vadd.f32 %v1457_v38, %v137_v41  ;;  %v3603_v41 = vor.u32 %v3763_v46, %v3602_v49  ;;  %v3604_v38 = vld [vmem:[%s5867_s7 + $0x18] sm:$0xf0] }
 0x421   :  { %1509 = vadd.xlane.f32.xlu2 %v4620_v47  ;;  %v1545_v60 = vmul.f32 %v4620_v47, %v4620_v47  ;;  %1991 = vmatpush.bf16.msrb.mxu3 %v3603_v41 }
 0x423   :  { %1573 = vadd.xlane.f32.xlu1 %v1545_v60  ;;  %v3607_v60 = vor.u32 %v3762_v21, %v3604_v38 }
 0x425   :  { %2040 = vmatpush.bf16.msra.mxu0 %v3607_v60  ;;  %1992 = vmatpush.bf16.msrb.mxu3 %v3595_v0 }
 0x426   :  { %v1459_v10 = vpop.f32.mrf.mxu3 }
 0x427   :  { %v4646_v28 = vadd.f32 %v1459_v10, %v138_v56  ;;  %v3760_v56 = vld [vmem:[%s5867_s7 + $0x4] sm:$0xf] }
 0x428   :  { %v3599_v4 = vor.u32 %v3760_v56, %v3596_v16  ;;  %v4762_v56 = vld [vmem:[%s5865_s5] ss:$0 sm:$0xff] }
 0x429   :  { %1511 = vadd.xlane.f32.xlu0 %v4646_v28  ;;  %v1546_v31 = vmul.f32 %v4646_v28, %v4646_v28 }
 0x42a   :  { %2041 = vmatpush.bf16.msra.mxu0 %v3599_v4 }
 0x42b   :  { %1575 = vadd.xlane.f32.xlu2 %v1546_v31 }
 0x438   :  { %v1486_v48 = vpop.xlane.xlu2 %1485 }
 0x439   :  { %v4702_v7 = vmul.f32 0.0078125, %v1486_v48 }
 0x43a   :  { %v1550_v42 = vpop.xlane.xlu1 %1549 }
 0x43b   :  { %v1597_v59 = vmul.f32 %v4702_v7, %v4702_v7  ;;  %v1581_v34 = vmul.f32 0.0078125, %v1550_v42  ;;  %v1629_v60 = vsub.f32 %v4560_v37, %v4702_v7 }
 0x43d   :  { %v1613_v3 = vsub.f32 %v1581_v34, %v1597_v59 }
 0x43f   :  { %v1645_v14 = vadd.f32 1e-05, %v1613_v3 }
 0x440   :  { %v1488_v10 = vpop.xlane.xlu0 %1487 }
 0x441   :  { %3908 = vrsqrt.f32 %v1645_v14  ;;  %v4730_v6 = vmul.f32 0.0078125, %v1488_v10  ;;  %vm1667_vm3 = vweird.f32 %v1645_v14 }
 0x442   :  { %v1552_v8 = vpop.xlane.xlu2 %1551 }
 0x443   :  { %v1598_v52 = vmul.f32 %v4730_v6, %v4730_v6  ;;  %v1582_v62 = vmul.f32 0.0078125, %v1552_v8  ;;  %v1630_v37 = vsub.f32 %v4565_v24, %v4730_v6  ;;  %v4777_v24 = vld [vmem:[%s5866_s6] ss:$0 sm:$0xff] }
 0x445   :  { %v1614_v31 = vsub.f32 %v1582_v62, %v1598_v52 }
 0x447   :  { %v3909_v17 = vpop.eup %3908  ;;  %v1646_v2 = vadd.f32 1e-05, %v1614_v31 }
 0x448   :  { %v1662_v18 = vmul.f32 %v3909_v17, %v1645_v14  ;;  %v1490_v36 = vpop.xlane.xlu0 %1489  ;;  %v1462_v19 = vpop.f32.mrf.mxu3  ;;  %vm1668_vm2 = vweird.f32 %v3909_v17 }
 0x449   :  { %3910 = vrsqrt.f32 %v1646_v2  ;;  %v4734_v20 = vmul.f32 0.0078125, %v1490_v36  ;;  %v4736_v9 = vadd.f32 %v1462_v19, %v139_v13  ;;  %vm1669_vm4 = vmor %vm1667_vm3, %vm1668_vm2  ;;  %vm1677_vm6 = vweird.f32 %v1646_v2 }
 0x44a   :  { %v1663_v50 = vmul.f32 %v3909_v17, %v1662_v18  ;;  %v1554_v40 = vpop.xlane.xlu2 %1553 }
 0x44b   :  { %v1599_v25 = vmul.f32 %v4734_v20, %v4734_v20  ;;  %v1583_v27 = vmul.f32 0.0078125, %v1554_v40  ;;  %1513 = vadd.xlane.f32.xlu0 %v4736_v9  ;;  %v1547_v29 = vmul.f32 %v4736_v9, %v4736_v9 }
 0x44c   :  { %v1664_v43 = vmul.f32 0.5, %v1663_v50 }
 0x44d   :  { %v1615_v32 = vsub.f32 %v1583_v27, %v1599_v25  ;;  %1577 = vadd.xlane.f32.xlu2 %v1547_v29 }
 0x44e   :  { %v1665_v12 = vsub.f32 1.5, %v1664_v43 }
 0x44f   :  { %v3911_v57 = vpop.eup %3910  ;;  %v4743_v51 = vadd.f32 1e-05, %v1615_v32 }
 0x450   :  { %v1666_v61 = vmul.f32 %v3909_v17, %v1665_v12  ;;  %v1672_v23 = vmul.f32 %v3911_v57, %v1646_v2  ;;  %v1464_v39 = vpop.f32.mrf.mxu3  ;;  %v1492_v11 = vpop.xlane.xlu1 %1491  ;;  %vm1678_vm5 = vweird.f32 %v3911_v57 }
 0x451   :  { %3912 = vrsqrt.f32 %v4743_v51  ;;  %v4746_v48 = vadd.f32 %v1464_v39, %v140_v35  ;;  %v4748_v33 = vmul.f32 0.0078125, %v1492_v11  ;;  %vm1679_vm7 = vmor %vm1677_vm6, %vm1678_vm5  ;;  %vm1687_vm9 = vweird.f32 %v4743_v51 }
 0x452   :  { %v1673_v42 = vmul.f32 %v3911_v57, %v1672_v23  ;;  %v1556_v49 = vpop.xlane.xlu0 %1555  ;;  %v1496_v46 = vpop.xlane.xlu2 %1495  ;;  %v1670_v34 = vsel %vm1669_vm4, %v3909_v17, %v1666_v61 }
 0x453   :  { %v1600_v21 = vmul.f32 %v4748_v33, %v4748_v33  ;;  %v1584_v59 = vmul.f32 0.0078125, %v1556_v49  ;;  %1515 = vadd.xlane.f32.xlu1 %v4746_v48  ;;  %v1548_v38 = vmul.f32 %v4746_v48, %v4746_v48  ;;  %v1821_v14 = vmul.f32 %v1670_v34, %v1629_v60 }
 0x454   :  { %v1674_v41 = vmul.f32 0.5, %v1673_v42  ;;  %v4780_v36 = vmul.f32 0.0078125, %v1496_v46 }
 0x455   :  { %v1616_v3 = vsub.f32 %v1584_v59, %v1600_v21  ;;  %1579 = vadd.xlane.f32.xlu0 %v1548_v38  ;;  %v1840_v31 = vmul.f32 %v4762_v56, %v1821_v14  ;;  %v1631_v14 = vsub.f32 %v4570_v15, %v4734_v20 }
 0x456   :  { %v1675_v63 = vsub.f32 1.5, %v1674_v41  ;;  %v1602_v35 = vmul.f32 %v4780_v36, %v4780_v36 }
 0x457   :  { %v4757_v1 = vpop.eup %3912  ;;  %v1648_v0 = vadd.f32 1e-05, %v1616_v3  ;;  %v4785_v27 = vadd.f32 %v4777_v24, %v1840_v31 }
 0x458   :  { %v1676_v16 = vmul.f32 %v3911_v57, %v1675_v63  ;;  %v1682_v10 = vmul.f32 %v4757_v1, %v4743_v51  ;;  %v1494_v4 = vpop.xlane.xlu1 %1493  ;;  %vm1688_vm8 = vweird.f32 %v4757_v1 }
 0x459   :  { %3914 = vrsqrt.f32 %v1648_v0  ;;  %v4768_v7 = vmul.f32 0.0078125, %v1494_v4  ;;  %vm4806_vm10 = vmor %vm1687_vm9, %vm1688_vm8  ;;  %vm1697_vm12 = vweird.f32 %v1648_v0 }
 0x45a   :  { %v1680_v8 = vsel %vm1679_vm7, %v3911_v57, %v1676_v16  ;;  %v1683_v22 = vmul.f32 %v4757_v1, %v1682_v10  ;;  %v1558_v52 = vpop.xlane.xlu0 %1557  ;;  %v1498_v62 = vpop.xlane.xlu2 %1497 }
 0x45b   :  { %v1822_v13 = vmul.f32 %v1680_v8, %v1630_v37  ;;  %v1601_v17 = vmul.f32 %v4768_v7, %v4768_v7  ;;  %v1585_v2 = vmul.f32 0.0078125, %v1558_v52  ;;  %v4800_v21 = vmul.f32 0.0078125, %v1498_v62 }
 0x45c   :  { %v1684_v6 = vmul.f32 0.5, %v1683_v22 }
 0x45d   :  { %v1841_v18 = vmul.f32 %v4762_v56, %v1822_v13  ;;  %v1617_v19 = vsub.f32 %v1585_v2, %v1601_v17  ;;  %v1603_v37 = vmul.f32 %v4800_v21, %v4800_v21 }
 0x45e   :  { %v1685_v40 = vsub.f32 1.5, %v1684_v6 }
 0x45f   :  { %v3915_v50 = vpop.eup %3914  ;;  %v4782_v25 = vadd.f32 1e-05, %v1617_v19  ;;  %v4788_v29 = vadd.f32 %v4777_v24, %v1841_v18 }
 0x460   :  { %v1692_v43 = vmul.f32 %v3915_v50, %v1648_v0  ;;  %v1560_v32 = vpop.xlane.xlu1 %1559  ;;  %v1686_v11 = vmul.f32 %v4757_v1, %v1685_v40  ;;  %vm1698_vm11 = vweird.f32 %v3915_v50 }
 0x461   :  { %3916 = vrsqrt.f32 %v4782_v25  ;;  %v1586_v12 = vmul.f32 0.0078125, %v1560_v32  ;;  %v1875_v57 = vpack.c.bf16 %v4788_v29, %v4785_v27  ;;  %vm1699_vm13 = vmor %vm1697_vm12, %vm1698_vm11  ;;  %vm1707_vm0 = vweird.f32 %v4782_v25 }
 0x462   :  { %v1693_v61 = vmul.f32 %v3915_v50, %v1692_v43  ;;  %v1500_v23 = vpop.xlane.xlu0 %1499  ;;  %v1564_v39 = vpop.xlane.xlu2 %1563  ;;  %v1690_v51 = vsel %vm4806_vm10, %v4757_v1, %v1686_v11  ;;  %v1632_v1 = vsub.f32 %v4575_v53, %v4748_v33 }
 0x463   :  { %v1618_v42 = vsub.f32 %v1586_v12, %v1602_v35  ;;  %v4797_v49 = vmul.f32 0.0078125, %v1500_v23  ;;  %1993 = vmatmul.bf16.vlgmr.msrb.gmra.mxu3 %v1875_v57  ;;  %2042 = vmatmul.bf16.vlgmr.msra.gmra.mxu0 %v1875_v57  ;;  %v1588_v41 = vmul.f32 0.0078125, %v1564_v39  ;;  %v1823_v20 = vmul.f32 %v1690_v51, %v1631_v14 }
 0x464   :  { %v1694_v46 = vmul.f32 0.5, %v1693_v61 }
 0x465   :  { %v4802_v59 = vadd.f32 1e-05, %v1618_v42  ;;  %v1604_v34 = vmul.f32 %v4797_v49, %v4797_v49  ;;  %v1842_v33 = vmul.f32 %v4762_v56, %v1823_v20 }
 0x466   :  { %v1695_v60 = vsub.f32 1.5, %v1694_v46 }
 0x467   :  { %v4810_v3 = vpop.eup %3916  ;;  %3918 = vrsqrt.f32 %v4802_v59  ;;  %v1620_v63 = vsub.f32 %v1588_v41, %v1604_v34  ;;  %v4846_v42 = vadd.f32 %v4777_v24, %v1842_v33  ;;  %vm1717_vm2 = vweird.f32 %v4802_v59 }
 0x468   :  { %v1696_v16 = vmul.f32 %v3915_v50, %v1695_v60  ;;  %v1702_v10 = vmul.f32 %v4810_v3, %v4782_v25  ;;  %v1562_v4 = vpop.xlane.xlu1 %1561  ;;  %vm1708_vm14 = vweird.f32 %v4810_v3 }
 0x469   :  { %v4822_v8 = vadd.f32 1e-05, %v1620_v63  ;;  %v1587_v22 = vmul.f32 0.0078125, %v1562_v4  ;;  %vm4857_vm1 = vmor %vm1707_vm0, %vm1708_vm14 }
 0x46a   :  { %v1700_v52 = vsel %vm1699_vm13, %v3915_v50, %v1696_v16  ;;  %v1703_v62 = vmul.f32 %v4810_v3, %v1702_v10  ;;  %v1502_v15 = vpop.xlane.xlu0 %1501  ;;  %v1566_v18 = vpop.xlane.xlu2 %1565 }
 0x46b   :  { %3920 = vrsqrt.f32 %v4822_v8  ;;  %v1619_v0 = vsub.f32 %v1587_v22, %v1603_v37  ;;  %v4828_v31 = vmul.f32 0.0078125, %v1502_v15  ;;  %v1824_v17 = vmul.f32 %v1700_v52, %v1632_v1 }
 0x46c   :  { %v1704_v13 = vmul.f32 0.5, %v1703_v62  ;;  %v1589_v32 = vmul.f32 0.0078125, %v1566_v18  ;;  %v1634_v37 = vsub.f32 %v4577_v26, %v4780_v36  ;;  %vm1737_vm8 = vweird.f32 %v4822_v8 }
 0x46d   :  { %v3919_v2 = vpop.eup %3918  ;;  %v4830_v6 = vadd.f32 1e-05, %v1619_v0  ;;  %v1605_v53 = vmul.f32 %v4828_v31, %v4828_v31  ;;  %v1843_v50 = vmul.f32 %v4762_v56, %v1824_v17 }
 0x46e   :  { %v1712_v19 = vmul.f32 %v3919_v2, %v4802_v59  ;;  %v1705_v40 = vsub.f32 1.5, %v1704_v13  ;;  %vm1718_vm15 = vweird.f32 %v3919_v2  ;;  %v1633_v59 = vsub.f32 %v4583_v45, %v4768_v7 }
 0x46f   :  { %3922 = vrsqrt.f32 %v4830_v6  ;;  %v4839_v12 = vadd.f32 %v4777_v24, %v1843_v50  ;;  %v1621_v39 = vsub.f32 %v1589_v32, %v1605_v53  ;;  %vm1719_vm3 = vmor %vm1717_vm2, %vm1718_vm15  ;;  %vm1727_vm5 = vweird.f32 %v4830_v6 }
 0x470   :  { %v1713_v43 = vmul.f32 %v3919_v2, %v1712_v19  ;;  %v1504_v35 = vpop.xlane.xlu1 %1503  ;;  %v1706_v46 = vmul.f32 %v4810_v3, %v1705_v40 }
 0x471   :  { %v4841_v57 = vpop.eup %3920  ;;  %v4843_v61 = vmul.f32 0.0078125, %v1504_v35  ;;  %v1876_v51 = vpack.c.bf16 %v4839_v12, %v4846_v42  ;;  %v4863_v4 = vadd.f32 1e-05, %v1621_v39 }
 0x472   :  { %v1714_v23 = vmul.f32 0.5, %v1713_v43  ;;  %v1568_v11 = vpop.xlane.xlu0 %1567  ;;  %v1732_v34 = vmul.f32 %v4841_v57, %v4822_v8  ;;  %v1710_v25 = vsel %vm4857_vm1, %v4810_v3, %v1706_v46  ;;  %vm1738_vm6 = vweird.f32 %v4841_v57 }
 0x473   :  { %v1606_v41 = vmul.f32 %v4843_v61, %v4843_v61  ;;  %v1590_v60 = vmul.f32 0.0078125, %v1568_v11  ;;  %1998 = vmatmul.bf16.gmra.mxu3 %v1876_v51  ;;  %2047 = vmatmul.bf16.gmra.mxu0 %v1876_v51  ;;  %3924 = vrsqrt.f32 %v4863_v4  ;;  %v1825_v26 = vmul.f32 %v1710_v25, %v1633_v59  ;;  %vm1739_vm9 = vmor %vm1737_vm8, %vm1738_vm6 }
 0x474   :  { %v1715_v38 = vsub.f32 1.5, %v1714_v23  ;;  %v1733_v22 = vmul.f32 %v4841_v57, %v1732_v34  ;;  %v1636_v8 = vsub.f32 %v4591_v54, %v4797_v49  ;;  %vm1747_vm14 = vweird.f32 %v4863_v4 }
 0x475   :  { %v3923_v63 = vpop.eup %3922  ;;  %v1622_v1 = vsub.f32 %v1590_v60, %v1606_v41  ;;  %v1844_v18 = vmul.f32 %v4762_v56, %v1825_v26 }
 0x476   :  { %v1716_v16 = vmul.f32 %v3919_v2, %v1715_v38  ;;  %v1722_v10 = vmul.f32 %v3923_v63, %v4830_v6  ;;  %v1734_v36 = vmul.f32 0.5, %v1733_v22  ;;  %vm1728_vm4 = vweird.f32 %v3923_v63 }
 0x477   :  { %v4873_v15 = vadd.f32 1e-05, %v1622_v1  ;;  %v4894_v35 = vadd.f32 %v4777_v24, %v1844_v18  ;;  %vm4900_vm7 = vmor %vm1727_vm5, %vm1728_vm4  ;;  %v1635_v38 = vsub.f32 %v4585_v30, %v4800_v21 }
 0x478   :  { %v1720_v52 = vsel %vm1719_vm3, %v3919_v2, %v1716_v16  ;;  %v1723_v62 = vmul.f32 %v3923_v63, %v1722_v10  ;;  %v1735_v19 = vsub.f32 1.5, %v1734_v36 }
 0x479   :  { %v1826_v20 = vmul.f32 %v1720_v52, %v1634_v37  ;;  %3926 = vrsqrt.f32 %v4873_v15  ;;  %v4881_v7 = vpop.eup %3924  ;;  %vm1757_vm12 = vweird.f32 %v4873_v15 }
 0x47a   :  { %v1724_v0 = vmul.f32 0.5, %v1723_v62  ;;  %v1736_v23 = vmul.f32 %v4841_v57, %v1735_v19  ;;  %v1742_v39 = vmul.f32 %v4881_v7, %v4863_v4  ;;  %vm1748_vm11 = vweird.f32 %v4881_v7 }
 0x47b   :  { %v1845_v3 = vmul.f32 %v4762_v56, %v1826_v20  ;;  %vm1749_vm15 = vmor %vm1747_vm14, %vm1748_vm11 }
 0x47c   :  { %v1725_v13 = vsub.f32 1.5, %v1724_v0  ;;  %v1740_v14 = vsel %vm1739_vm9, %v4841_v57, %v1736_v23  ;;  %v1743_v16 = vmul.f32 %v4881_v7, %v1742_v39 }
 0x47d   :  { %v4884_v53 = vadd.f32 %v4777_v24, %v1845_v3  ;;  %v1828_v22 = vmul.f32 %v1740_v14, %v1636_v8 }
 0x47e   :  { %v1506_v17 = vpop.xlane.xlu1 %1505  ;;  %v1726_v50 = vmul.f32 %v3923_v63, %v1725_v13  ;;  %v1744_v1 = vmul.f32 0.5, %v1743_v16 }
 0x47f   :  { %v4879_v45 = vmul.f32 0.0078125, %v1506_v17  ;;  %v4886_v33 = vpop.eup %3926  ;;  %v1877_v6 = vpack.c.bf16 %v4884_v53, %v4894_v35  ;;  %v1847_v20 = vmul.f32 %v4762_v56, %v1828_v22 }
 0x480   :  { %v1570_v2 = vpop.xlane.xlu0 %1569  ;;  %v1752_v32 = vmul.f32 %v4886_v33, %v4873_v15  ;;  %v1730_v34 = vsel %vm4900_vm7, %v3923_v63, %v1726_v50  ;;  %v1745_v0 = vsub.f32 1.5, %v1744_v1  ;;  %vm1758_vm10 = vweird.f32 %v4886_v33 }
 0x481   :  { %v1607_v40 = vmul.f32 %v4879_v45, %v4879_v45  ;;  %v1591_v43 = vmul.f32 0.0078125, %v1570_v2  ;;  %v1827_v37 = vmul.f32 %v1730_v34, %v1635_v38  ;;  %v4933_v36 = vadd.f32 %v4777_v24, %v1847_v20  ;;  %vm4940_vm13 = vmor %vm1757_vm12, %vm1758_vm10 }
 0x482   :  { %v1753_v41 = vmul.f32 %v4886_v33, %v1752_v32  ;;  %v1746_v3 = vmul.f32 %v4881_v7, %v1745_v0  ;;  %v1638_v15 = vsub.f32 %v4605_v5, %v4843_v61 }
 0x483   :  { %v1623_v11 = vsub.f32 %v1591_v43, %v1607_v40  ;;  %2003 = vmatmul.bf16.gmra.mxu3 %v1877_v6  ;;  %2052 = vmatmul.bf16.gmra.mxu0 %v1877_v6  ;;  %v1846_v57 = vmul.f32 %v4762_v56, %v1827_v37 }
 0x484   :  { %v1754_v25 = vmul.f32 0.5, %v1753_v41  ;;  %v1750_v23 = vsel %vm1749_vm15, %v4881_v7, %v1746_v3 }
 0x485   :  { %v4912_v60 = vadd.f32 1e-05, %v1623_v11  ;;  %v4928_v49 = vadd.f32 %v4777_v24, %v1846_v57 }
 0x486   :  { %v1508_v51 = vpop.xlane.xlu2 %1507  ;;  %v1755_v52 = vsub.f32 1.5, %v1754_v25 }
 0x487   :  { %v4916_v10 = vmul.f32 0.0078125, %v1508_v51  ;;  %3928 = vrsqrt.f32 %v4912_v60  ;;  %v1878_v18 = vpack.c.bf16 %v4933_v36, %v4928_v49  ;;  %vm1767_vm4 = vweird.f32 %v4912_v60 }
 0x488   :  { %v1572_v63 = vpop.xlane.xlu1 %1571  ;;  %v1756_v26 = vmul.f32 %v4886_v33, %v1755_v52 }
 0x489   :  { %v1608_v30 = vmul.f32 %v4916_v10, %v4916_v10  ;;  %v1592_v21 = vmul.f32 0.0078125, %v1572_v63 }
 0x48a   :  { %v1760_v50 = vsel %vm4940_vm13, %v4886_v33, %v1756_v26  ;;  %v1637_v33 = vsub.f32 %v4598_v55, %v4828_v31  ;;  %v1640_v26 = vsub.f32 %v4615_v58, %v4916_v10 }
 0x48b   :  { %v1624_v59 = vsub.f32 %v1592_v21, %v1608_v30  ;;  %v1830_v6 = vmul.f32 %v1760_v50, %v1638_v15 }
 0x48c   :  { %v1829_v5 = vmul.f32 %v1750_v23, %v1637_v33 }
 0x48d   :  { %v1656_v62 = vadd.f32 1e-05, %v1624_v59  ;;  %v4925_v54 = vpop.eup %3928  ;;  %v1849_v14 = vmul.f32 %v4762_v56, %v1830_v6 }
 0x48e   :  { %v1762_v13 = vmul.f32 %v4925_v54, %v4912_v60  ;;  %v1848_v63 = vmul.f32 %v4762_v56, %v1829_v5  ;;  %vm1768_vm1 = vweird.f32 %v4925_v54 }
 0x48f   :  { %3930 = vrsqrt.f32 %v1656_v62  ;;  %v4967_v25 = vadd.f32 %v4777_v24, %v1849_v14  ;;  %vm1777_vm2 = vweird.f32 %v1656_v62  ;;  %vm1769_vm5 = vmor %vm1767_vm4, %vm1768_vm1 }
 0x490   :  { %v1763_v39 = vmul.f32 %v4925_v54, %v1762_v13  ;;  %v4970_v22 = vadd.f32 %v4777_v24, %v1848_v63  ;;  %v3781_v63 = vld [vmem:[#allocation8 + $0x28] sm:$0xff] }
 0x492   :  { %v1764_v61 = vmul.f32 0.5, %v1763_v39  ;;  %v1879_v20 = vpack.c.bf16 %v4967_v25, %v4970_v22 }
 0x493   :  { %2008 = vmatmul.bf16.gmra.mxu3 %v1878_v18  ;;  %2057 = vmatmul.bf16.gmra.mxu0 %v1878_v18 }
 0x494   :  { %v1510_v19 = vpop.xlane.xlu2 %1509  ;;  %v1765_v37 = vsub.f32 1.5, %v1764_v61  ;;  %v3789_v61 = vld [vmem:[#allocation8 + $0x68] sm:$0xff] }
 0x495   :  { %v3931_v2 = vpop.eup %3930  ;;  %v4950_v40 = vmul.f32 0.0078125, %v1510_v19 }
 0x496   :  { %v1772_v43 = vmul.f32 %v3931_v2, %v1656_v62  ;;  %v1574_v32 = vpop.xlane.xlu1 %1573  ;;  %vm1778_vm0 = vweird.f32 %v3931_v2  ;;  %v1766_v59 = vmul.f32 %v4925_v54, %v1765_v37  ;;  %v1639_v62 = vsub.f32 %v4610_v44, %v4879_v45 }
 0x497   :  { %v1609_v4 = vmul.f32 %v4950_v40, %v4950_v40  ;;  %v1593_v11 = vmul.f32 0.0078125, %v1574_v32  ;;  %vm1779_vm3 = vmor %vm1777_vm2, %vm1778_vm0  ;;  %vm2977_vm2 = vcmask 7168  }
 0x498   :  { %v1773_v46 = vmul.f32 %v3931_v2, %v1772_v43  ;;  %v1770_v3 = vsel %vm1769_vm5, %v4925_v54, %v1766_v59  ;;  %v3791_v54 = vld [vmem:[#allocation8 + $0x78] sm:$0xff]  ;;  %v3786_v59 = vld [vmem:[#allocation8 + $0x50] sm:$0xff] }
 0x499   :  { %v1625_v34 = vsub.f32 %v1593_v11, %v1609_v4  ;;  %v1831_v18 = vmul.f32 %v1770_v3, %v1639_v62  ;;  %2312 = vmatpush.bf16.msrb.mxu2 %v3791_v54  ;;  %v3790_v11 = vld [vmem:[#allocation8 + $0x70] sm:$0xff]  ;;  %v3785_v62 = vld [vmem:[#allocation8 + $0x48] sm:$0xff]  ;;  %v3776_v54 = vld [vmem:[#allocation8] sm:$0xff] }
 0x49a   :  { %v1774_v41 = vmul.f32 0.5, %v1773_v46 }
 0x49b   :  { %v1657_v38 = vadd.f32 1e-05, %v1625_v34  ;;  %v1850_v43 = vmul.f32 %v4762_v56, %v1831_v18  ;;  %v3783_v34 = vld [vmem:[#allocation8 + $0x38] sm:$0xff]  ;;  %v3778_v18 = vld [vmem:[#allocation8 + $0x10] sm:$0xff] }
 0x49c   :  { %v1512_v51 = vpop.xlane.xlu0 %1511  ;;  %v1775_v7 = vsub.f32 1.5, %v1774_v41  ;;  %v1641_v41 = vsub.f32 %v4620_v47, %v4950_v40  ;;  %2263 = vmatpush.bf16.msra.mxu1 %v3783_v34 }
 0x49d   :  { %3932 = vrsqrt.f32 %v1657_v38  ;;  %v4961_v16 = vmul.f32 0.0078125, %v1512_v51  ;;  %v4988_v44 = vadd.f32 %v4777_v24, %v1850_v43  ;;  %vm1787_vm9 = vweird.f32 %v1657_v38  ;;  %2313 = vmatpush.bf16.msrb.mxu2 %v3790_v11  ;;  %v3777_v43 = vld [vmem:[#allocation8 + $0x8] sm:$0xff] }
 0x49e   :  { %v1576_v8 = vpop.xlane.xlu2 %1575  ;;  %v1776_v30 = vmul.f32 %v3931_v2, %v1775_v7  ;;  %v3788_v7 = vld [vmem:[#allocation8 + $0x60] sm:$0xff] }
 0x49f   :  { %v1610_v55 = vmul.f32 %v4961_v16, %v4961_v16  ;;  %v1594_v31 = vmul.f32 0.0078125, %v1576_v8  ;;  %v1642_v33 = vsub.f32 %v4646_v28, %v4961_v16 }
 0x4a0   :  { %v1780_v0 = vsel %vm1779_vm3, %v3931_v2, %v1776_v30 }
 0x4a1   :  { %v1626_v21 = vsub.f32 %v1594_v31, %v1610_v55  ;;  %v1832_v17 = vmul.f32 %v1780_v0, %v1640_v26  ;;  %2314 = vmatpush.bf16.msrb.mxu2 %v3789_v61  ;;  %v3787_v31 = vld [vmem:[#allocation8 + $0x58] sm:$0xff] }
 0x4a2   :  { %v3779_v26 = vld [vmem:[#allocation8 + $0x18] sm:$0xff] }
 0x4a3   :  { %v3933_v1 = vpop.eup %3932  ;;  %v1658_v57 = vadd.f32 1e-05, %v1626_v21  ;;  %2013 = vmatmul.bf16.gmra.mxu3 %v1879_v20  ;;  %2062 = vmatmul.bf16.gmra.mxu0 %v1879_v20  ;;  %v1851_v60 = vmul.f32 %v4762_v56, %v1832_v17 }
 0x4a4   :  { %v1782_v52 = vmul.f32 %v3933_v1, %v1657_v38  ;;  %vm1788_vm7 = vweird.f32 %v3933_v1  ;;  %v3782_v38 = vld [vmem:[#allocation8 + $0x30] sm:$0xff] }
 0x4a5   :  { %3934 = vrsqrt.f32 %v1658_v57  ;;  %v4985_v10 = vadd.f32 %v4777_v24, %v1851_v60  ;;  %vm1797_vm8 = vweird.f32 %v1658_v57  ;;  %vm1789_vm11 = vmor %vm1787_vm9, %vm1788_vm7  ;;  %2264 = vmatpush.bf16.msra.mxu1 %v3782_v38  ;;  %2315 = vmatpush.bf16.msrb.mxu2 %v3788_v7 }
 0x4a6   :  { %v1783_v13 = vmul.f32 %v3933_v1, %v1782_v52 }
 0x4a7   :  { %v1880_v4 = vpack.c.bf16 %v4985_v10, %v4988_v44 }
 0x4a8   :  { %v1784_v50 = vmul.f32 0.5, %v1783_v13 }
 0x4a9   :  { %2265 = vmatpush.bf16.msra.mxu1 %v3781_v63  ;;  %2316 = vmatpush.bf16.msrb.mxu2 %v3787_v31 }
 0x4aa   :  { %v1785_v32 = vsub.f32 1.5, %v1784_v50 }
 0x4ab   :  { %v3935_v19 = vpop.eup %3934 }
 0x4ac   :  { %v1792_v15 = vmul.f32 %v3935_v19, %v1658_v57  ;;  %vm1798_vm6 = vweird.f32 %v3935_v19  ;;  %v1786_v45 = vmul.f32 %v3933_v1, %v1785_v32 }
 0x4ad   :  { %vm1799_vm10 = vmor %vm1797_vm8, %vm1798_vm6  ;;  %2317 = vmatpush.bf16.msrb.mxu2 %v3786_v59 }
 0x4ae   :  { %v1793_v2 = vmul.f32 %v3935_v19, %v1792_v15  ;;  %v1790_v6 = vsel %vm1789_vm11, %v3933_v1, %v1786_v45  ;;  %v3780_v1 = vld [vmem:[#allocation8 + $0x20] sm:$0xff] }
 0x4af   :  { %v1833_v51 = vmul.f32 %v1790_v6, %v1641_v41  ;;  %2266 = vmatpush.bf16.msra.mxu1 %v3780_v1  ;;  %v3784_v15 = vld [vmem:[#allocation8 + $0x40] sm:$0xff] }
 0x4b0   :  { %v1794_v58 = vmul.f32 0.5, %v1793_v2 }
 0x4b1   :  { %v1852_v16 = vmul.f32 %v4762_v56, %v1833_v51  ;;  %2318 = vmatpush.bf16.msrb.mxu2 %v3785_v62  ;;  %v1899_v51 = vld [vmem:[%s5868_s8] sm:$0x3] }
 0x4b2   :  { %v1795_v23 = vsub.f32 1.5, %v1794_v58  ;;  %v5024_v31 = vperm.slane %v1899_v51, 0 }
 0x4b3   :  { %2018 = vmatmul.bf16.gmra.mxu3 %v1880_v4  ;;  %2067 = vmatmul.bf16.gmra.mxu0 %v1880_v4  ;;  %v5002_v30 = vadd.f32 %v4777_v24, %v1852_v16  ;;  %v5012_v16 = vperm.slane %v1899_v51, 1  ;;  %v2774_v51 = vld [vmem:[%s5862_s2 + $0x28] sm:$0xff] }
 0x4b4   :  { %v1796_v39 = vmul.f32 %v3935_v19, %v1795_v23  ;;  %2267 = vmatpush.bf16.msra.mxu1 %v3779_v26  ;;  %v4144_v26 = vmov 0  }
 0x4b5   :  { %2319 = vmatpush.bf16.msrb.mxu2 %v3784_v15  ;;  %3821 = vset.pattern.permute.xlu1 %v4144_v26 }
 0x4b6   :  { %v1800_v46 = vsel %vm1799_vm10, %v3935_v19, %v1796_v39  ;;  %3822 = vset.pattern.permute.xlu2 %v4144_v26  ;;  %3820 = vset.pattern.permute.xlu0 %v4144_v26 }
 0x4b7   :  { %v1834_v5 = vmul.f32 %v1800_v46, %v1642_v33 }
 0x4b8   :  { %2268 = vmatpush.bf16.msra.mxu1 %v3778_v18 }
 0x4b9   :  { %v1853_v14 = vmul.f32 %v4762_v56, %v1834_v5 }
 0x4bb   :  { %v4999_v55 = vadd.f32 %v4777_v24, %v1853_v14 }
 0x4bc   :  { %2269 = vmatpush.bf16.msra.mxu1 %v3777_v43  ;;  %v2772_v43 = vld [vmem:[%s5862_s2 + $0x18] sm:$0xff] }
 0x4bd   :  { %v1881_v57 = vpack.c.bf16 %v4999_v55, %v5002_v30 }
 0x4be   :  { %v1514_v28 = vpop.xlane.xlu0 %1513 }
 0x4bf   :  { %v1531_v8 = vmul.f32 0.0078125, %v1514_v28 }
 0x4c0   :  { %v1578_v37 = vpop.xlane.xlu2 %1577  ;;  %2270 = vmatpush.bf16.msra.mxu1 %v3776_v54 }
 0x4c1   :  { %v1611_v47 = vmul.f32 %v1531_v8, %v1531_v8  ;;  %v1595_v40 = vmul.f32 0.0078125, %v1578_v37  ;;  %v1643_v6 = vsub.f32 %v4736_v9, %v1531_v8 }
 0x4c3   :  { %v1627_v21 = vsub.f32 %v1595_v40, %v1611_v47  ;;  %2023 = vmatmul.bf16.gmra.mxu3 %v1881_v57  ;;  %2072 = vmatmul.bf16.gmra.mxu0 %v1881_v57 }
 0x4c5   :  { %v1659_v52 = vadd.f32 1e-05, %v1627_v21 }
 0x4c6   :  { %v1516_v20 = vpop.xlane.xlu1 %1515 }
 0x4c7   :  { %3936 = vrsqrt.f32 %v1659_v52  ;;  %v1532_v0 = vmul.f32 0.0078125, %v1516_v20  ;;  %vm1807_vm13 = vweird.f32 %v1659_v52 }
 0x4c8   :  { %v1580_v13 = vpop.xlane.xlu0 %1579 }
 0x4c9   :  { %v1612_v3 = vmul.f32 %v1532_v0, %v1532_v0  ;;  %v1596_v17 = vmul.f32 0.0078125, %v1580_v13  ;;  %v1644_v61 = vsub.f32 %v4746_v48, %v1532_v0 }
 0x4cb   :  { %v1628_v19 = vsub.f32 %v1596_v17, %v1612_v3  ;;  %v2770_v3 = vld [vmem:[%s5862_s2 + $0x8] sm:$0xff]  ;;  %v2771_v17 = vld [vmem:[%s5862_s2 + $0x10] sm:$0xff] }
 0x4cc   :  { %2792 = vperm.xlu1 %3821, %v2770_v3   ;;  %2797 = vperm.xlu2 %3822, %v2771_v17  }
 0x4cd   :  { %v3937_v50 = vpop.eup %3936  ;;  %v1660_v2 = vadd.f32 1e-05, %v1628_v19  ;;  %v2773_v19 = vld [vmem:[%s5862_s2 + $0x20] sm:$0xff] }
 0x4ce   :  { %v1802_v60 = vmul.f32 %v3937_v50, %v1659_v52  ;;  %vm1808_vm12 = vweird.f32 %v3937_v50 }
 0x4cf   :  { %3938 = vrsqrt.f32 %v1660_v2  ;;  %vm1809_vm14 = vmor %vm1807_vm13, %vm1808_vm12  ;;  %vm1817_vm0 = vweird.f32 %v1660_v2 }
 0x4d0   :  { %v1803_v32 = vmul.f32 %v3937_v50, %v1802_v60 }
 0x4d2   :  { %v1804_v58 = vmul.f32 0.5, %v1803_v32 }
 0x4d4   :  { %v1805_v23 = vsub.f32 1.5, %v1804_v58  ;;  %2807 = vperm.xlu1 %3821, %v2773_v19   ;;  %2802 = vperm.xlu2 %3822, %v2772_v43  }
 0x4d5   :  { %v3939_v45 = vpop.eup %3938 }
 0x4d6   :  { %v1806_v39 = vmul.f32 %v3937_v50, %v1805_v23  ;;  %v1812_v4 = vmul.f32 %v3939_v45, %v1660_v2  ;;  %vm1818_vm15 = vweird.f32 %v3939_v45  ;;  %v2985_v2 = vsel %vm2977_vm2, %v2770_v3, 0.0 }
 0x4d7   :  { %vm1819_vm1 = vmor %vm1817_vm0, %vm1818_vm15  ;;  %v2986_v54 = vrot.slane %v2985_v2, 4  ;;  %v3006_v3 = vsel %vm2977_vm2, %v2773_v19, 0.0 }
 0x4d8   :  { %v1813_v11 = vmul.f32 %v3939_v45, %v1812_v4  ;;  %v1810_v33 = vsel %vm1809_vm14, %v3937_v50, %v1806_v39  ;;  %v2992_v39 = vsel %vm2977_vm2, %v2771_v17, 0.0 }
 0x4d9   :  { %v1835_v41 = vmul.f32 %v1810_v33, %v1643_v6  ;;  %v2987_v6 = vadd.f32 %v2986_v54, %v2985_v2 }
 0x4da   :  { %v1814_v46 = vmul.f32 0.5, %v1813_v11  ;;  %v2775_v11 = vld [vmem:[%s5862_s2 + $0x30] sm:$0xff] }
 0x4db   :  { %v1854_v28 = vmul.f32 %v4762_v56, %v1835_v41  ;;  %v2769_v41 = vld [vmem:[%s5862_s2] sm:$0xff] }
 0x4dc   :  { %v1815_v34 = vsub.f32 1.5, %v1814_v46  ;;  %2817 = vperm.xlu1 %3821, %v2775_v11   ;;  %2787 = vperm.xlu0 %3820, %v2769_v41  }
 0x4dd   :  { %v5016_v63 = vadd.f32 %v4777_v24, %v1854_v28  ;;  %2812 = vperm.xlu2 %3822, %v2774_v51  }
 0x4de   :  { %v1816_v5 = vmul.f32 %v3939_v45, %v1815_v34  ;;  %v2993_v34 = vrot.slane %v2992_v39, 4 }
 0x4e0   :  { %v2043_v38 = vpop.f32.mrf.mxu0  ;;  %v1820_v14 = vsel %vm1819_vm1, %v3939_v45, %v1816_v5  ;;  %v2994_v28 = vadd.f32 %v2993_v34, %v2992_v39  ;;  %v3007_v39 = vrot.slane %v3006_v3, 4 }
 0x4e1   :  { %v1836_v7 = vmul.f32 %v1820_v14, %v1644_v61  ;;  %v2044_v37 = vadd.f32 %v2043_v38, %v5012_v16  ;;  %v5057_v14 = vsel %vm2977_vm2, %v2775_v11, 0.0  ;;  %v2781_v11 = vld [vmem:[%s5862_s2 + $0x60] sm:$0xff] }
 0x4e3   :  { %v1855_v9 = vmul.f32 %v4762_v56, %v1836_v7  ;;  %v2084_v56 = vmax.f32 %v2044_v37, 0.0  ;;  %v2988_v7 = vrot.slane %v2987_v6, 2 }
 0x4e5   :  { %v5019_v48 = vadd.f32 %v4777_v24, %v1855_v9  ;;  %v2978_v9 = vsel %vm2977_vm2, %v2769_v41, 0.0 }
 0x4e6   :  { %v1994_v8 = vpop.f32.mrf.mxu3 }
 0x4e7   :  { %v1882_v40 = vpack.c.bf16 %v5019_v48, %v5016_v63  ;;  %v1995_v59 = vadd.f32 %v1994_v8, %v5024_v31  ;;  %v5061_v8 = vsel %vm2977_vm2, %v2774_v51, 0.0  ;;  %v2779_v51 = vld [vmem:[%s5862_s2 + $0x50] sm:$0xff] }
 0x4e8   :  { %v2045_v47 = vpop.f32.mrf.mxu0 }
 0x4e9   :  { %v2046_v21 = vadd.f32 %v2045_v47, %v5012_v16  ;;  %2028 = vmatmul.bf16.gmra.mxu3 %v1882_v40  ;;  %2077 = vmatmul.bf16.gmra.mxu0 %v1882_v40  ;;  %v2083_v20 = vmax.f32 %v1995_v59, 0.0  ;;  %v2979_v47 = vrot.slane %v2978_v9, 4  ;;  %v2778_v40 = vld [vmem:[%s5862_s2 + $0x48] sm:$0xff]  ;;  %v2989_v59 = vadd.f32 %v2988_v7, %v2987_v6 }
 0x4ea   :  { %2832 = vperm.xlu1 %3821, %v2778_v40   ;;  %v3041_v26 = vsel %vm2977_vm2, %v2778_v40, 0.0 }
 0x4eb   :  { %v2086_v1 = vmax.f32 %v2046_v21, 0.0 }
 0x4ed   :  { %v2116_v57 = vpack.c.bf16 %v2086_v1, %v2084_v56  ;;  %v2999_v56 = vsel %vm2977_vm2, %v2772_v43, 0.0 }
 0x4ee   :  { %v1996_v52 = vpop.f32.mrf.mxu3 }
 0x4ef   :  { %v1997_v24 = vadd.f32 %v1996_v52, %v5024_v31  ;;  %2320 = vmatmul.bf16.vlgmr.msrb.gmra.mxu2 %v2116_v57  ;;  %v2995_v57 = vrot.slane %v2994_v28, 2  ;;  %v2980_v52 = vadd.f32 %v2979_v47, %v2978_v9  ;;  %v3008_v47 = vadd.f32 %v3007_v39, %v3006_v3 }
 0x4f0   :  { %v2048_v62 = vpop.f32.mrf.mxu0 }
 0x4f1   :  { %v2085_v0 = vmax.f32 %v1997_v24, 0.0  ;;  %v2049_v50 = vadd.f32 %v2048_v62, %v5012_v16  ;;  %v2776_v24 = vld [vmem:[%s5862_s2 + $0x38] sm:$0xff]  ;;  %v2981_v62 = vrot.slane %v2980_v52, 2  ;;  %v2996_v2 = vadd.f32 %v2995_v57, %v2994_v28 }
 0x4f2   :  { %2822 = vperm.xlu0 %3820, %v2776_v24   ;;  %2847 = vperm.xlu1 %3821, %v2781_v11  }
 0x4f3   :  { %v2115_v13 = vpack.c.bf16 %v2085_v0, %v2083_v20  ;;  %v2088_v32 = vmax.f32 %v2049_v50, 0.0  ;;  %v2777_v20 = vld [vmem:[%s5862_s2 + $0x40] sm:$0xff]  ;;  %v3042_v50 = vrot.slane %v3041_v26, 4  ;;  %v2982_v43 = vadd.f32 %v2981_v62, %v2980_v52 }
 0x4f4   :  { %2827 = vperm.xlu2 %3822, %v2777_v20   ;;  %v3009_v62 = vrot.slane %v3008_v47, 2 }
 0x4f5   :  { %2271 = vmatmul.bf16.vlgmr.msra.gmra.mxu1 %v2115_v13  ;;  %v3000_v13 = vrot.slane %v2999_v56, 4 }
 0x4f6   :  { %v1999_v18 = vpop.f32.mrf.mxu3 }
 0x4f7   :  { %v2000_v23 = vadd.f32 %v1999_v18, %v5024_v31 }
 0x4f8   :  { %v2050_v15 = vpop.f32.mrf.mxu0 }
 0x4f9   :  { %v2051_v60 = vadd.f32 %v2050_v15, %v5012_v16  ;;  %v2087_v5 = vmax.f32 %v2000_v23, 0.0  ;;  %v3034_v15 = vsel %vm2977_vm2, %v2777_v20, 0.0  ;;  %v3043_v23 = vadd.f32 %v3042_v50, %v3041_v26  ;;  %v2784_v50 = vld [vmem:[%s5862_s2 + $0x78] sm:$0xff] }
 0x4fa   :  { %2837 = vperm.xlu0 %3820, %v2779_v51   ;;  %v3048_v26 = vsel %vm2977_vm2, %v2779_v51, 0.0  ;;  %2862 = vperm.xlu1 %3821, %v2784_v50   ;;  %v5107_v51 = vsel %vm2977_vm2, %v2784_v50, 0.0 }
 0x4fb   :  { %v2090_v58 = vmax.f32 %v2051_v60, 0.0  ;;  %v2990_v60 = vrot.slane %v2989_v59, 1  ;;  %v3044_v6 = vrot.slane %v3043_v23, 2 }
 0x4fd   :  { %v2118_v45 = vpack.c.bf16 %v2090_v58, %v2088_v32  ;;  %v3035_v32 = vrot.slane %v3034_v15, 4  ;;  %v2991_v28 = vadd.f32 %v2990_v60, %v2989_v59  ;;  %v3045_v9 = vadd.f32 %v3044_v6, %v3043_v23 }
 0x4fe   :  { %v2001_v4 = vpop.f32.mrf.mxu3 }
 0x4ff   :  { %v2002_v33 = vadd.f32 %v2001_v4, %v5024_v31  ;;  %2325 = vmatmul.bf16.gmra.mxu2 %v2118_v45  ;;  %v5080_v45 = vsel %vm2977_vm2, %v2776_v24, 0.0  ;;  %v2983_v4 = vrot.slane %v2982_v43, 1  ;;  %v3036_v34 = vadd.f32 %v3035_v32, %v3034_v15 }
 0x500   :  { %v2053_v46 = vpop.f32.mrf.mxu0  ;;  %v3046_v57 = vrot.slane %v3045_v9, 1  ;;  %v3062_v24 = vsel %vm2977_vm2, %v2781_v11, 0.0  ;;  %v3091_v20 = vadd.f32 1e-09, %v2991_v28  ;;  %v2783_v11 = vld [vmem:[%s5862_s2 + $0x70] sm:$0xff] }
 0x501   :  { %v2089_v61 = vmax.f32 %v2002_v33, 0.0  ;;  %v2054_v21 = vadd.f32 %v2053_v46, %v5012_v16  ;;  %v3001_v46 = vadd.f32 %v3000_v13, %v2999_v56  ;;  %v3037_v40 = vrot.slane %v3036_v34, 2 }
 0x502   :  { %v3063_v59 = vrot.slane %v3062_v24, 4  ;;  %v3047_v32 = vadd.f32 %v3046_v57, %v3045_v9 }
 0x503   :  { %v2117_v38 = vpack.c.bf16 %v2089_v61, %v2087_v5  ;;  %v2092_v17 = vmax.f32 %v2054_v21, 0.0  ;;  %v2997_v5 = vrot.slane %v2996_v2, 1  ;;  %v2984_v61 = vadd.f32 %v2983_v4, %v2982_v43 }
 0x504   :  { %v3002_v56 = vrot.slane %v3001_v46, 2  ;;  %v3038_v52 = vadd.f32 %v3037_v40, %v3036_v34 }
 0x505   :  { %2276 = vmatmul.bf16.gmra.mxu1 %v2117_v38 }
 0x506   :  { %v2004_v37 = vpop.f32.mrf.mxu3  ;;  %v3003_v60 = vadd.f32 %v3002_v56, %v3001_v46 }
 0x507   :  { %v2005_v58 = vadd.f32 %v2004_v37, %v5024_v31  ;;  %v2780_v37 = vld [vmem:[%s5862_s2 + $0x58] sm:$0xff] }
 0x508   :  { %v2055_v1 = vpop.f32.mrf.mxu0  ;;  %2842 = vperm.xlu2 %3822, %v2780_v37   ;;  %v3055_v3 = vsel %vm2977_vm2, %v2780_v37, 0.0 }
 0x509   :  { %v2056_v0 = vadd.f32 %v2055_v1, %v5012_v16  ;;  %v2091_v38 = vmax.f32 %v2005_v58, 0.0  ;;  %v3090_v1 = vadd.f32 1e-09, %v2984_v61  ;;  %v3056_v43 = vrot.slane %v3055_v3, 4 }
 0x50a   :  { %v3004_v61 = vrot.slane %v3003_v60, 1 }
 0x50b   :  { %v2094_v18 = vmax.f32 %v2056_v0, 0.0  ;;  %v2998_v0 = vadd.f32 %v2997_v5, %v2996_v2  ;;  %3940 = vrcp.f32 %v3090_v1  ;;  %v3057_v34 = vadd.f32 %v3056_v43, %v3055_v3 }
 0x50c   :  { %3942 = vrcp.f32 %v3091_v20  ;;  %v3005_v20 = vadd.f32 %v3004_v61, %v3003_v60 }
 0x50d   :  { %v2120_v54 = vpack.c.bf16 %v2094_v18, %v2092_v17  ;;  %v3039_v17 = vrot.slane %v3038_v52, 1  ;;  %v3049_v18 = vrot.slane %v3048_v26, 4  ;;  %v3092_v39 = vadd.f32 1e-09, %v2998_v0 }
 0x50e   :  { %v2006_v19 = vpop.f32.mrf.mxu3  ;;  %v3058_v9 = vrot.slane %v3057_v34, 2 }
 0x50f   :  { %v2007_v33 = vadd.f32 %v2006_v19, %v5024_v31  ;;  %2330 = vmatmul.bf16.gmra.mxu2 %v2120_v54  ;;  %v3040_v58 = vadd.f32 %v3039_v17, %v3038_v52  ;;  %v3064_v54 = vadd.f32 %v3063_v59, %v3062_v24  ;;  %v3050_v23 = vadd.f32 %v3049_v18, %v3048_v26  ;;  %v2782_v19 = vld [vmem:[%s5862_s2 + $0x68] sm:$0xff] }
 0x510   :  { %v2058_v41 = vpop.f32.mrf.mxu0  ;;  %2852 = vperm.xlu0 %3820, %v2782_v19   ;;  %2857 = vperm.xlu2 %3822, %v2783_v11   ;;  %v3059_v57 = vadd.f32 %v3058_v9, %v3057_v34  ;;  %v5115_v59 = vsel %vm2977_vm2, %v2783_v11, 0.0 }
 0x511   :  { %v2093_v7 = vmax.f32 %v2007_v33, 0.0  ;;  %v2059_v15 = vadd.f32 %v2058_v41, %v5012_v16  ;;  %v3010_v33 = vadd.f32 %v3009_v62, %v3008_v47  ;;  %v3098_v46 = vadd.f32 1e-09, %v3040_v58  ;;  %v3941_v37 = vpop.eup %3940 }
 0x512   :  { %v3051_v6 = vrot.slane %v3050_v23, 2  ;;  %v5111_v47 = vsel %vm2977_vm2, %v2782_v19, 0.0  ;;  %v3943_v52 = vpop.eup %3942  ;;  %v3060_v17 = vrot.slane %v3059_v57, 1 }
 0x513   :  { %v2119_v21 = vpack.c.bf16 %v2093_v7, %v2091_v38  ;;  %v2096_v41 = vmax.f32 %v2059_v15, 0.0  ;;  %v3099_v38 = vadd.f32 1e-09, %v3047_v32  ;;  %v3065_v7 = vrot.slane %v3064_v54, 2 }
 0x514   :  { %v3052_v28 = vadd.f32 %v3051_v6, %v3050_v23  ;;  %3944 = vrcp.f32 %v3098_v46  ;;  %v3011_v24 = vrot.slane %v3010_v33, 1  ;;  %v3061_v15 = vadd.f32 %v3060_v17, %v3059_v57 }
 0x515   :  { %2281 = vmatmul.bf16.gmra.mxu1 %v2119_v21  ;;  %3946 = vrcp.f32 %v3099_v38  ;;  %v3093_v32 = vadd.f32 1e-09, %v3005_v20 }
 0x516   :  { %v2009_v13 = vpop.f32.mrf.mxu3  ;;  %v3053_v1 = vrot.slane %v3052_v28, 1  ;;  %3948 = vrcp.f32 %v3092_v39  ;;  %v3012_v60 = vadd.f32 %v3011_v24, %v3010_v33  ;;  %v3101_v23 = vadd.f32 1e-09, %v3061_v15 }
 0x517   :  { %v2010_v40 = vadd.f32 %v2009_v13, %v5024_v31  ;;  %v3066_v13 = vadd.f32 %v3065_v7, %v3064_v54 }
 0x518   :  { %v2060_v2 = vpop.f32.mrf.mxu0  ;;  %v3054_v62 = vadd.f32 %v3053_v1, %v3052_v28  ;;  %3124 = vperm.xlu0 %3820, %v3941_v37   ;;  %3129 = vperm.xlu2 %3822, %v3943_v52   ;;  %v3094_v11 = vadd.f32 1e-09, %v3012_v60 }
 0x519   :  { %v2061_v4 = vadd.f32 %v2060_v2, %v5012_v16  ;;  %v2095_v18 = vmax.f32 %v2010_v40, 0.0  ;;  %v3067_v58 = vrot.slane %v3066_v13, 1 }
 0x51a   :  { %v3100_v50 = vadd.f32 1e-09, %v3054_v62  ;;  %v3945_v43 = vpop.eup %3944 }
 0x51b   :  { %v2098_v5 = vmax.f32 %v2061_v4, 0.0  ;;  %3164 = vperm.xlu1 %3821, %v3945_v43   ;;  %v3947_v19 = vpop.eup %3946  ;;  %v3068_v6 = vadd.f32 %v3067_v58, %v3066_v13 }
 0x51c   :  { %3950 = vrcp.f32 %v3100_v50  ;;  %v3949_v4 = vpop.eup %3948 }
 0x51d   :  { %v2122_v21 = vpack.c.bf16 %v2098_v5, %v2096_v41  ;;  %3952 = vrcp.f32 %v3093_v32  ;;  %v3102_v61 = vadd.f32 1e-09, %v3068_v6 }
 0x51e   :  { %v2011_v56 = vpop.f32.mrf.mxu3  ;;  %3954 = vrcp.f32 %v3101_v23 }
 0x51f   :  { %v2012_v0 = vadd.f32 %v2011_v56, %v5024_v31  ;;  %2335 = vmatmul.bf16.gmra.mxu2 %v2122_v21  ;;  %3956 = vrcp.f32 %v3094_v11 }
 0x520   :  { %v2063_v26 = vpop.f32.mrf.mxu0  ;;  %3169 = vperm.xlu0 %3820, %v3947_v19   ;;  %3134 = vperm.xlu2 %3822, %v3949_v4   ;;  %3958 = vrcp.f32 %v3102_v61 }
 0x521   :  { %v2097_v3 = vmax.f32 %v2012_v0, 0.0  ;;  %v2064_v39 = vadd.f32 %v2063_v26, %v5012_v16 }
 0x522   :  { %v3951_v33 = vpop.eup %3950 }
 0x523   :  { %v2121_v2 = vpack.c.bf16 %v2097_v3, %v2095_v18  ;;  %v2100_v41 = vmax.f32 %v2064_v39, 0.0  ;;  %3174 = vperm.xlu1 %3821, %v3951_v33   ;;  %v3953_v28 = vpop.eup %3952 }
 0x524   :  { %v3955_v37 = vpop.eup %3954 }
 0x525   :  { %2286 = vmatmul.bf16.gmra.mxu1 %v2121_v2  ;;  %v3957_v56 = vpop.eup %3956 }
 0x526   :  { %v2014_v54 = vpop.f32.mrf.mxu3  ;;  %v3959_v24 = vpop.eup %3958 }
 0x527   :  { %v2015_v38 = vadd.f32 %v2014_v54, %v5024_v31 }
 0x528   :  { %v2065_v46 = vpop.f32.mrf.mxu0  ;;  %3139 = vperm.xlu0 %3820, %v3953_v28   ;;  %3179 = vperm.xlu2 %3822, %v3955_v37  }
 0x529   :  { %v2066_v34 = vadd.f32 %v2065_v46, %v5012_v16  ;;  %v2099_v1 = vmax.f32 %v2015_v38, 0.0 }
 0x52b   :  { %v2102_v5 = vmax.f32 %v2066_v34, 0.0  ;;  %3144 = vperm.xlu1 %3821, %v3957_v56  }
 0x52d   :  { %v2124_v7 = vpack.c.bf16 %v2102_v5, %v2100_v41 }
 0x52e   :  { %v2016_v9 = vpop.f32.mrf.mxu3 }
 0x52f   :  { %v2017_v40 = vadd.f32 %v2016_v9, %v5024_v31  ;;  %2340 = vmatmul.bf16.gmra.mxu2 %v2124_v7  ;;  %v5133_v9 = vld [vmem:[%s5870_s10] ss:$0 sm:$0xff] }
 0x530   :  { %v2068_v21 = vpop.f32.mrf.mxu0  ;;  %3184 = vperm.xlu0 %3820, %v3959_v24  }
 0x531   :  { %v2101_v57 = vmax.f32 %v2017_v40, 0.0  ;;  %v2069_v0 = vadd.f32 %v2068_v21, %v5012_v16 }
 0x533   :  { %v2123_v52 = vpack.c.bf16 %v2101_v57, %v2099_v1  ;;  %v2104_v62 = vmax.f32 %v2069_v0, 0.0 }
 0x535   :  { %2291 = vmatmul.bf16.gmra.mxu1 %v2123_v52 }
 0x536   :  { %v2019_v20 = vpop.f32.mrf.mxu3 }
 0x537   :  { %v2020_v18 = vadd.f32 %v2019_v20, %v5024_v31 }
 0x538   :  { %v2070_v26 = vpop.f32.mrf.mxu0 }
 0x539   :  { %v2071_v13 = vadd.f32 %v2070_v26, %v5012_v16  ;;  %v2103_v60 = vmax.f32 %v2020_v18, 0.0 }
 0x53b   :  { %v2106_v17 = vmax.f32 %v2071_v13, 0.0 }
 0x53d   :  { %v2126_v3 = vpack.c.bf16 %v2106_v17, %v2104_v62 }
 0x53e   :  { %v2021_v50 = vpop.f32.mrf.mxu3 }
 0x53f   :  { %v2022_v15 = vadd.f32 %v2021_v50, %v5024_v31  ;;  %2345 = vmatmul.bf16.gmra.mxu2 %v2126_v3 }
 0x540   :  { %v2073_v43 = vpop.f32.mrf.mxu0 }
 0x541   :  { %v2105_v2 = vmax.f32 %v2022_v15, 0.0  ;;  %v2074_v23 = vadd.f32 %v2073_v43, %v5012_v16 }
 0x543   :  { %v2125_v32 = vpack.c.bf16 %v2105_v2, %v2103_v60  ;;  %v2108_v4 = vmax.f32 %v2074_v23, 0.0 }
 0x545   :  { %2296 = vmatmul.bf16.gmra.mxu1 %v2125_v32 }
 0x546   :  { %v2024_v58 = vpop.f32.mrf.mxu3 }
 0x547   :  { %v2025_v39 = vadd.f32 %v2024_v58, %v5024_v31 }
 0x548   :  { %v2075_v19 = vpop.f32.mrf.mxu0 }
 0x549   :  { %v2076_v54 = vadd.f32 %v2075_v19, %v5012_v16  ;;  %v2107_v33 = vmax.f32 %v2025_v39, 0.0 }
 0x54b   :  { %v2110_v11 = vmax.f32 %v2076_v54, 0.0 }
 0x54d   :  { %v2128_v46 = vpack.c.bf16 %v2110_v11, %v2108_v4 }
 0x54e   :  { %v2026_v6 = vpop.f32.mrf.mxu3 }
 0x54f   :  { %v2027_v34 = vadd.f32 %v2026_v6, %v5024_v31  ;;  %2350 = vmatmul.bf16.gmra.mxu2 %v2128_v46 }
 0x551   :  { %v2109_v41 = vmax.f32 %v2027_v34, 0.0 }
 0x553   :  { %v2127_v5 = vpack.c.bf16 %v2109_v41, %v2107_v33 }
 0x555   :  { %2301 = vmatmul.bf16.gmra.mxu1 %v2127_v5 }
 0x566   :  { %v2078_v61 = vpop.f32.mrf.mxu0 }
 0x567   :  { %v2079_v7 = vadd.f32 %v2078_v61, %v5012_v16 }
 0x569   :  { %v2112_v40 = vmax.f32 %v2079_v7, 0.0 }
 0x56c   :  { %v2029_v38 = vpop.f32.mrf.mxu3 }
 0x56d   :  { %v2030_v52 = vadd.f32 %v2029_v38, %v5024_v31 }
 0x56e   :  { %v2080_v28 = vpop.f32.mrf.mxu0 }
 0x56f   :  { %v2081_v37 = vadd.f32 %v2080_v28, %v5012_v16  ;;  %v2111_v62 = vmax.f32 %v2030_v52, 0.0 }
 0x571   :  { %v2114_v21 = vmax.f32 %v2081_v37, 0.0 }
 0x572   :  { %v2272_v56 = vpop.f32.mrf.mxu1  ;;  %v2321_v1 = vpop.f32.mrf.mxu2 }
 0x573   :  { %v2273_v57 = vadd.f32 %v5133_v9, %v2272_v56  ;;  %v2130_v24 = vpack.c.bf16 %v2114_v21, %v2112_v40 }
 0x574   :  { %v2031_v0 = vpop.f32.mrf.mxu3 }
 0x575   :  { %v2322_v20 = vadd.f32 %v2321_v1, %v2273_v57  ;;  %v2032_v26 = vadd.f32 %v2031_v0, %v5024_v31  ;;  %2355 = vmatmul.bf16.gmra.mxu2 %v2130_v24  ;;  %v5190_v0 = vpop.permute.xlu1 %2792 }
 0x577   :  { %v5140_v13 = vadd.f32 %v2322_v20, %v4785_v27  ;;  %v2113_v17 = vmax.f32 %v2032_v26, 0.0  ;;  %v5188_v20 = vpop.permute.xlu2 %2797 }
 0x579   :  { %2379 = vadd.xlane.f32.xlu1 %v5140_v13  ;;  %v2427_v16 = vmul.f32 %v5140_v13, %v5140_v13  ;;  %v2129_v18 = vpack.c.bf16 %v2113_v17, %v2111_v62 }
 0x57a   :  { %v2274_v3 = vpop.f32.mrf.mxu1  ;;  %v2323_v15 = vpop.f32.mrf.mxu2 }
 0x57b   :  { %v2275_v50 = vadd.f32 %v5133_v9, %v2274_v3  ;;  %2443 = vadd.xlane.f32.xlu2 %v2427_v16  ;;  %2306 = vmatmul.bf16.gmra.mxu1 %v2129_v18 }
 0x57d   :  { %v2324_v43 = vadd.f32 %v2323_v15, %v2275_v50  ;;  %v5201_v15 = vpop.permute.xlu1 %2807 }
 0x57f   :  { %v5147_v31 = vadd.f32 %v2324_v43, %v4788_v29  ;;  %v5199_v50 = vpop.permute.xlu2 %2802 }
 0x581   :  { %v2428_v27 = vmul.f32 %v5147_v31, %v5147_v31 }
 0x582   :  { %v2277_v60 = vpop.f32.mrf.mxu1  ;;  %v2326_v2 = vpop.f32.mrf.mxu2 }
 0x583   :  { %2445 = vadd.xlane.f32.xlu0 %v2428_v27  ;;  %2381 = vadd.xlane.f32.xlu2 %v5147_v31  ;;  %v2278_v32 = vadd.f32 %v5133_v9, %v2277_v60 }
 0x585   :  { %v2327_v58 = vadd.f32 %v2326_v2, %v2278_v32 }
 0x587   :  { %v5154_v23 = vadd.f32 %v2327_v58, %v4846_v42 }
 0x589   :  { %v2429_v29 = vmul.f32 %v5154_v23, %v5154_v23 }
 0x58a   :  { %v2279_v19 = vpop.f32.mrf.mxu1  ;;  %v2328_v54 = vpop.f32.mrf.mxu2 }
 0x58b   :  { %2383 = vadd.xlane.f32.xlu0 %v5154_v23  ;;  %v2280_v4 = vadd.f32 %v5133_v9, %v2279_v19  ;;  %2447 = vadd.xlane.f32.xlu1 %v2429_v29  ;;  %v5215_v19 = vpop.permute.xlu2 %2812 }
 0x58d   :  { %v2329_v11 = vadd.f32 %v2328_v54, %v2280_v4 }
 0x58f   :  { %v5161_v39 = vadd.f32 %v2329_v11, %v4839_v12 }
 0x591   :  { %v2430_v46 = vmul.f32 %v5161_v39, %v5161_v39 }
 0x592   :  { %v2282_v6 = vpop.f32.mrf.mxu1  ;;  %v2331_v42 = vpop.f32.mrf.mxu2 }
 0x593   :  { %v2283_v34 = vadd.f32 %v5133_v9, %v2282_v6  ;;  %2449 = vadd.xlane.f32.xlu2 %v2430_v46  ;;  %2385 = vadd.xlane.f32.xlu1 %v5161_v39 }
 0x595   :  { %v2332_v33 = vadd.f32 %v2331_v42, %v2283_v34 }
 0x597   :  { %v5168_v41 = vadd.f32 %v2332_v33, %v4894_v35 }
 0x599   :  { %v2431_v5 = vmul.f32 %v5168_v41, %v5168_v41 }
 0x59a   :  { %v2284_v61 = vpop.f32.mrf.mxu1  ;;  %v2333_v12 = vpop.f32.mrf.mxu2 }
 0x59b   :  { %v2285_v38 = vadd.f32 %v5133_v9, %v2284_v61  ;;  %2387 = vadd.xlane.f32.xlu2 %v5168_v41  ;;  %2451 = vadd.xlane.f32.xlu0 %v2431_v5  ;;  %v5230_v61 = vpop.permute.xlu2 %2827 }
 0x59c   :  { %5886 = vst [vmem:[#allocation17_spill] sm:$0xff] %v5230_v61 }
 0x59d   :  { %v2334_v7 = vadd.f32 %v2333_v12, %v2285_v38 }
 0x59f   :  { %v5175_v28 = vadd.f32 %v2334_v7, %v4884_v53 }
 0x5a1   :  { %v2432_v37 = vmul.f32 %v5175_v28, %v5175_v28 }
 0x5a2   :  { %v2287_v40 = vpop.f32.mrf.mxu1  ;;  %v2336_v35 = vpop.f32.mrf.mxu2 }
 0x5a3   :  { %v2288_v21 = vadd.f32 %v5133_v9, %v2287_v40  ;;  %2453 = vadd.xlane.f32.xlu1 %v2432_v37  ;;  %2389 = vadd.xlane.f32.xlu0 %v5175_v28 }
 0x5a5   :  { %v2337_v56 = vadd.f32 %v2336_v35, %v2288_v21 }
 0x5a7   :  { %v5182_v1 = vadd.f32 %v2337_v56, %v4928_v49 }
 0x5a9   :  { %v2433_v57 = vmul.f32 %v5182_v1, %v5182_v1 }
 0x5aa   :  { %v2289_v52 = vpop.f32.mrf.mxu1  ;;  %v2338_v53 = vpop.f32.mrf.mxu2 }
 0x5ab   :  { %v2290_v24 = vadd.f32 %v5133_v9, %v2289_v52  ;;  %2391 = vadd.xlane.f32.xlu1 %v5182_v1  ;;  %2455 = vadd.xlane.f32.xlu2 %v2433_v57  ;;  %v5245_v57 = vpop.permute.xlu2 %2842 }
 0x5ac   :  { %5889 = vst [vmem:[#allocation20_spill] sm:$0xff] %v5245_v57 }
 0x5ad   :  { %v2339_v26 = vadd.f32 %v2338_v53, %v2290_v24 }
 0x5af   :  { %v5193_v62 = vadd.f32 %v2339_v26, %v4933_v36  ;;  %v5206_v36 = vpop.permute.xlu0 %2787 }
 0x5b1   :  { %v2434_v49 = vmul.f32 %v5193_v62, %v5193_v62 }
 0x5b2   :  { %v2292_v17 = vpop.f32.mrf.mxu1  ;;  %v2341_v16 = vpop.f32.mrf.mxu2 }
 0x5b3   :  { %v2293_v18 = vadd.f32 %v5133_v9, %v2292_v17  ;;  %2457 = vadd.xlane.f32.xlu0 %v2434_v49  ;;  %2393 = vadd.xlane.f32.xlu2 %v5193_v62 }
 0x5b5   :  { %v2342_v3 = vadd.f32 %v2341_v16, %v2293_v18 }
 0x5b7   :  { %v5204_v43 = vadd.f32 %v2342_v3, %v4970_v22  ;;  %v5217_v22 = vpop.permute.xlu1 %2817  ;;  %v5223_v6 = vpop.permute.xlu0 %2822 }
 0x5b8   :  { %5884 = vst [vmem:[#allocation15_spill] sm:$0xff] %v5217_v22  ;;  %v5258_v3 = vpop.permute.xlu2 %2857 }
 0x5b9   :  { %v2435_v27 = vmul.f32 %v5204_v43, %v5204_v43  ;;  %5885 = vst [vmem:[#allocation16_spill] sm:$0xff] %v5223_v6 }
 0x5ba   :  { %v2294_v60 = vpop.f32.mrf.mxu1  ;;  %v2343_v2 = vpop.f32.mrf.mxu2  ;;  %5892 = vst [vmem:[#allocation23_spill] sm:$0xff] %v5258_v3 }
 0x5bb   :  { %v2295_v32 = vadd.f32 %v5133_v9, %v2294_v60  ;;  %2395 = vadd.xlane.f32.xlu0 %v5204_v43  ;;  %2459 = vadd.xlane.f32.xlu1 %v2435_v27 }
 0x5bd   :  { %v2344_v58 = vadd.f32 %v2343_v2, %v2295_v32 }
 0x5bf   :  { %v5213_v29 = vadd.f32 %v2344_v58, %v4967_v25  ;;  %v5234_v38 = vpop.permute.xlu1 %2832  ;;  %v5236_v37 = vpop.permute.xlu0 %2837 }
 0x5c0   :  { %5887 = vst [vmem:[#allocation18_spill] sm:$0xff] %v5234_v38  ;;  %v5270_v32 = vpop.permute.xlu2 %3129 }
 0x5c1   :  { %v2436_v54 = vmul.f32 %v5213_v29, %v5213_v29  ;;  %5888 = vst [vmem:[#allocation19_spill] sm:$0xff] %v5236_v37 }
 0x5c2   :  { %v2297_v4 = vpop.f32.mrf.mxu1  ;;  %v2346_v11 = vpop.f32.mrf.mxu2 }
 0x5c3   :  { %v2298_v46 = vadd.f32 %v5133_v9, %v2297_v4  ;;  %2461 = vadd.xlane.f32.xlu2 %v2436_v54  ;;  %2397 = vadd.xlane.f32.xlu1 %v5213_v29  ;;  %v3021_v54 = vrot.slane %v5057_v14, 4 }
 0x5c5   :  { %v2347_v42 = vadd.f32 %v2346_v11, %v2298_v46 }
 0x5c7   :  { %v5226_v25 = vadd.f32 %v2347_v42, %v4988_v44  ;;  %v5247_v53 = vpop.permute.xlu1 %2847  ;;  %v3084_v42 = vrot.slane %v5107_v51, 4 }
 0x5c8   :  { %5890 = vst [vmem:[#allocation21_spill] sm:$0xff] %v5247_v53  ;;  %v5278_v11 = vpop.permute.xlu2 %3134 }
 0x5c9   :  { %v2437_v34 = vmul.f32 %v5226_v25, %v5226_v25  ;;  %5896 = vst [vmem:[#allocation27_spill] sm:$0xff] %v5278_v11 }
 0x5ca   :  { %v2299_v33 = vpop.f32.mrf.mxu1  ;;  %v2348_v5 = vpop.f32.mrf.mxu2 }
 0x5cb   :  { %v2300_v12 = vadd.f32 %v5133_v9, %v2299_v33  ;;  %2399 = vadd.xlane.f32.xlu2 %v5226_v25  ;;  %2463 = vadd.xlane.f32.xlu0 %v2437_v34 }
 0x5cd   :  { %v2349_v7 = vadd.f32 %v2348_v5, %v2300_v12 }
 0x5cf   :  { %v5239_v44 = vadd.f32 %v2349_v7, %v4985_v10  ;;  %v5252_v10 = vpop.permute.xlu0 %2852 }
 0x5d0   :  { %5891 = vst [vmem:[#allocation22_spill] sm:$0xff] %v5252_v10 }
 0x5d1   :  { %v2438_v40 = vmul.f32 %v5239_v44, %v5239_v44 }
 0x5d2   :  { %v2302_v35 = vpop.f32.mrf.mxu1  ;;  %v2351_v21 = vpop.f32.mrf.mxu2 }
 0x5d3   :  { %v2303_v56 = vadd.f32 %v5133_v9, %v2302_v35  ;;  %2465 = vadd.xlane.f32.xlu1 %v2438_v40  ;;  %2401 = vadd.xlane.f32.xlu0 %v5239_v44  ;;  %v3085_v35 = vadd.f32 %v3084_v42, %v5107_v51 }
 0x5d5   :  { %v2352_v52 = vadd.f32 %v2351_v21, %v2303_v56  ;;  %v3014_v56 = vrot.slane %v5061_v8, 4 }
 0x5d7   :  { %v5250_v24 = vadd.f32 %v2352_v52, %v5002_v30  ;;  %v5263_v30 = vpop.permute.xlu1 %2862  ;;  %v5267_v2 = vpop.permute.xlu0 %3124 }
 0x5d8   :  { %5893 = vst [vmem:[#allocation24_spill] sm:$0xff] %v5263_v30 }
 0x5d9   :  { %v2439_v26 = vmul.f32 %v5250_v24, %v5250_v24 }
 0x5da   :  { %v2304_v49 = vpop.f32.mrf.mxu1  ;;  %v2353_v16 = vpop.f32.mrf.mxu2 }
 0x5db   :  { %v2305_v17 = vadd.f32 %v5133_v9, %v2304_v49  ;;  %2403 = vadd.xlane.f32.xlu1 %v5250_v24  ;;  %2467 = vadd.xlane.f32.xlu2 %v2439_v26  ;;  %v3086_v49 = vrot.slane %v3085_v35, 2 }
 0x5dd   :  { %v2354_v18 = vadd.f32 %v2353_v16, %v2305_v17  ;;  %v5292_v17 = vpop.permute.xlu2 %3179 }
 0x5de   :  { %5900 = vst [vmem:[#allocation31_spill] sm:$0xff] %v5292_v17 }
 0x5df   :  { %v5261_v27 = vadd.f32 %v2354_v18, %v4999_v55  ;;  %v5272_v58 = vpop.permute.xlu1 %3164  ;;  %v5275_v4 = vpop.permute.xlu0 %3169  ;;  %v3022_v55 = vadd.f32 %v3021_v54, %v5057_v14  ;;  %v3070_v14 = vrot.slane %v5111_v47, 4  ;;  %v3015_v18 = vadd.f32 %v3014_v56, %v5061_v8 }
 0x5e0   :  { %5894 = vst [vmem:[#allocation25_spill] sm:$0xff] %v5272_v58  ;;  %v3077_v8 = vrot.slane %v5115_v59, 4 }
 0x5e1   :  { %v2440_v60 = vmul.f32 %v5261_v27, %v5261_v27  ;;  %5895 = vst [vmem:[#allocation26_spill] sm:$0xff] %v5275_v4  ;;  %v3023_v46 = vrot.slane %v3022_v55, 2  ;;  %v3071_v54 = vadd.f32 %v3070_v14, %v5111_v47 }
 0x5e3   :  { %2469 = vadd.xlane.f32.xlu0 %v2440_v60  ;;  %2405 = vadd.xlane.f32.xlu2 %v5261_v27  ;;  %v3024_v40 = vadd.f32 %v3023_v46, %v3022_v55  ;;  %v3072_v17 = vrot.slane %v3071_v54, 2 }
 0x5e5   :  { %v3025_v26 = vrot.slane %v3024_v40, 1 }
 0x5e7   :  { %v5281_v34 = vpop.permute.xlu1 %3174  ;;  %v5283_v33 = vpop.permute.xlu0 %3139  ;;  %v3026_v55 = vadd.f32 %v3025_v26, %v3024_v40  ;;  %v3073_v26 = vadd.f32 %v3072_v17, %v3071_v54 }
 0x5e8   :  { %5897 = vst [vmem:[#allocation28_spill] sm:$0xff] %v5281_v34 }
 0x5e9   :  { %5898 = vst [vmem:[#allocation29_spill] sm:$0xff] %v5283_v33  ;;  %v3096_v56 = vadd.f32 1e-09, %v3026_v55 }
 0x5eb   :  { %3960 = vrcp.f32 %v3096_v56 }
 0x5ee   :  { %v2444_v47 = vpop.xlane.xlu2 %2443 }
 0x5ef   :  { %v5298_v51 = vpop.permute.xlu1 %3144  ;;  %v5301_v46 = vpop.permute.xlu0 %3184 }
 0x5f0   :  { %5901 = vst [vmem:[#allocation32_spill] sm:$0xff] %v5298_v51 }
 0x5f1   :  { %5902 = vst [vmem:[#allocation33_spill] sm:$0xff] %v5301_v46  ;;  %v3961_v17 = vpop.eup %3960 }
 0x5f6   :  { %v2382_v56 = vpop.xlane.xlu2 %2381 }
 0x5f7   :  { %v2380_v14 = vpop.xlane.xlu1 %2379  ;;  %v5320_v3 = vmul.f32 0.0078125, %v2382_v56 }
 0x5f8   :  { %v2307_v5 = vpop.f32.mrf.mxu1  ;;  %v2356_v7 = vpop.f32.mrf.mxu2  ;;  %v5314_v55 = vmul.f32 0.0078125, %v2380_v14 }
 0x5f9   :  { %v2308_v12 = vadd.f32 %v5133_v9, %v2307_v5 }
 0x5fb   :  { %v2357_v21 = vadd.f32 %v2356_v7, %v2308_v12  ;;  %v3016_v12 = vrot.slane %v3015_v18, 2  ;;  %v3028_v7 = vrot.slane %v5080_v45, 4 }
 0x5fd   :  { %v5290_v52 = vadd.f32 %v2357_v21, %v5016_v63  ;;  %v3087_v63 = vadd.f32 %v3086_v49, %v3085_v35  ;;  %v3017_v40 = vadd.f32 %v3016_v12, %v3015_v18  ;;  %v3029_v35 = vadd.f32 %v3028_v7, %v5080_v45 }
 0x5fe   :  { %v3078_v49 = vadd.f32 %v3077_v8, %v5115_v59  ;;  %v3074_v18 = vrot.slane %v3073_v26, 1  ;;  %v2491_v12 = vmul.f32 %v5314_v55, %v5314_v55  ;;  %v2475_v7 = vmul.f32 0.0078125, %v2444_v47 }
 0x5ff   :  { %5899 = vst [vmem:[#allocation30_spill] sm:$0xff] %v5290_v52  ;;  %2407 = vadd.xlane.f32.xlu0 %v5290_v52  ;;  %v2441_v16 = vmul.f32 %v5290_v52, %v5290_v52  ;;  %v3088_v58 = vrot.slane %v3087_v63, 1 }
 0x600   :  { %v2309_v60 = vpop.f32.mrf.mxu1  ;;  %v2358_v5 = vpop.f32.mrf.mxu2 }
 0x601   :  { %2471 = vadd.xlane.f32.xlu1 %v2441_v16  ;;  %v2310_v42 = vadd.f32 %v5133_v9, %v2309_v60  ;;  %v3089_v16 = vadd.f32 %v3088_v58, %v3087_v63  ;;  %v2446_v60 = vpop.xlane.xlu0 %2445  ;;  %v2448_v58 = vpop.xlane.xlu1 %2447  ;;  %v2507_v63 = vsub.f32 %v2475_v7, %v2491_v12 }
 0x603   :  { %v2359_v21 = vadd.f32 %v2358_v5, %v2310_v42  ;;  %v3030_v42 = vrot.slane %v3029_v35, 2  ;;  %v3079_v5 = vrot.slane %v3078_v49, 2  ;;  %v3105_v45 = vadd.f32 1e-09, %v3089_v16 }
 0x604   :  { %v5318_v16 = vadd.f32 1e-05, %v2507_v63 }
 0x605   :  { %v5307_v34 = vadd.f32 %v2359_v21, %v5019_v48  ;;  %v3018_v48 = vrot.slane %v3017_v40, 1  ;;  %v3031_v59 = vadd.f32 %v3030_v42, %v3029_v35  ;;  %v3075_v21 = vadd.f32 %v3074_v18, %v3073_v26 }
 0x606   :  { %v3080_v8 = vadd.f32 %v3079_v5, %v3078_v49  ;;  %3962 = vrcp.f32 %v3105_v45  ;;  %v2450_v35 = vpop.xlane.xlu2 %2449  ;;  %v2492_v49 = vmul.f32 %v5320_v3, %v5320_v3  ;;  %v2476_v45 = vmul.f32 0.0078125, %v2446_v60 }
 0x607   :  { %5903 = vst [vmem:[#allocation34_spill] sm:$0xff] %v5307_v34  ;;  %v2442_v9 = vmul.f32 %v5307_v34, %v5307_v34  ;;  %v3019_v54 = vadd.f32 %v3018_v48, %v3017_v40  ;;  %v3103_v4 = vadd.f32 1e-09, %v3075_v21  ;;  %v2478_v63 = vmul.f32 0.0078125, %v2450_v35 }
 0x608   :  { %v3081_v30 = vrot.slane %v3080_v8, 1  ;;  %vm2561_vm4 = vweird.f32 %v5318_v16 }
 0x609   :  { %2409 = vadd.xlane.f32.xlu1 %v5307_v34  ;;  %2473 = vadd.xlane.f32.xlu2 %v2442_v9  ;;  %v3095_v14 = vadd.f32 1e-09, %v3019_v54  ;;  %v3032_v9 = vrot.slane %v3031_v59, 1  ;;  %v2384_v46 = vpop.xlane.xlu0 %2383  ;;  %v2386_v48 = vpop.xlane.xlu1 %2385 }
 0x60a   :  { %v3082_v40 = vadd.f32 %v3081_v30, %v3080_v8  ;;  %v5325_v7 = vmul.f32 0.0078125, %v2384_v46  ;;  %v2477_v8 = vmul.f32 0.0078125, %v2448_v58 }
 0x60b   :  { %3964 = vrcp.f32 %v3095_v14  ;;  %v3033_v47 = vadd.f32 %v3032_v9, %v3031_v59 }
 0x60c   :  { %v3963_v34 = vpop.eup %3962  ;;  %3966 = vrcp.f32 %v3103_v4  ;;  %v3104_v18 = vadd.f32 1e-09, %v3082_v40  ;;  %v5327_v4 = vmul.f32 0.0078125, %v2386_v48 }
 0x60d   :  { %3968 = vrsqrt.f32 %v5318_v16  ;;  %v3097_v26 = vadd.f32 1e-09, %v3033_v47 }
 0x60e   :  { %v2388_v54 = vpop.xlane.xlu2 %2387  ;;  %v2494_v46 = vmul.f32 %v5327_v4, %v5327_v4 }
 0x60f   :  { %3970 = vrcp.f32 %v3097_v26  ;;  %v5343_v58 = vmul.f32 0.0078125, %v2388_v54 }
 0x610   :  { %3972 = vrcp.f32 %v3104_v18  ;;  %v2510_v26 = vsub.f32 %v2478_v63, %v2494_v46 }
 0x611   :  { %v2452_v42 = vpop.xlane.xlu0 %2451  ;;  %v3965_v5 = vpop.eup %3964 }
 0x612   :  { %v3967_v12 = vpop.eup %3966 }
 0x613   :  { %3154 = vperm.xlu0 %3820, %v3961_v17   ;;  %v2508_v17 = vsub.f32 %v2476_v45, %v2492_v49  ;;  %v3969_v30 = vpop.eup %3968 }
 0x614   :  { %v2556_v59 = vmul.f32 %v3969_v30, %v5318_v16  ;;  %vm2562_vm3 = vweird.f32 %v3969_v30 }
 0x615   :  { %v5332_v21 = vadd.f32 1e-05, %v2508_v17  ;;  %v3971_v56 = vpop.eup %3970  ;;  %vm2563_vm5 = vmor %vm2561_vm4, %vm2562_vm3 }
 0x616   :  { %v2454_v60 = vpop.xlane.xlu1 %2453  ;;  %v3973_v9 = vpop.eup %3972  ;;  %v2557_v40 = vmul.f32 %v3969_v30, %v2556_v59  ;;  %v2495_v59 = vmul.f32 %v5343_v58, %v5343_v58 }
 0x617   :  { %3974 = vrsqrt.f32 %v5332_v21  ;;  %vm2571_vm7 = vweird.f32 %v5332_v21 }
 0x618   :  { %v2558_v18 = vmul.f32 0.5, %v2557_v40 }
 0x619   :  { %v2390_v14 = vpop.xlane.xlu0 %2389 }
 0x61a   :  { %v2559_v17 = vsub.f32 1.5, %v2558_v18  ;;  %v5356_v63 = vmul.f32 0.0078125, %v2390_v14  ;;  %v2523_v18 = vsub.f32 %v5140_v13, %v5314_v55  ;;  %v2480_v55 = vmul.f32 0.0078125, %v2454_v60 }
 0x61b   :  { %3199 = vperm.xlu0 %3820, %v3963_v34   ;;  %v2493_v34 = vmul.f32 %v5325_v7, %v5325_v7 }
 0x61c   :  { %v2560_v46 = vmul.f32 %v3969_v30, %v2559_v17  ;;  %v2496_v52 = vmul.f32 %v5356_v63, %v5356_v63 }
 0x61d   :  { %v2509_v47 = vsub.f32 %v2477_v8, %v2493_v34  ;;  %v5341_v45 = vpop.eup %3974  ;;  %v2479_v8 = vmul.f32 0.0078125, %v2452_v42 }
 0x61e   :  { %v2456_v48 = vpop.xlane.xlu2 %2455  ;;  %v2392_v35 = vpop.xlane.xlu1 %2391  ;;  %v2566_v34 = vmul.f32 %v5341_v45, %v5332_v21  ;;  %v2564_v17 = vsel %vm2563_vm5, %v3969_v30, %v2560_v46  ;;  %v2512_v10 = vsub.f32 %v2480_v55, %v2496_v52  ;;  %vm2572_vm6 = vweird.f32 %v5341_v45 }
 0x61f   :  { %v5337_v49 = vadd.f32 1e-05, %v2509_v47  ;;  %v2511_v40 = vsub.f32 %v2479_v8, %v2495_v59  ;;  %v5376_v59 = vld [vmem:[%s5871_s11] ss:$0 sm:$0xff]  ;;  %v2715_v13 = vmul.f32 %v2564_v17, %v2523_v18  ;;  %v5378_v30 = vmul.f32 0.0078125, %v2392_v35  ;;  %vm2573_vm8 = vmor %vm2571_vm7, %vm2572_vm6  ;;  %s4145_s11 = smov [#allocation10]  }
 0x620   :  { %v2567_v54 = vmul.f32 %v5341_v45, %v2566_v34 }
 0x621   :  { %3149 = vperm.xlu2 %3822, %v3965_v5   ;;  %v5339_v5 = vadd.f32 1e-05, %v2510_v26  ;;  %3976 = vrsqrt.f32 %v5337_v49  ;;  %v5371_v16 = vadd.f32 1e-05, %v2511_v40  ;;  %v5386_v40 = vld [vmem:[%s5872_s12] ss:$0 sm:$0xff]  ;;  %v2734_v57 = vmul.f32 %v5376_v59, %v2715_v13 }
 0x622   :  { %3189 = vperm.xlu1 %3821, %v3967_v12   ;;  %v2568_v51 = vmul.f32 0.5, %v2567_v54  ;;  %vm2581_vm11 = vweird.f32 %v5337_v49  ;;  %s3399_s12 = sshll.u32 %s4145_s11, 4  ;;  %s3400_s12 = int_to_ptr.vmem [resolvable:$true] %s3399_s12 }
 0x623   :  { %3978 = vrsqrt.f32 %v5339_v5  ;;  %v2753_v33 = vadd.f32 %v5386_v40, %v2734_v57  ;;  %vm2591_vm13 = vweird.f32 %v5339_v5  ;;  %vm2601_vm0 = vweird.f32 %v5371_v16 }
 0x624   :  { %v2569_v46 = vsub.f32 1.5, %v2568_v51  ;;  %3980 = vrsqrt.f32 %v5371_v16  ;;  %v2497_v51 = vmul.f32 %v5378_v30, %v5378_v30 }
 0x625   :  { %v2865_v57 = vmul.f32 %v5206_v36, %v2753_v33 }
 0x626   :  { %v5345_v12 = vpop.xlane.xlu0 %2457  ;;  %v2570_v18 = vmul.f32 %v5341_v45, %v2569_v46 }
 0x628   :  { %v2574_v61 = vsel %vm2573_vm8, %v5341_v45, %v2570_v18 }
 0x629   :  { %3194 = vperm.xlu2 %3822, %v3973_v9   ;;  %v2394_v9 = vpop.xlane.xlu2 %2393 }
 0x62a   :  { %3159 = vperm.xlu1 %3821, %v3971_v56   ;;  %v5353_v56 = vpop.eup %3976  ;;  %v5395_v55 = vmul.f32 0.0078125, %v2394_v9 }
 0x62b   :  { %v5358_v47 = vpop.eup %3978  ;;  %v2576_v34 = vmul.f32 %v5353_v56, %v5337_v49  ;;  %vm2582_vm9 = vweird.f32 %v5353_v56 }
 0x62c   :  { %v2586_v14 = vmul.f32 %v5358_v47, %v5339_v5  ;;  %v5399_v13 = vpop.eup %3980  ;;  %vm2592_vm10 = vweird.f32 %v5358_v47  ;;  %vm5428_vm12 = vmor %vm2581_vm11, %vm2582_vm9 }
 0x62d   :  { %v2577_v8 = vmul.f32 %v5353_v56, %v2576_v34  ;;  %v5393_v34 = vadd.f32 1e-05, %v2512_v10  ;;  %v2524_v10 = vsub.f32 %v5147_v31, %v5320_v3  ;;  %v2596_v21 = vmul.f32 %v5399_v13, %v5371_v16  ;;  %vm5437_vm14 = vmor %vm2591_vm13, %vm2592_vm10 }
 0x62e   :  { %v5361_v26 = vpop.xlane.xlu1 %2459  ;;  %v2396_v42 = vpop.xlane.xlu0 %2395  ;;  %v2587_v54 = vmul.f32 %v5358_v47, %v2586_v14  ;;  %v2481_v14 = vmul.f32 0.0078125, %v2456_v48  ;;  %v2498_v48 = vmul.f32 %v5395_v55, %v5395_v55  ;;  %vm2602_vm15 = vweird.f32 %v5399_v13 }
 0x62f   :  { %v2578_v52 = vmul.f32 0.5, %v2577_v8  ;;  %3982 = vrsqrt.f32 %v5393_v34  ;;  %v2716_v8 = vmul.f32 %v2574_v61, %v2524_v10  ;;  %v5419_v36 = vmul.f32 0.0078125, %v2396_v42  ;;  %vm5499_vm1 = vmor %vm2601_vm0, %vm2602_vm15 }
 0x630   :  { %v2588_v17 = vmul.f32 0.5, %v2587_v54  ;;  %v2513_v37 = vsub.f32 %v2481_v14, %v2497_v51  ;;  %v2482_v54 = vmul.f32 0.0078125, %v5345_v12  ;;  %v2881_v42 = vrot.slane %v2865_v57, 4 }
 0x631   :  { %v2579_v11 = vsub.f32 1.5, %v2578_v52  ;;  %v2735_v49 = vmul.f32 %v5376_v59, %v2716_v8  ;;  %v2525_v14 = vsub.f32 %v5154_v23, %v5325_v7  ;;  %v2526_v7 = vsub.f32 %v5161_v39, %v5327_v4 }
 0x632   :  { %v2589_v6 = vsub.f32 1.5, %v2588_v17  ;;  %v5413_v45 = vadd.f32 1e-05, %v2513_v37  ;;  %v2514_v33 = vsub.f32 %v2482_v54, %v2498_v48  ;;  %v2499_v48 = vmul.f32 %v5419_v36, %v5419_v36 }
 0x633   :  { %v2580_v3 = vmul.f32 %v5353_v56, %v2579_v11  ;;  %v2483_v8 = vmul.f32 0.0078125, %v5361_v26  ;;  %v2882_v54 = vadd.f32 %v2881_v42, %v2865_v57  ;;  %vm2611_vm3 = vweird.f32 %v5393_v34 }
 0x634   :  { %3984 = vrsqrt.f32 %v5413_v45  ;;  %vm2621_vm6 = vweird.f32 %v5413_v45 }
 0x635   :  { %v5426_v18 = vpop.eup %3982  ;;  %v2584_v5 = vsel %vm5428_vm12, %v5353_v56, %v2580_v3  ;;  %v2515_v52 = vsub.f32 %v2483_v8, %v2499_v48 }
 0x636   :  { %v2462_v53 = vpop.xlane.xlu2 %2461  ;;  %v2398_v60 = vpop.xlane.xlu1 %2397  ;;  %v2717_v3 = vmul.f32 %v2584_v5, %v2525_v14  ;;  %vm2612_vm2 = vweird.f32 %v5426_v18 }
 0x637   :  { %v5407_v9 = vmul.f32 0.0078125, %v2398_v60  ;;  %v2590_v60 = vmul.f32 %v5358_v47, %v2589_v6  ;;  %v2597_v6 = vmul.f32 %v5399_v13, %v2596_v21  ;;  %v2484_v17 = vmul.f32 0.0078125, %v2462_v53  ;;  %vm5533_vm4 = vmor %vm2611_vm3, %vm2612_vm2 }
 0x638   :  { %v2606_v21 = vmul.f32 %v5426_v18, %v5393_v34  ;;  %v2736_v14 = vmul.f32 %v5376_v59, %v2717_v3 }
 0x639   :  { %v2500_v61 = vmul.f32 %v5407_v9, %v5407_v9  ;;  %v2594_v10 = vsel %vm5437_vm14, %v5358_v47, %v2590_v60  ;;  %v2598_v56 = vmul.f32 0.5, %v2597_v6 }
 0x63a   :  { %v5466_v22 = vpop.eup %3984  ;;  %v2607_v39 = vmul.f32 %v5426_v18, %v2606_v21 }
 0x63b   :  { %v2516_v53 = vsub.f32 %v2484_v17, %v2500_v61  ;;  %v2718_v61 = vmul.f32 %v2594_v10, %v2526_v7  ;;  %v2599_v57 = vsub.f32 1.5, %v2598_v56  ;;  %v2616_v5 = vmul.f32 %v5466_v22, %v5413_v45 }
 0x63c   :  { %v5478_v10 = vadd.f32 1e-05, %v2515_v52  ;;  %vm2622_vm5 = vweird.f32 %v5466_v22 }
 0x63d   :  { %v5470_v4 = vadd.f32 1e-05, %v2516_v53  ;;  %v2737_v21 = vmul.f32 %v5376_v59, %v2718_v61  ;;  %v2608_v53 = vmul.f32 0.5, %v2607_v39  ;;  %v2600_v7 = vmul.f32 %v5399_v13, %v2599_v57  ;;  %vm5566_vm7 = vmor %vm2621_vm6, %vm2622_vm5 }
 0x63e   :  { %v2464_v35 = vpop.xlane.xlu0 %2463  ;;  %v2400_v46 = vpop.xlane.xlu2 %2399  ;;  %v2527_v61 = vsub.f32 %v5168_v41, %v5343_v58  ;;  %vm2641_vm12 = vweird.f32 %v5478_v10 }
 0x63f   :  { %v5424_v37 = vmul.f32 0.0078125, %v2400_v46  ;;  %v5454_v46 = vadd.f32 1e-05, %v2514_v33  ;;  %v2485_v60 = vmul.f32 0.0078125, %v2464_v35  ;;  %v2604_v16 = vsel %vm5499_vm1, %v5399_v13, %v2600_v7 }
 0x640   :  { %vm2651_vm13 = vweird.f32 %v5470_v4 }
 0x641   :  { %v2501_v23 = vmul.f32 %v5424_v37, %v5424_v37  ;;  %3986 = vrsqrt.f32 %v5454_v46  ;;  %vm2631_vm9 = vweird.f32 %v5454_v46 }
 0x642   :  { %3988 = vrsqrt.f32 %v5470_v4 }
 0x643   :  { %v2517_v26 = vsub.f32 %v2485_v60, %v2501_v23  ;;  %3990 = vrsqrt.f32 %v5478_v10 }
 0x645   :  { %v5482_v23 = vadd.f32 1e-05, %v2517_v26 }
 0x646   :  { %v2402_v51 = vpop.xlane.xlu0 %2401  ;;  %v2466_v31 = vpop.xlane.xlu1 %2465 }
 0x647   :  { %v5434_v11 = vmul.f32 0.0078125, %v2402_v51  ;;  %v2754_v51 = vadd.f32 %v5386_v40, %v2735_v49  ;;  %v2486_v17 = vmul.f32 0.0078125, %v2466_v31  ;;  %v2883_v49 = vrot.slane %v2882_v54, 2  ;;  %v5488_v56 = vpop.eup %3986 }
 0x648   :  { %3992 = vrsqrt.f32 %v5482_v23  ;;  %v2626_v39 = vmul.f32 %v5488_v56, %v5454_v46  ;;  %v5512_v41 = vpop.eup %3988  ;;  %vm2632_vm8 = vweird.f32 %v5488_v56  ;;  %vm2661_vm3 = vweird.f32 %v5482_v23 }
 0x649   :  { %v2502_v47 = vmul.f32 %v5434_v11, %v5434_v11  ;;  %v2866_v31 = vmul.f32 %v5190_v0, %v2754_v51  ;;  %v2884_v8 = vadd.f32 %v2883_v49, %v2882_v54  ;;  %v2755_v51 = vadd.f32 %v5386_v40, %v2736_v14  ;;  %vm2633_vm10 = vmor %vm2631_vm9, %vm2632_vm8 }
 0x64a   :  { %v2609_v54 = vsub.f32 1.5, %v2608_v53  ;;  %v2719_v14 = vmul.f32 %v2604_v16, %v2527_v61  ;;  %vm2652_vm11 = vweird.f32 %v5512_v41 }
 0x64b   :  { %v2518_v6 = vsub.f32 %v2486_v17, %v2502_v47  ;;  %v2887_v47 = vrot.slane %v2866_v31, 4  ;;  %v2885_v58 = vrot.slane %v2884_v8, 1  ;;  %vm5616_vm15 = vmor %vm2651_vm13, %vm2652_vm11  ;;  %vm3250_vm13 = vcmask 1041409  }
 0x64d   :  { %v5486_v0 = vadd.f32 1e-05, %v2518_v6  ;;  %v2888_v57 = vadd.f32 %v2887_v47, %v2866_v31  ;;  %v2867_v6 = vmul.f32 %v5188_v20, %v2755_v51  ;;  %v2627_v31 = vmul.f32 %v5488_v56, %v2626_v39 }
 0x64e   :  { %v2468_v33 = vpop.xlane.xlu2 %2467  ;;  %v2404_v12 = vpop.xlane.xlu1 %2403  ;;  %v2646_v20 = vmul.f32 %v5512_v41, %v5470_v4 }
 0x64f   :  { %v5464_v38 = vmul.f32 0.0078125, %v2404_v12  ;;  %v2487_v42 = vmul.f32 0.0078125, %v2468_v33  ;;  %v2617_v33 = vmul.f32 %v5466_v22, %v2616_v5  ;;  %v2756_v12 = vadd.f32 %v5386_v40, %v2737_v21 }
 0x650   :  { %3994 = vrsqrt.f32 %v5486_v0  ;;  %v2610_v5 = vmul.f32 %v5426_v18, %v2609_v54  ;;  %v2889_v7 = vrot.slane %v2888_v57, 2  ;;  %v2893_v47 = vrot.slane %v2867_v6, 4 }
 0x651   :  { %v2503_v35 = vmul.f32 %v5464_v38, %v5464_v38  ;;  %v2868_v49 = vmul.f32 %v5199_v50, %v2756_v12  ;;  %v2886_v50 = vadd.f32 %v2885_v58, %v2884_v8  ;;  %vm2671_vm6 = vweird.f32 %v5486_v0 }
 0x652   :  { %v2614_v34 = vsel %vm5533_vm4, %v5426_v18, %v2610_v5  ;;  %v2890_v39 = vadd.f32 %v2889_v7, %v2888_v57  ;;  %v2894_v58 = vadd.f32 %v2893_v47, %v2867_v6  ;;  %v2529_v7 = vsub.f32 %v5182_v1, %v5378_v30 }
 0x653   :  { %v2519_v48 = vsub.f32 %v2487_v42, %v2503_v35  ;;  %v2618_v42 = vmul.f32 0.5, %v2617_v33  ;;  %v2899_v54 = vrot.slane %v2868_v49, 4 }
 0x654   :  { %v2895_v45 = vrot.slane %v2894_v58, 2 }
 0x655   :  { %v5491_v3 = vadd.f32 1e-05, %v2519_v48  ;;  %v5521_v48 = vpop.eup %3990  ;;  %v2619_v12 = vsub.f32 1.5, %v2618_v42  ;;  %v2900_v5 = vadd.f32 %v2899_v54, %v2868_v49 }
 0x656   :  { %v2406_v60 = vpop.xlane.xlu2 %2405  ;;  %v2470_v17 = vpop.xlane.xlu0 %2469  ;;  %v2636_v8 = vmul.f32 %v5521_v48, %v5478_v10  ;;  %vm2642_vm14 = vweird.f32 %v5521_v48 }
 0x657   :  { %v5510_v26 = vmul.f32 0.0078125, %v2406_v60  ;;  %3996 = vrsqrt.f32 %v5491_v3  ;;  %v2488_v35 = vmul.f32 0.0078125, %v2470_v17  ;;  %v5526_v53 = vpop.eup %3992  ;;  %v2528_v60 = vsub.f32 %v5175_v28, %v5356_v63  ;;  %vm5632_vm2 = vmor %vm2641_vm12, %vm2642_vm14 }
 0x658   :  { %v5529_v51 = vpop.eup %3994  ;;  %v2738_v17 = vmul.f32 %v5376_v59, %v2719_v14  ;;  %v2628_v28 = vmul.f32 0.5, %v2627_v31  ;;  %v2647_v63 = vmul.f32 %v5512_v41, %v2646_v20  ;;  %v2656_v16 = vmul.f32 %v5526_v53, %v5482_v23 }
 0x659   :  { %v2504_v13 = vmul.f32 %v5510_v26, %v5510_v26  ;;  %v2666_v42 = vmul.f32 %v5529_v51, %v5486_v0  ;;  %v2720_v18 = vmul.f32 %v2614_v34, %v2528_v60  ;;  %v2637_v57 = vmul.f32 %v5521_v48, %v2636_v8 }
 0x65a   :  { %v2757_v31 = vadd.f32 %v5386_v40, %v2738_v17  ;;  %v2629_v6 = vsub.f32 1.5, %v2628_v28  ;;  %v2648_v20 = vmul.f32 0.5, %v2647_v63  ;;  %v2901_v30 = vrot.slane %v2900_v5, 2 }
 0x65b   :  { %v2520_v21 = vsub.f32 %v2488_v35, %v2504_v13  ;;  %v5554_v35 = vmul.f32 %v5267_v2, %v2886_v50  ;;  %v2620_v13 = vmul.f32 %v5466_v22, %v2619_v12  ;;  %v2657_v2 = vmul.f32 %v5526_v53, %v2656_v16 }
 0x65c   :  { %v2667_v49 = vmul.f32 %v5529_v51, %v2666_v42  ;;  %v2739_v1 = vmul.f32 %v5376_v59, %v2720_v18  ;;  %v5583_v54 = vmul.f32 %v5201_v15, %v2757_v31  ;;  %v2638_v17 = vmul.f32 0.5, %v2637_v57 }
 0x65d   :  { %v5537_v61 = vadd.f32 1e-05, %v2520_v21  ;;  %v5539_v52 = vpop.eup %3996  ;;  %v2891_v21 = vrot.slane %v2890_v39, 1  ;;  %v5573_v50 = vmul.f32 %v5554_v35, %v5554_v35  ;;  %v2624_v33 = vsel %vm5566_vm7, %v5466_v22, %v2620_v13 }
 0x65e   :  { %v2676_v14 = vmul.f32 %v5539_v52, %v5491_v3  ;;  %v2630_v8 = vmul.f32 %v5488_v56, %v2629_v6  ;;  %v2649_v28 = vsub.f32 1.5, %v2648_v20  ;;  %v2658_v63 = vmul.f32 0.5, %v2657_v2 }
 0x65f   :  { %3998 = vrsqrt.f32 %v5537_v61  ;;  %v5589_v16 = vadd.f32 %v2891_v21, %v2890_v39  ;;  %v2721_v22 = vmul.f32 %v2624_v33, %v2529_v7  ;;  %v2668_v42 = vmul.f32 0.5, %v2667_v49 }
 0x660   :  { %v2677_v12 = vmul.f32 %v5539_v52, %v2676_v14  ;;  %v5592_v13 = vadd.f32 %v2895_v45, %v2894_v58  ;;  %v2758_v14 = vadd.f32 %v5386_v40, %v2739_v1  ;;  %v5596_v31 = vadd.f32 %v2901_v30, %v2900_v5 }
 0x661   :  { %v2905_v57 = vrot.slane %v5583_v54, 4  ;;  %v2530_v6 = vsub.f32 %v5193_v62, %v5395_v55  ;;  %v2639_v39 = vsub.f32 1.5, %v2638_v17  ;;  %v2634_v20 = vsel %vm2633_vm10, %v5488_v56, %v2630_v8 }
 0x662   :  { %v2678_v15 = vmul.f32 0.5, %v2677_v12  ;;  %v2650_v2 = vmul.f32 %v5512_v41, %v2649_v28  ;;  %v2659_v58 = vsub.f32 1.5, %v2658_v63  ;;  %v2740_v46 = vmul.f32 %v5376_v59, %v2721_v22 }
 0x663   :  { %v2531_v5 = vsub.f32 %v5204_v43, %v5419_v36  ;;  %v2669_v21 = vsub.f32 1.5, %v2668_v42  ;;  %v5610_v55 = vmul.f32 %v5215_v19, %v2758_v14  ;;  %v2722_v56 = vmul.f32 %v2634_v20, %v2530_v6 }
 0x664   :  { %v2679_v62 = vsub.f32 1.5, %v2678_v15  ;;  %v2640_v47 = vmul.f32 %v5521_v48, %v2639_v39  ;;  %v2532_v49 = vsub.f32 %v5213_v29, %v5407_v9  ;;  %v2654_v4 = vsel %vm5616_vm15, %v5512_v41, %v2650_v2 }
 0x665   :  { %v5575_v60 = vpop.eup %3998  ;;  %v2660_v19 = vmul.f32 %v5526_v53, %v2659_v58  ;;  %vm2662_vm0 = vweird.f32 %v5526_v53  ;;  %v2759_v33 = vadd.f32 %v5386_v40, %v2740_v46  ;;  %v2670_v12 = vmul.f32 %v5529_v51, %v2669_v21 }
 0x666   :  { %v2686_v34 = vmul.f32 %v5575_v60, %v5537_v61  ;;  %vm2672_vm1 = vweird.f32 %v5529_v51  ;;  %v2680_v41 = vmul.f32 %v5539_v52, %v2679_v62  ;;  %vm2682_vm4 = vweird.f32 %v5539_v52  ;;  %vm5644_vm5 = vmor %vm2661_vm3, %vm2662_vm0 }
 0x667   :  { %v2644_v17 = vsel %vm5632_vm2, %v5521_v48, %v2640_v47  ;;  %v2741_v23 = vmul.f32 %v5376_v59, %v2722_v56  ;;  %v2533_v28 = vsub.f32 %v5226_v25, %v5424_v37  ;;  %v2664_v63 = vsel %vm5644_vm5, %v5526_v53, %v2660_v19  ;;  %vm5657_vm7 = vmor %vm2671_vm6, %vm2672_vm1  ;;  %v5930_v48 = vld [vmem:[#allocation17_spill] sm:$0xff] }
 0x668   :  { %v2687_v18 = vmul.f32 %v5575_v60, %v2686_v34  ;;  %v2724_v34 = vmul.f32 %v2654_v4, %v2532_v49  ;;  %vm2681_vm8 = vweird.f32 %v5491_v3  ;;  %v2674_v0 = vsel %vm5657_vm7, %v5529_v51, %v2670_v12 }
 0x669   :  { %vm5665_vm9 = vmor %vm2681_vm8, %vm2682_vm4  ;;  %vm2692_vm10 = vweird.f32 %v5575_v60  ;;  %v2723_v53 = vmul.f32 %v2644_v17, %v2531_v5  ;;  %v2534_v42 = vsub.f32 %v5239_v44, %v5434_v11  ;;  %v2535_v3 = vsub.f32 %v5250_v24, %v5464_v38 }
 0x66a   :  { %v2688_v7 = vmul.f32 0.5, %v2687_v18  ;;  %v2684_v51 = vsel %vm5665_vm9, %v5539_v52, %v2680_v41  ;;  %v2743_v18 = vmul.f32 %v5376_v59, %v2724_v34  ;;  %v2725_v15 = vmul.f32 %v2664_v63, %v2533_v28 }
 0x66b   :  { %vm2691_vm11 = vweird.f32 %v5537_v61  ;;  %v5684_v6 = vmul.f32 %v5270_v32, %v5589_v16  ;;  %v2726_v39 = vmul.f32 %v2674_v0, %v2534_v42  ;;  %v2897_v38 = vrot.slane %v5592_v13, 1 }
 0x66c   :  { %v2689_v29 = vsub.f32 1.5, %v2688_v7  ;;  %vm5686_vm12 = vmor %vm2691_vm11, %vm2692_vm10  ;;  %v2906_v24 = vadd.f32 %v2905_v57, %v5583_v54  ;;  %v2727_v11 = vmul.f32 %v2684_v51, %v2535_v3  ;;  %v2911_v52 = vrot.slane %v5610_v55, 4  ;;  %v5926_v54 = vld [vmem:[#allocation15_spill] sm:$0xff]  ;;  %v5932_v51 = vld [vmem:[#allocation29_spill] sm:$0xff] }
 0x66d   :  { %v2742_v16 = vmul.f32 %v5376_v59, %v2723_v53  ;;  %v2536_v20 = vsub.f32 %v5261_v27, %v5510_v26  ;;  %v2871_v57 = vmul.f32 %v5926_v54, %v2759_v33  ;;  %v2903_v46 = vrot.slane %v5596_v31, 1  ;;  %v5931_v53 = vld [vmem:[#allocation19_spill] sm:$0xff] }
 0x66e   :  { %v2690_v25 = vmul.f32 %v5575_v60, %v2689_v29  ;;  %v2762_v5 = vadd.f32 %v5386_v40, %v2743_v18  ;;  %v2744_v21 = vmul.f32 %v5376_v59, %v2725_v15  ;;  %v2745_v7 = vmul.f32 %v5376_v59, %v2726_v39  ;;  %v5933_v15 = vld [vmem:[#allocation20_spill] sm:$0xff] }
 0x66f   :  { %v2746_v26 = vmul.f32 %v5376_v59, %v2727_v11  ;;  %v2912_v47 = vadd.f32 %v2911_v52, %v5610_v55  ;;  %v2898_v49 = vadd.f32 %v2897_v38, %v5592_v13  ;;  %v2907_v43 = vrot.slane %v2906_v24, 2  ;;  %v5934_v11 = vld [vmem:[#allocation21_spill] sm:$0xff] }
 0x670   :  { %v2694_v61 = vsel %vm5686_vm12, %v5575_v60, %v2690_v25  ;;  %v2760_v60 = vadd.f32 %v5386_v40, %v2741_v23  ;;  %v2917_v19 = vrot.slane %v2871_v57, 4  ;;  %v3219_v33 = vmul.f32 %v5684_v6, %v5684_v6 }
 0x671   :  { %v2728_v62 = vmul.f32 %v2694_v61, %v2536_v20  ;;  %v2904_v29 = vadd.f32 %v2903_v46, %v5596_v31  ;;  %v2763_v41 = vadd.f32 %v5386_v40, %v2744_v21  ;;  %v2764_v55 = vadd.f32 %v5386_v40, %v2745_v7  ;;  %v5929_v31 = vld [vmem:[#allocation27_spill] sm:$0xff] }
 0x672   :  { %v2408_v36 = vpop.xlane.xlu0 %2407  ;;  %vm3252_vm14 = vcmask 1042434   ;;  %v2913_v23 = vrot.slane %v2912_v47, 2  ;;  %v2908_v28 = vadd.f32 %v2907_v43, %v2906_v24  ;;  %v5729_v63 = vmul.f32 %v5929_v31, %v2898_v49  ;;  %v5937_v31 = vld [vmem:[#allocation32_spill] sm:$0xff] }
 0x673   :  { %v5625_v45 = vmul.f32 0.0078125, %v2408_v36  ;;  %v2761_v36 = vadd.f32 %v5386_v40, %v2742_v16  ;;  %v2747_v13 = vmul.f32 %v5376_v59, %v2728_v62  ;;  %v2918_v25 = vadd.f32 %v2917_v19, %v2871_v57  ;;  %v5935_v62 = vld [vmem:[#allocation22_spill] sm:$0xff] }
 0x674   :  { %v2472_v9 = vpop.xlane.xlu1 %2471  ;;  %vm3254_vm15 = vcmask 1043459   ;;  %v2875_v42 = vmul.f32 %v5931_v53, %v2763_v41  ;;  %v5735_v18 = vmul.f32 %v5932_v51, %v2904_v29  ;;  %v2876_v39 = vmul.f32 %v5933_v15, %v2764_v55 }
 0x675   :  { %v2505_v30 = vmul.f32 %v5625_v45, %v5625_v45  ;;  %v2489_v8 = vmul.f32 0.0078125, %v2472_v9  ;;  %v5927_v9 = vld [vmem:[#allocation18_spill] sm:$0xff]  ;;  %v2873_v0 = vmul.f32 %v5930_v48, %v2761_v36  ;;  %v2766_v44 = vadd.f32 %v5386_v40, %v2747_v13 }
 0x676   :  { %v2874_v1 = vmul.f32 %v5927_v9, %v2762_v5  ;;  %v3251_v24 = vsel %vm3250_vm13, %v3219_v33, %v5573_v50  ;;  %v2909_v52 = vrot.slane %v2908_v28, 1  ;;  %v3220_v16 = vmul.f32 %v5729_v63, %v5729_v63 }
 0x677   :  { %v2521_v37 = vsub.f32 %v2489_v8, %v2505_v30  ;;  %v5928_v30 = vld [vmem:[#allocation16_spill] sm:$0xff]  ;;  %v2765_v8 = vadd.f32 %v5386_v40, %v2746_v26  ;;  %v2929_v20 = vrot.slane %v2873_v0, 4  ;;  %v2919_v54 = vrot.slane %v2918_v25, 2  ;;  %v5936_v26 = vld [vmem:[#allocation30_spill] sm:$0xff] }
 0x678   :  { %v2872_v17 = vmul.f32 %v5928_v30, %v2760_v60  ;;  %v2941_v46 = vrot.slane %v2875_v42, 4  ;;  %v3221_v5 = vmul.f32 %v5735_v18, %v5735_v18  ;;  %v2947_v7 = vrot.slane %v2876_v39, 4 }
 0x679   :  { %v5680_v14 = vadd.f32 1e-05, %v2521_v37  ;;  %v2935_v37 = vrot.slane %v2874_v1, 4  ;;  %v2877_v61 = vmul.f32 %v5934_v11, %v2765_v8  ;;  %v2910_v43 = vadd.f32 %v2909_v52, %v2908_v28  ;;  %v5939_v11 = vld [vmem:[#allocation34_spill] sm:$0xff] }
 0x67a   :  { %v2923_v3 = vrot.slane %v2872_v17, 4  ;;  %v2930_v36 = vadd.f32 %v2929_v20, %v2873_v0  ;;  %v2920_v33 = vadd.f32 %v2919_v54, %v2918_v25  ;;  %v2942_v29 = vadd.f32 %v2941_v46, %v2875_v42 }
 0x67b   :  { %4000 = vrsqrt.f32 %v5680_v14  ;;  %v2936_v57 = vadd.f32 %v2935_v37, %v2874_v1  ;;  %vm2701_vm1 = vweird.f32 %v5680_v14  ;;  %v3253_v41 = vsel %vm3252_vm14, %v3220_v16, %v3251_v24 }
 0x67c   :  { %v2410_v32 = vpop.xlane.xlu1 %2409  ;;  %v2474_v2 = vpop.xlane.xlu2 %2473  ;;  %v2924_v60 = vadd.f32 %v2923_v3, %v2872_v17  ;;  %vm3256_vm3 = vcmask 1044484   ;;  %v2948_v30 = vadd.f32 %v2947_v7, %v2876_v39  ;;  %v3255_v8 = vsel %vm3254_vm15, %v3221_v5, %v3253_v41 }
 0x67d   :  { %v5702_v58 = vmul.f32 0.0078125, %v2410_v32  ;;  %v2490_v56 = vmul.f32 0.0078125, %v2474_v2  ;;  %v2914_v32 = vadd.f32 %v2913_v23, %v2912_v47  ;;  %v2537_v47 = vsub.f32 %v5936_v26, %v5625_v45 }
 0x67e   :  { %v2925_v55 = vrot.slane %v2924_v60, 2  ;;  %v2931_v23 = vrot.slane %v2930_v36, 2  ;;  %v2921_v28 = vrot.slane %v2920_v33, 1  ;;  %v5755_v48 = vmul.f32 %v5937_v31, %v2910_v43 }
 0x67f   :  { %v2506_v27 = vmul.f32 %v5702_v58, %v5702_v58  ;;  %v2915_v19 = vrot.slane %v2914_v32, 1  ;;  %v2943_v0 = vrot.slane %v2942_v29, 2  ;;  %v2949_v42 = vrot.slane %v2948_v30, 2 }
 0x680   :  { %v2926_v51 = vadd.f32 %v2925_v55, %v2924_v60  ;;  %v2922_v16 = vadd.f32 %v2921_v28, %v2920_v33  ;;  %v3222_v20 = vmul.f32 %v5755_v48, %v5755_v48  ;;  %vm3258_vm7 = vcmask 1045509  }
 0x681   :  { %v2522_v4 = vsub.f32 %v2490_v56, %v2506_v27  ;;  %v4001_v12 = vpop.eup %4000  ;;  %v2878_v56 = vmul.f32 %v5935_v62, %v2766_v44  ;;  %v2953_v27 = vrot.slane %v2877_v61, 4  ;;  %v5938_v44 = vld [vmem:[#allocation23_spill] sm:$0xff]  ;;  %v2944_v54 = vadd.f32 %v2943_v0, %v2942_v29  ;;  %v5941_v0 = vld [vmem:[#allocation26_spill] sm:$0xff] }
 0x682   :  { %v2696_v34 = vmul.f32 %v4001_v12, %v5680_v14  ;;  %vm2702_vm0 = vweird.f32 %v4001_v12  ;;  %v2937_v14 = vrot.slane %v2936_v57, 2  ;;  %v2927_v5 = vrot.slane %v2926_v51, 1 }
 0x683   :  { %v5725_v10 = vadd.f32 1e-05, %v2522_v4  ;;  %vm2703_vm2 = vmor %vm2701_vm1, %vm2702_vm0  ;;  %v2959_v17 = vrot.slane %v2878_v56, 4  ;;  %v2954_v13 = vadd.f32 %v2953_v27, %v2877_v61  ;;  %v2538_v61 = vsub.f32 %v5939_v11, %v5702_v58 }
 0x684   :  { %v2697_v22 = vmul.f32 %v4001_v12, %v2696_v34  ;;  %v3150_v25 = vpop.permute.xlu2 %3149  ;;  %v2938_v53 = vadd.f32 %v2937_v14, %v2936_v57  ;;  %v2950_v7 = vadd.f32 %v2949_v42, %v2948_v30  ;;  %v5940_v14 = vld [vmem:[#allocation24_spill] sm:$0xff]  ;;  %vm3260_vm8 = vcmask 1046534  }
 0x685   :  { %4002 = vrsqrt.f32 %v5725_v10  ;;  %v2960_v3 = vadd.f32 %v2959_v17, %v2878_v56  ;;  %v2955_v15 = vrot.slane %v2954_v13, 2  ;;  %vm2711_vm5 = vweird.f32 %v5725_v10  ;;  %v3155_v52 = vpop.permute.xlu0 %3154  ;;  %v5942_v42 = vld [vmem:[#allocation28_spill] sm:$0xff] }
 0x686   :  { %v2698_v38 = vmul.f32 0.5, %v2697_v22  ;;  %v5766_v56 = vmul.f32 %v3155_v52, %v2922_v16  ;;  %v2951_v33 = vrot.slane %v2950_v7, 1  ;;  %vm3262_vm9 = vcmask 1047559  }
 0x687   :  { %v2956_v62 = vadd.f32 %v2955_v15, %v2954_v13 }
 0x688   :  { %v2699_v2 = vsub.f32 1.5, %v2698_v38 }
 0x68a   :  { %v2700_v50 = vmul.f32 %v4001_v12, %v2699_v2  ;;  %v2932_v2 = vadd.f32 %v2931_v23, %v2930_v36 }
 0x68b   :  { %v4003_v21 = vpop.eup %4002 }
 0x68c   :  { %v2706_v49 = vmul.f32 %v4003_v21, %v5725_v10  ;;  %v2704_v4 = vsel %vm2703_vm2, %v4001_v12, %v2700_v50  ;;  %v2916_v12 = vadd.f32 %v2915_v19, %v2914_v32  ;;  %vm2712_vm4 = vweird.f32 %v4003_v21  ;;  %v3195_v16 = vpop.permute.xlu2 %3194 }
 0x68d   :  { %v2729_v9 = vmul.f32 %v2704_v4, %v2537_v47  ;;  %vm2713_vm6 = vmor %vm2711_vm5, %vm2712_vm4  ;;  %v2961_v10 = vrot.slane %v2960_v3, 2  ;;  %v2939_v50 = vrot.slane %v2938_v53, 1  ;;  %v3257_v47 = vsel %vm3256_vm3, %v3222_v20, %v3255_v8 }
 0x68e   :  { %v2707_v1 = vmul.f32 %v4003_v21, %v2706_v49  ;;  %v5762_v32 = vmul.f32 %v3150_v25, %v2916_v12  ;;  %v2933_v49 = vrot.slane %v2932_v2, 1  ;;  %v2928_v19 = vadd.f32 %v2927_v5, %v2926_v51 }
 0x68f   :  { %v2748_v34 = vmul.f32 %v5376_v59, %v2729_v9  ;;  %v2962_v4 = vadd.f32 %v2961_v10, %v2960_v3  ;;  %v2940_v29 = vadd.f32 %v2939_v50, %v2938_v53  ;;  %v2957_v9 = vrot.slane %v2956_v62, 1 }
 0x690   :  { %v2708_v45 = vmul.f32 0.5, %v2707_v1  ;;  %v3223_v26 = vmul.f32 %v5762_v32, %v5762_v32  ;;  %v3224_v1 = vmul.f32 %v5766_v56, %v5766_v56  ;;  %v2952_v12 = vadd.f32 %v2951_v33, %v2950_v7 }
 0x691   :  { %v2767_v37 = vadd.f32 %v5386_v40, %v2748_v34  ;;  %v2963_v8 = vrot.slane %v2962_v4, 1  ;;  %v2958_v31 = vadd.f32 %v2957_v9, %v2956_v62 }
 0x692   :  { %v2709_v22 = vsub.f32 1.5, %v2708_v45  ;;  %v3259_v55 = vsel %vm3258_vm7, %v3223_v26, %v3257_v47 }
 0x693   :  { %v2879_v38 = vmul.f32 %v5938_v44, %v2767_v37  ;;  %v3261_v28 = vsel %vm3260_vm8, %v3224_v1, %v3259_v55  ;;  %v2964_v15 = vadd.f32 %v2963_v8, %v2962_v4 }
 0x694   :  { %v2710_v39 = vmul.f32 %v4003_v21, %v2709_v22  ;;  %v3190_v24 = vpop.permute.xlu1 %3189  ;;  %v5783_v22 = vmul.f32 %v5941_v0, %v2940_v29 }
 0x695   :  { %v2965_v46 = vrot.slane %v2879_v38, 4 }
 0x696   :  { %v2714_v57 = vsel %vm2713_vm6, %v4003_v21, %v2710_v39  ;;  %v2945_v21 = vrot.slane %v2944_v54, 1  ;;  %v5943_v39 = vld [vmem:[#allocation25_spill] sm:$0xff] }
 0x697   :  { %v2730_v60 = vmul.f32 %v2714_v57, %v2538_v61  ;;  %v2966_v58 = vadd.f32 %v2965_v46, %v2879_v38  ;;  %v5944_v38 = vld [vmem:[#allocation31_spill] sm:$0xff]  ;;  %v5945_v61 = vld [vmem:[#allocation33_spill] sm:$0xff] }
 0x698   :  { %v2946_v45 = vadd.f32 %v2945_v21, %v2944_v54  ;;  %v5793_v11 = vmul.f32 %v5944_v38, %v2952_v12  ;;  %v5796_v52 = vmul.f32 %v5945_v61, %v2958_v31  ;;  %v3227_v54 = vmul.f32 %v5783_v22, %v5783_v22 }
 0x699   :  { %v2749_v27 = vmul.f32 %v5376_v59, %v2730_v60  ;;  %v2967_v43 = vrot.slane %v2966_v58, 2 }
 0x69a   :  { %v5787_v3 = vmul.f32 %v5942_v42, %v2946_v45  ;;  %v3229_v5 = vmul.f32 %v5793_v11, %v5793_v11  ;;  %v3230_v7 = vmul.f32 %v5796_v52, %v5796_v52 }
 0x69b   :  { %v2768_v36 = vadd.f32 %v5386_v40, %v2749_v27  ;;  %v2968_v59 = vadd.f32 %v2967_v43, %v2966_v58  ;;  %v2934_v40 = vadd.f32 %v2933_v49, %v2932_v2  ;;  %v5798_v2 = vmul.f32 %v3190_v24, %v2964_v15  ;;  %v3200_v27 = vpop.permute.xlu0 %3199 }
 0x69c   :  { %v3160_v41 = vpop.permute.xlu1 %3159  ;;  %v3228_v46 = vmul.f32 %v5787_v3, %v5787_v3 }
 0x69d   :  { %v2880_v30 = vmul.f32 %v5940_v14, %v2768_v36  ;;  %v5776_v17 = vmul.f32 %v3160_v41, %v2928_v19  ;;  %v2969_v13 = vrot.slane %v2968_v59, 1  ;;  %v5790_v44 = vmul.f32 %v5943_v39, %v2934_v40 }
 0x69e   :  { %v3231_v50 = vmul.f32 %v5798_v2, %v5798_v2 }
 0x69f   :  { %v2971_v34 = vrot.slane %v2880_v30, 4  ;;  %v3225_v23 = vmul.f32 %v5776_v17, %v5776_v17  ;;  %v2970_v53 = vadd.f32 %v2969_v13, %v2968_v59  ;;  %v3226_v10 = vmul.f32 %v5790_v44, %v5790_v44 }
 0x6a1   :  { %v2972_v25 = vadd.f32 %v2971_v34, %v2880_v30  ;;  %v3263_v37 = vsel %vm3262_vm9, %v3225_v23, %v3261_v28  ;;  %v5802_v57 = vmul.f32 %v3195_v16, %v2970_v53  ;;  %v3264_v62 = vsel %vm3250_vm13, %v3227_v54, %v3226_v10 }
 0x6a2   :  { %3273 = vadd.xlane.f32.xlu2 %v3263_v37  ;;  %v3265_v26 = vsel %vm3252_vm14, %v3228_v46, %v3264_v62 }
 0x6a3   :  { %v2973_v51 = vrot.slane %v2972_v25, 2  ;;  %v3232_v58 = vmul.f32 %v5802_v57, %v5802_v57  ;;  %v3266_v49 = vsel %vm3254_vm15, %v3229_v5, %v3265_v26 }
 0x6a4   :  { %v3267_v43 = vsel %vm3256_vm3, %v3230_v7, %v3266_v49 }
 0x6a5   :  { %v2974_v20 = vadd.f32 %v2973_v51, %v2972_v25  ;;  %v3268_v36 = vsel %vm3258_vm7, %v3231_v50, %v3267_v43 }
 0x6a6   :  { %v3269_v4 = vsel %vm3260_vm8, %v3232_v58, %v3268_v36 }
 0x6a7   :  { %v2975_v60 = vrot.slane %v2974_v20, 1 }
 0x6a9   :  { %v2976_v24 = vadd.f32 %v2975_v60, %v2974_v20 }
 0x6ab   :  { %v5818_v47 = vmul.f32 %v3200_v27, %v2976_v24 }
 0x6ad   :  { %v3233_v21 = vmul.f32 %v5818_v47, %v5818_v47 }
 0x6af   :  { %v3270_v19 = vsel %vm3262_vm9, %v3233_v21, %v3269_v4 }
 0x6b0   :  { %3275 = vadd.xlane.f32.xlu1 %v3270_v19 }
 0x715   :  { %v3274_v33 = vpop.xlane.xlu2 %3273 }
 0x716   :  { %v3277_v29 = vadd.f32 1e-12, %v3274_v33 }
 0x718   :  { %4004 = vrsqrt.f32 %v3277_v29  ;;  %vm3285_vm11 = vweird.f32 %v3277_v29 }
 0x71e   :  { %v4005_v9 = vpop.eup %4004 }
 0x71f   :  { %v3280_v1 = vmul.f32 %v4005_v9, %v3277_v29  ;;  %vm3286_vm10 = vweird.f32 %v4005_v9 }
 0x720   :  { %vm3287_vm12 = vmor %vm3285_vm11, %vm3286_vm10 }
 0x721   :  { %v3281_v59 = vmul.f32 %v4005_v9, %v3280_v1 }
 0x723   :  { %v3282_v41 = vmul.f32 0.5, %v3281_v59  ;;  %v3276_v14 = vpop.xlane.xlu1 %3275 }
 0x724   :  { %v3278_v30 = vadd.f32 1e-12, %v3276_v14 }
 0x725   :  { %v3283_v55 = vsub.f32 1.5, %v3282_v41 }
 0x726   :  { %4006 = vrsqrt.f32 %v3278_v30  ;;  %vm3295_vm1 = vweird.f32 %v3278_v30 }
 0x727   :  { %v3284_v13 = vmul.f32 %v4005_v9, %v3283_v55 }
 0x729   :  { %v3288_v40 = vsel %vm3287_vm12, %v4005_v9, %v3284_v13 }
 0x72a   :  { %v3301_v45 = vrot.slane %v3288_v40, 1  ;;  %v3302_v34 = vrot.slane %v3288_v40, 2  ;;  %v3303_v8 = vrot.slane %v3288_v40, 3  ;;  %v3304_v23 = vrot.slane %v3288_v40, 4 }
 0x72b   :  { %v3305_v12 = vrot.slane %v3288_v40, 5  ;;  %v3306_v28 = vrot.slane %v3288_v40, 6  ;;  %v3307_v53 = vrot.slane %v3288_v40, 7  ;;  %v3331_v15 = vmul.f32 %v3288_v40, %v5554_v35 }
 0x72c   :  { %v4007_v31 = vpop.eup %4006  ;;  %v3332_v0 = vmul.f32 %v3301_v45, %v5684_v6  ;;  %v3333_v25 = vmul.f32 %v3302_v34, %v5729_v63  ;;  %v3334_v37 = vmul.f32 %v3303_v8, %v5735_v18  ;;  %v3335_v51 = vmul.f32 %v3304_v23, %v5755_v48 }
 0x72d   :  { %v3290_v42 = vmul.f32 %v4007_v31, %v3278_v30  ;;  %v3336_v61 = vmul.f32 %v3305_v12, %v5762_v32  ;;  %v3337_v20 = vmul.f32 %v3306_v28, %v5766_v56  ;;  %v3338_v6 = vmul.f32 %v3307_v53, %v5776_v17 }
 0x72e   :  { %v3363_v39 = vrot.slane %v3332_v0, 7  ;;  %v3365_v38 = vrot.slane %v3333_v25, 6  ;;  %v3367_v54 = vrot.slane %v3334_v37, 5  ;;  %v3369_v60 = vrot.slane %v3335_v51, 4 }
 0x72f   :  { %v3291_v16 = vmul.f32 %v4007_v31, %v3290_v42  ;;  %v3371_v10 = vrot.slane %v3336_v61, 3  ;;  %vm3296_vm0 = vweird.f32 %v4007_v31  ;;  %v3373_v32 = vrot.slane %v3337_v20, 2 }
 0x730   :  { %v3364_v63 = vsel %vm3250_vm13, %v3363_v39, %v3331_v15  ;;  %v3375_v56 = vrot.slane %v3338_v6, 1  ;;  %vm3297_vm2 = vmor %vm3295_vm1, %vm3296_vm0 }
 0x731   :  { %v3292_v46 = vmul.f32 0.5, %v3291_v16  ;;  %v3366_v18 = vsel %vm3252_vm14, %v3365_v38, %v3364_v63 }
 0x732   :  { %v3368_v48 = vsel %vm3254_vm15, %v3367_v54, %v3366_v18 }
 0x733   :  { %v3293_v35 = vsub.f32 1.5, %v3292_v46  ;;  %v3370_v5 = vsel %vm3256_vm3, %v3369_v60, %v3368_v48 }
 0x734   :  { %v3372_v7 = vsel %vm3258_vm7, %v3371_v10, %v3370_v5 }
 0x735   :  { %v3294_v24 = vmul.f32 %v4007_v31, %v3293_v35  ;;  %v3374_v17 = vsel %vm3260_vm8, %v3373_v32, %v3372_v7 }
 0x736   :  { %v3376_v50 = vsel %vm3262_vm9, %v3375_v56, %v3374_v17 }
 0x737   :  { %v3298_v62 = vsel %vm3297_vm2, %v4007_v31, %v3294_v24  ;;  %3393 = vst [vmem:[#allocation10] sm:$0xff] %v3376_v50 }
 0x738   :  { %v3308_v58 = vrot.slane %v3298_v62, 1  ;;  %v3309_v27 = vrot.slane %v3298_v62, 2  ;;  %v3310_v26 = vrot.slane %v3298_v62, 3  ;;  %v3311_v49 = vrot.slane %v3298_v62, 4 }
 0x739   :  { %v3312_v43 = vrot.slane %v3298_v62, 5  ;;  %v3313_v21 = vrot.slane %v3298_v62, 6  ;;  %v3314_v33 = vrot.slane %v3298_v62, 7  ;;  %v3339_v9 = vmul.f32 %v3298_v62, %v5790_v44 }
 0x73a   :  { %v3340_v36 = vmul.f32 %v3308_v58, %v5783_v22  ;;  %v3341_v4 = vmul.f32 %v3309_v27, %v5787_v3  ;;  %v3342_v19 = vmul.f32 %v3310_v26, %v5793_v11  ;;  %v3343_v29 = vmul.f32 %v3311_v49, %v5796_v52 }
 0x73b   :  { %v3344_v41 = vmul.f32 %v3312_v43, %v5798_v2  ;;  %v3345_v14 = vmul.f32 %v3313_v21, %v5802_v57  ;;  %v3346_v55 = vmul.f32 %v3314_v33, %v5818_v47 }
 0x73c   :  { %v3377_v1 = vrot.slane %v3340_v36, 7  ;;  %v3379_v59 = vrot.slane %v3341_v4, 6  ;;  %v3381_v30 = vrot.slane %v3342_v19, 5  ;;  %v3383_v13 = vrot.slane %v3343_v29, 4 }
 0x73d   :  { %v3385_v11 = vrot.slane %v3344_v41, 3  ;;  %v3387_v2 = vrot.slane %v3345_v14, 2  ;;  %v3389_v47 = vrot.slane %v3346_v55, 1 }
 0x73e   :  { %v3378_v22 = vsel %vm3250_vm13, %v3377_v1, %v3339_v9 }
 0x73f   :  { %v3380_v3 = vsel %vm3252_vm14, %v3379_v59, %v3378_v22 }
 0x740   :  { %v3382_v44 = vsel %vm3254_vm15, %v3381_v30, %v3380_v3 }
 0x741   :  { %v3384_v52 = vsel %vm3256_vm3, %v3383_v13, %v3382_v44 }
 0x742   :  { %v3386_v57 = vsel %vm3258_vm7, %v3385_v11, %v3384_v52 }
 0x743   :  { %v3388_v40 = vsel %vm3260_vm8, %v3387_v2, %v3386_v57 }
 0x744   :  { %v3390_v45 = vsel %vm3262_vm9, %v3389_v47, %v3388_v40 }
 0x745   :  { %3394 = vst [vmem:[#allocation10 + $0x8] sm:$0xff] %v3390_v45 }
 0x746   :  { %3407 = dma.vmem_to_hbm [thread:$0]  %s3400_s12, 256, %s3402_s9, [#allocation4], %s4146_s30, %s4146_s30, %s4147_s14  }
 0x747   :  { %4134 = dma.done.wait [#allocation4], 256  }
 0x748   :  { %4135 = vsyncadd [#allocation4], 4294967040 }
 0x749   :  { %3412 = vsyncpa [#allocation3], 1 }
 0x74a   :  { %3413 = vsyncpa [#allocation6], 1 }
 0x74b   :  { %3414 = vsyncpa [#allocation9], 1 }
 0x74c   :  { %3415 = vsyncpa [#allocation4], 1 }

</bundles_post_ra>
